<compile_context>
chip_gen: v6e
topology: v6e:2x2x1
jax: 0.10.0
libtpu: 0.0.40
codegen_flags: <defaults>
</compile_context>

<pallas_src>
import jax
import jax.numpy as jnp
from jax.experimental import pallas as pl
from jax.experimental.pallas import tpu as pltpu

LANE = 128  # channel padding target (lane width)


def _round_up(x, m):
    return ((x + m - 1) // m) * m


# ---------------------------------------------------------------------------
# Kernel 1: im2col GEMM + fused BN affine + ReLU   (layer1 only, K = 27)
# ---------------------------------------------------------------------------

def _gemm_bn_relu_kernel(p_ref, w_ref, scale_ref, bias_ref, o_ref):
    # bf16 operands on the MXU, f32 accumulate + epilogue on the VPU.
    acc = jnp.dot(p_ref[...], w_ref[...], preferred_element_type=jnp.float32)
    y = jnp.maximum(acc * scale_ref[...] + bias_ref[...], 0.0)
    o_ref[...] = y.astype(o_ref.dtype)


def conv_gemm_bn_relu(patches, w2, scale, bias, *, tm=256):
    M, K = patches.shape
    Cout = w2.shape[1]
    tm = min(tm, _round_up(M, 8))
    Mp = _round_up(M, tm)
    if Mp != M:
        patches = jnp.pad(patches, ((0, Mp - M), (0, 0)))
    cost = pl.CostEstimate(
        flops=2 * Mp * K * Cout, transcendentals=0,
        bytes_accessed=Mp * K * 2 + K * Cout * 2 + Mp * Cout * 2 + 2 * Cout * 4)
    return pl.pallas_call(
        _gemm_bn_relu_kernel,
        out_shape=jax.ShapeDtypeStruct((Mp, Cout), jnp.bfloat16),
        grid_spec=pltpu.PrefetchScalarGridSpec(
            num_scalar_prefetch=0,
            grid=(Mp // tm,),
            in_specs=[
                pl.BlockSpec((tm, K), lambda i: (i, 0)),      # im2col patches
                pl.BlockSpec((K, Cout), lambda i: (0, 0)),    # flattened weight
                pl.BlockSpec((1, Cout), lambda i: (0, 0)),    # BN scale
                pl.BlockSpec((1, Cout), lambda i: (0, 0)),    # BN bias
            ],
            out_specs=pl.BlockSpec((tm, Cout), lambda i: (i, 0)),
        ),
        compiler_params=pltpu.CompilerParams(
            dimension_semantics=("parallel",)),
        cost_estimate=cost,
    )(patches, w2, scale, bias)


# ---------------------------------------------------------------------------
# Kernel 2: fused 3x3 / stride-1 conv + BN + ReLU   (layer2, layer3)
# ---------------------------------------------------------------------------

def _conv3x3_s1_bn_relu_kernel(x_ref, w_ref, scale_ref, bias_ref, o_ref):
    # x_ref : (3, TR, Wp, C)  bf16 -- 3 dy-shifted row slabs (full padded width)
    # w_ref : (9*C, Cout)     bf16 -- rows ordered (dy, dx, cin)
    # scale/bias : (1, Cout)  f32  -- folded BatchNorm affine
    # o_ref : (TR, W, Cout)   bf16
    C = x_ref.shape[-1]
    TR, W, Cout = o_ref.shape
    scale = scale_ref[...]
    bias = bias_ref[...]
    for t in range(TR):
        acc = jnp.zeros((W, Cout), jnp.float32)
        for dy in range(3):
            xrow = x_ref[dy, t, :, :]                        # (Wp, C) bf16
            for dx in range(3):
                k = dy * 3 + dx
                wk = w_ref[k * C:(k + 1) * C, :]             # (C, Cout) bf16
                # full-width GEMM, then the dx tap is a cheap f32 row shift
                p = jnp.dot(xrow, wk, preferred_element_type=jnp.float32)
                acc = acc + p[dx:dx + W, :]
        o_ref[t, :, :] = jnp.maximum(acc * scale + bias, 0.0).astype(o_ref.dtype)


def conv3x3_s1_bn_relu(x, w2, scale, bias, *, tr=8):
    """x: (N, H, W, 128) bf16 -> (N, H, W, Cout). 3x3 conv, stride 1, pad 1."""
    N, H, W, C = x.shape
    Cout = w2.shape[1]
    Wp = W + 2
    xp = jnp.pad(x, ((0, 0), (1, 1), (1, 1), (0, 0)))
    # Only 3 dy-shifted views are materialized; the 3 dx taps are applied
    # in-kernel -> no 9x im2col buffer in HBM.
    x3 = jnp.stack([xp[:, dy:dy + H, :, :] for dy in range(3)], axis=0)
    x3 = x3.reshape(3, N * H, Wp, C)
    M = N * H
    Mp = _round_up(M, tr)
    if Mp != M:
        x3 = jnp.pad(x3, ((0, 0), (0, Mp - M), (0, 0), (0, 0)))
    cost = pl.CostEstimate(
        flops=2 * Mp * 9 * Wp * C * Cout, transcendentals=0,
        bytes_accessed=x3.size * 2 + w2.size * 2 + Mp * W * Cout * 2 + 2 * Cout * 4)
    out = pl.pallas_call(
        _conv3x3_s1_bn_relu_kernel,
        out_shape=jax.ShapeDtypeStruct((Mp, W, Cout), jnp.bfloat16),
        grid_spec=pltpu.PrefetchScalarGridSpec(
            num_scalar_prefetch=0,
            grid=(Mp // tr,),
            in_specs=[
                pl.BlockSpec((3, tr, Wp, C), lambda r: (0, r, 0, 0)),
                pl.BlockSpec((9 * C, Cout), lambda r: (0, 0)),   # resident weight
                pl.BlockSpec((1, Cout), lambda r: (0, 0)),
                pl.BlockSpec((1, Cout), lambda r: (0, 0)),
            ],
            out_specs=pl.BlockSpec((tr, W, Cout), lambda r: (r, 0, 0)),
        ),
        compiler_params=pltpu.CompilerParams(
            dimension_semantics=("parallel",)),
        cost_estimate=cost,
    )(x3, w2, scale, bias)
    return out[:M].reshape(N, H, W, Cout)


# ---------------------------------------------------------------------------
# Kernel 3: tiled 3x3 / stride-2 max pool
# ---------------------------------------------------------------------------

def _maxpool_kernel(w_ref, o_ref):
    o_ref[...] = jnp.max(w_ref[...], axis=0)


def maxpool_3x3_s2(x, *, tmp=512):
    """3x3 / stride-2 / pad-1 max pool on NHWC (inputs are post-ReLU, >= 0)."""
    N, H, W, C = x.shape
    Ho = (H + 2 - 3) // 2 + 1
    Wo = (W + 2 - 3) // 2 + 1
    # TODO(synk): fuse the 9-tap max into the layer3 epilogue to remove this
    #             9x window materialization entirely.
    xp = jnp.pad(x, ((0, 0), (1, 1), (1, 1), (0, 0)))   # 0-pad is exact post-ReLU
    wins = jnp.stack(
        [xp[:, dy:dy + 2 * Ho:2, dx:dx + 2 * Wo:2, :]
         for dy in range(3) for dx in range(3)], axis=0)  # (9, N, Ho, Wo, C)
    M = N * Ho * Wo
    wins = wins.reshape(9, M, C)
    tmp = min(tmp, _round_up(M, 8))
    Mp = _round_up(M, tmp)
    if Mp != M:
        wins = jnp.pad(wins, ((0, 0), (0, Mp - M), (0, 0)))
    out = pl.pallas_call(
        _maxpool_kernel,
        out_shape=jax.ShapeDtypeStruct((Mp, C), x.dtype),
        grid_spec=pltpu.PrefetchScalarGridSpec(
            num_scalar_prefetch=0,
            grid=(Mp // tmp,),
            in_specs=[pl.BlockSpec((9, tmp, C), lambda i: (0, i, 0))],
            out_specs=pl.BlockSpec((tmp, C), lambda i: (i, 0)),
        ),
        compiler_params=pltpu.CompilerParams(
            dimension_semantics=("parallel",)),
    )(wins)
    return out[:M].reshape(N, Ho, Wo, C)


# ---------------------------------------------------------------------------
# One-time parameter preparation (BN folding, channel padding, bf16 casts)
# ---------------------------------------------------------------------------

def _fold_bn(p, cout_pad):
    eps = 1e-5
    cout = p["gamma"].shape[0]
    inv_std = p["gamma"] / jnp.sqrt(p["var"] + eps)
    scale = jnp.zeros((1, cout_pad), jnp.float32).at[0, :cout].set(inv_std)
    bias = jnp.zeros((1, cout_pad), jnp.float32).at[0, :cout].set(
        p["beta"] - p["mean"] * inv_std)
    return scale, bias


def prepare_params(params):
    prep = {}
    # layer1: HWIO (3,3,3,64) -> (27, 128) bf16 (Cout zero-padded to 128).
    w = params["layer1"]["w"]
    kh, kw, cin, cout = w.shape
    w1 = jnp.zeros((kh * kw * cin, LANE), jnp.float32)
    w1 = w1.at[:, :cout].set(w.reshape(kh * kw * cin, cout))
    s1, b1 = _fold_bn(params["layer1"], LANE)
    prep["layer1"] = {"w": w1.astype(jnp.bfloat16), "scale": s1, "bias": b1}
    # layer2/3: HWIO (3,3,cin,cout) -> (9*128, 128) bf16 (cin & cout padded).
    for name in ("layer2", "layer3"):
        w = params[name]["w"]
        kh, kw, cin, cout = w.shape
        wp = jnp.zeros((kh, kw, LANE, LANE), jnp.float32)
        wp = wp.at[:, :, :cin, :cout].set(w)
        s, b = _fold_bn(params[name], LANE)
        prep[name] = {"w": wp.reshape(kh * kw * LANE, LANE).astype(jnp.bfloat16),
                      "scale": s, "bias": b}
    return prep


# ---------------------------------------------------------------------------
# JAX glue: im2col (layer1 only) and the full stem forward
# ---------------------------------------------------------------------------

def _extract_conv_patches(x, ksize, stride, padding):
    N, H, W, C = x.shape
    xp = jnp.pad(x, ((0, 0), (padding, padding), (padding, padding), (0, 0)))
    Ho = (H + 2 * padding - ksize) // stride + 1
    Wo = (W + 2 * padding - ksize) // stride + 1
    cols = [xp[:, dy:dy + stride * Ho:stride, dx:dx + stride * Wo:stride, :]
            for dy in range(ksize) for dx in range(ksize)]
    patches = jnp.stack(cols, axis=3)               # (N, Ho, Wo, k*k, C)
    return patches.reshape(N * Ho * Wo, ksize * ksize * C), Ho, Wo


def feature_map_convolution(x_nchw, prep):
    """(N, 3, H, W) -> (N, 128, H//4, W//4); same semantics as the PyTorch stem."""
    N = x_nchw.shape[0]
    x = jnp.transpose(x_nchw, (0, 2, 3, 1)).astype(jnp.bfloat16)   # NCHW -> NHWC
    # layer1: 3x3 / stride 2 conv via im2col GEMM (Cin=3 -> K=27, negligible).
    p1 = prep["layer1"]
    patches, Ho, Wo = _extract_conv_patches(x, 3, 2, 1)
    y = conv_gemm_bn_relu(patches, p1["w"], p1["scale"], p1["bias"])
    y = y[:N * Ho * Wo].reshape(N, Ho, Wo, LANE)
    # layer2 / layer3: fused 3x3 / stride 1 conv + BN + ReLU (no im2col).
    for name in ("layer2", "layer3"):
        p = prep[name]
        y = conv3x3_s1_bn_relu(y, p["w"], p["scale"], p["bias"])
    # layer4: 3x3 / stride 2 max pool.
    y = maxpool_3x3_s2(y)
    return jnp.transpose(y, (0, 3, 1, 2)).astype(jnp.float32)      # NHWC -> NCHW


# ---------------------------------------------------------------------------
# Pure-JAX reference (mirrors the kernel's bf16-operand / f32-accumulate policy)
# ---------------------------------------------------------------------------

def _reference(x_nchw, params):
    x = jnp.transpose(x_nchw, (0, 2, 3, 1)).astype(jnp.bfloat16)
    eps = 1e-5
    for name, stride in (("layer1", 2), ("layer2", 1), ("layer3", 1)):
        p = params[name]
        y = jax.lax.conv_general_dilated(
            x, p["w"].astype(jnp.bfloat16),
            window_strides=(stride, stride), padding=((1, 1), (1, 1)),
            dimension_numbers=("NHWC", "HWIO", "NHWC"),
            preferred_element_type=jnp.float32)
        inv_std = p["gamma"] / jnp.sqrt(p["var"] + eps)
        y = y * inv_std + (p["beta"] - p["mean"] * inv_std)
        x = jnp.maximum(y, 0.0).astype(jnp.bfloat16)
    x = jax.lax.reduce_window(
        x, jnp.array(-jnp.inf, x.dtype), jax.lax.max,
        window_dimensions=(1, 3, 3, 1), window_strides=(1, 2, 2, 1),
        padding=((0, 0), (1, 1), (1, 1), (0, 0)))
    return jnp.transpose(x, (0, 3, 1, 2)).astype(jnp.float32)


# ---------------------------------------------------------------------------
# Main
# ---------------------------------------------------------------------------

if __name__ == "__main__":
    key = jax.random.PRNGKey(0)
    kx, kp = jax.random.split(key)

    # Small synthetic input consistent with the module: NCHW, 3 channels.
    x = jax.random.normal(kx, (2, 3, 16, 16), jnp.float32)

    def init_conv_bn(k, cin, cout):
        k1, k2, k3, k4, k5 = jax.random.split(k, 5)
        fan_in = cin * 9
        return {
            "w": jax.random.normal(k1, (3, 3, cin, cout), jnp.float32)
                 * (2.0 / fan_in) ** 0.5,                       # HWIO
            "gamma": 1.0 + 0.1 * jax.random.normal(k2, (cout,), jnp.float32),
            "beta": 0.1 * jax.random.normal(k3, (cout,), jnp.float32),
            "mean": 0.1 * jax.random.normal(k4, (cout,), jnp.float32),
            "var": 0.5 + jnp.abs(jax.random.normal(k5, (cout,), jnp.float32)),
        }

    k1, k2, k3 = jax.random.split(kp, 3)
    params = {
        "layer1": init_conv_bn(k1, 3, 64),
        "layer2": init_conv_bn(k2, 64, 64),
        "layer3": init_conv_bn(k3, 64, 128),
    }

    prep = prepare_params(params)     # BN folding / padding / casts hoisted out
    out = jax.jit(feature_map_convolution)(x, prep)
    out = jax.block_until_ready(out)
    assert out.shape == (2, 128, 4, 4), out.shape

    ref = _reference(x, params)
    err = float(jnp.max(jnp.abs(out - ref)))
    assert jnp.allclose(out, ref, rtol=2e-2, atol=2e-2), err

    print("KERNEL_OK")
</pallas_src>

<mosaic_0001>
module attributes {stable_mosaic.version = 11 : i64} {
  func.func @_gemm_bn_relu_kernel(%arg0: i32, %arg1: memref<128x27xbf16, #tpu.memory_space<vmem>>, %arg2: memref<27x128xbf16, #tpu.memory_space<vmem>>, %arg3: memref<1x128xf32, #tpu.memory_space<vmem>>, %arg4: memref<1x128xf32, #tpu.memory_space<vmem>>, %arg5: memref<128x128xbf16, #tpu.memory_space<vmem>>) attributes {dimension_semantics = [#tpu.dimension_semantics<parallel>], iteration_bounds = array<i64: 1>, scalar_prefetch = 0 : i64, scratch_operands = 0 : i64, tpu.core_type = #tpu.core_type<tc>, window_params = [{transform_indices = @transform_0, window_bounds = array<i64: 128, 27>}, {pipeline_mode = #tpu.pipeline_mode<synchronous>, transform_indices = @transform_1, window_bounds = array<i64: 27, 128>}, {pipeline_mode = #tpu.pipeline_mode<synchronous>, transform_indices = @transform_2, window_bounds = array<i64: 1, 128>}, {pipeline_mode = #tpu.pipeline_mode<synchronous>, transform_indices = @transform_3, window_bounds = array<i64: 1, 128>}, {transform_indices = @transform_4, window_bounds = array<i64: 128, 128>}]} {
    %c0 = arith.constant 0 : index
    %c0_0 = arith.constant 0 : index
    %0 = vector.load %arg1[%c0, %c0_0] : memref<128x27xbf16, #tpu.memory_space<vmem>>, vector<128x27xbf16>
    %c0_1 = arith.constant 0 : index
    %c0_2 = arith.constant 0 : index
    %1 = vector.load %arg2[%c0_1, %c0_2] : memref<27x128xbf16, #tpu.memory_space<vmem>>, vector<27x128xbf16>
    %cst = arith.constant dense<0.000000e+00> : vector<128x128xf32>
    %2 = tpu.matmul %0, %1, %cst {dimension_numbers = #tpu.dot_dimension_numbers<[1], [0], [0], [1], [0, 0, 1, 1], [], []>} : vector<128x27xbf16>, vector<27x128xbf16>, vector<128x128xf32> -> vector<128x128xf32>
    %c0_3 = arith.constant 0 : index
    %c0_4 = arith.constant 0 : index
    %3 = vector.load %arg3[%c0_3, %c0_4] : memref<1x128xf32, #tpu.memory_space<vmem>>, vector<1x128xf32>
    %4 = vector.broadcast %3 : vector<1x128xf32> to vector<128x128xf32>
    %5 = arith.mulf %2, %4 : vector<128x128xf32>
    %c0_5 = arith.constant 0 : index
    %c0_6 = arith.constant 0 : index
    %6 = vector.load %arg4[%c0_5, %c0_6] : memref<1x128xf32, #tpu.memory_space<vmem>>, vector<1x128xf32>
    %7 = vector.broadcast %6 : vector<1x128xf32> to vector<128x128xf32>
    %8 = arith.addf %5, %7 : vector<128x128xf32>
    %cst_7 = arith.constant 0.000000e+00 : f32
    %9 = vector.broadcast %cst_7 : f32 to vector<128x128xf32>
    %10 = arith.maximumf %8, %9 : vector<128x128xf32>
    %11 = arith.truncf %10 : vector<128x128xf32> to vector<128x128xbf16>
    %c0_8 = arith.constant 0 : index
    %c0_9 = arith.constant 0 : index
    %12 = vector.load %arg5[%c0_8, %c0_9] : memref<128x128xbf16, #tpu.memory_space<vmem>>, vector<128x128xbf16>
    tpu.vector_store %arg5[%c0_8, %c0_9], %11 {strides = array<i32>} : memref<128x128xbf16, #tpu.memory_space<vmem>>, vector<128x128xbf16>,
    return
  }
  func.func @transform_0(%arg0: i32) -> (i32, i32) {
    %c0_i32 = arith.constant 0 : i32
    %c0_i32_0 = arith.constant 0 : i32
    return %arg0, %c0_i32 : i32, i32
  }
  func.func @transform_1(%arg0: i32) -> (i32, i32) {
    %c0_i32 = arith.constant 0 : i32
    %c0_i32_0 = arith.constant 0 : i32
    %c0_i32_1 = arith.constant 0 : i32
    return %c0_i32, %c0_i32_0 : i32, i32
  }
  func.func @transform_2(%arg0: i32) -> (i32, i32) {
    %c0_i32 = arith.constant 0 : i32
    %c0_i32_0 = arith.constant 0 : i32
    %c0_i32_1 = arith.constant 0 : i32
    return %c0_i32, %c0_i32_0 : i32, i32
  }
  func.func @transform_3(%arg0: i32) -> (i32, i32) {
    %c0_i32 = arith.constant 0 : i32
    %c0_i32_0 = arith.constant 0 : i32
    %c0_i32_1 = arith.constant 0 : i32
    return %c0_i32, %c0_i32_0 : i32, i32
  }
  func.func @transform_4(%arg0: i32) -> (i32, i32) {
    %c0_i32 = arith.constant 0 : i32
    %c0_i32_0 = arith.constant 0 : i32
    return %arg0, %c0_i32 : i32, i32
  }
}

module attributes {stable_mosaic.version = 11 : i64} {
  func.func @_conv3x3_s1_bn_relu_kernel(%arg0: i32, %arg1: memref<3x8x10x128xbf16, #tpu.memory_space<vmem>>, %arg2: memref<1152x128xbf16, #tpu.memory_space<vmem>>, %arg3: memref<1x128xf32, #tpu.memory_space<vmem>>, %arg4: memref<1x128xf32, #tpu.memory_space<vmem>>, %arg5: memref<8x8x128xbf16, #tpu.memory_space<vmem>>) attributes {dimension_semantics = [#tpu.dimension_semantics<parallel>], iteration_bounds = array<i64: 2>, scalar_prefetch = 0 : i64, scratch_operands = 0 : i64, tpu.core_type = #tpu.core_type<tc>, window_params = [{transform_indices = @transform_0, window_bounds = array<i64: 3, 8, 10, 128>}, {pipeline_mode = #tpu.pipeline_mode<synchronous>, transform_indices = @transform_1, window_bounds = array<i64: 1152, 128>}, {pipeline_mode = #tpu.pipeline_mode<synchronous>, transform_indices = @transform_2, window_bounds = array<i64: 1, 128>}, {pipeline_mode = #tpu.pipeline_mode<synchronous>, transform_indices = @transform_3, window_bounds = array<i64: 1, 128>}, {transform_indices = @transform_4, window_bounds = array<i64: 8, 8, 128>}]} {
    %c0 = arith.constant 0 : index
    %c0_0 = arith.constant 0 : index
    %0 = vector.load %arg3[%c0, %c0_0] : memref<1x128xf32, #tpu.memory_space<vmem>>, vector<1x128xf32>
    %c0_1 = arith.constant 0 : index
    %c0_2 = arith.constant 0 : index
    %1 = vector.load %arg4[%c0_1, %c0_2] : memref<1x128xf32, #tpu.memory_space<vmem>>, vector<1x128xf32>
    %cst = arith.constant 0.000000e+00 : f32
    %2 = vector.broadcast %cst : f32 to vector<8x128xf32>
    %c0_3 = arith.constant 0 : index
    %c0_4 = arith.constant 0 : index
    %c0_5 = arith.constant 0 : index
    %c0_6 = arith.constant 0 : index
    %3 = vector.load %arg1[%c0_3, %c0_4, %c0_5, %c0_6] : memref<3x8x10x128xbf16, #tpu.memory_space<vmem>>, vector<1x1x10x128xbf16>
    %4 = vector.shape_cast %3 : vector<1x1x10x128xbf16> to vector<10x128xbf16>
    %c0_7 = arith.constant 0 : index
    %c0_8 = arith.constant 0 : index
    %5 = vector.load %arg2[%c0_7, %c0_8] : memref<1152x128xbf16, #tpu.memory_space<vmem>>, vector<128x128xbf16>
    %cst_9 = arith.constant dense<0.000000e+00> : vector<10x128xf32>
    %6 = tpu.matmul %4, %5, %cst_9 {dimension_numbers = #tpu.dot_dimension_numbers<[1], [0], [0], [1], [0, 0, 1, 1], [], []>} : vector<10x128xbf16>, vector<128x128xbf16>, vector<10x128xf32> -> vector<10x128xf32>
    %7 = vector.extract_strided_slice %6 {offsets = [0, 0], sizes = [8, 128], strides = [1, 1]} : vector<10x128xf32> to vector<8x128xf32>
    %8 = arith.addf %2, %7 : vector<8x128xf32>
    %c128 = arith.constant 128 : index
    %c0_10 = arith.constant 0 : index
    %9 = vector.load %arg2[%c128, %c0_10] : memref<1152x128xbf16, #tpu.memory_space<vmem>>, vector<128x128xbf16>
    %cst_11 = arith.constant dense<0.000000e+00> : vector<10x128xf32>
    %10 = tpu.matmul %4, %9, %cst_11 {dimension_numbers = #tpu.dot_dimension_numbers<[1], [0], [0], [1], [0, 0, 1, 1], [], []>} : vector<10x128xbf16>, vector<128x128xbf16>, vector<10x128xf32> -> vector<10x128xf32>
    %11 = vector.extract_strided_slice %10 {offsets = [1, 0], sizes = [8, 128], strides = [1, 1]} : vector<10x128xf32> to vector<8x128xf32>
    %12 = arith.addf %8, %11 : vector<8x128xf32>
    %c256 = arith.constant 256 : index
    %c0_12 = arith.constant 0 : index
    %13 = vector.load %arg2[%c256, %c0_12] : memref<1152x128xbf16, #tpu.memory_space<vmem>>, vector<128x128xbf16>
    %cst_13 = arith.constant dense<0.000000e+00> : vector<10x128xf32>
    %14 = tpu.matmul %4, %13, %cst_13 {dimension_numbers = #tpu.dot_dimension_numbers<[1], [0], [0], [1], [0, 0, 1, 1], [], []>} : vector<10x128xbf16>, vector<128x128xbf16>, vector<10x128xf32> -> vector<10x128xf32>
    %15 = vector.extract_strided_slice %14 {offsets = [2, 0], sizes = [8, 128], strides = [1, 1]} : vector<10x128xf32> to vector<8x128xf32>
    %16 = arith.addf %12, %15 : vector<8x128xf32>
    %c1 = arith.constant 1 : index
    %c0_14 = arith.constant 0 : index
    %c0_15 = arith.constant 0 : index
    %c0_16 = arith.constant 0 : index
    %17 = vector.load %arg1[%c1, %c0_14, %c0_15, %c0_16] : memref<3x8x10x128xbf16, #tpu.memory_space<vmem>>, vector<1x1x10x128xbf16>
    %18 = vector.shape_cast %17 : vector<1x1x10x128xbf16> to vector<10x128xbf16>
    %c384 = arith.constant 384 : index
    %c0_17 = arith.constant 0 : index
    %19 = vector.load %arg2[%c384, %c0_17] : memref<1152x128xbf16, #tpu.memory_space<vmem>>, vector<128x128xbf16>
    %cst_18 = arith.constant dense<0.000000e+00> : vector<10x128xf32>
    %20 = tpu.matmul %18, %19, %cst_18 {dimension_numbers = #tpu.dot_dimension_numbers<[1], [0], [0], [1], [0, 0, 1, 1], [], []>} : vector<10x128xbf16>, vector<128x128xbf16>, vector<10x128xf32> -> vector<10x128xf32>
    %21 = vector.extract_strided_slice %20 {offsets = [0, 0], sizes = [8, 128], strides = [1, 1]} : vector<10x128xf32> to vector<8x128xf32>
    %22 = arith.addf %16, %21 : vector<8x128xf32>
    %c512 = arith.constant 512 : index
    %c0_19 = arith.constant 0 : index
    %23 = vector.load %arg2[%c512, %c0_19] : memref<1152x128xbf16, #tpu.memory_space<vmem>>, vector<128x128xbf16>
    %cst_20 = arith.constant dense<0.000000e+00> : vector<10x128xf32>
    %24 = tpu.matmul %18, %23, %cst_20 {dimension_numbers = #tpu.dot_dimension_numbers<[1], [0], [0], [1], [0, 0, 1, 1], [], []>} : vector<10x128xbf16>, vector<128x128xbf16>, vector<10x128xf32> -> vector<10x128xf32>
    %25 = vector.extract_strided_slice %24 {offsets = [1, 0], sizes = [8, 128], strides = [1, 1]} : vector<10x128xf32> to vector<8x128xf32>
    %26 = arith.addf %22, %25 : vector<8x128xf32>
    %c640 = arith.constant 640 : index
    %c0_21 = arith.constant 0 : index
    %27 = vector.load %arg2[%c640, %c0_21] : memref<1152x128xbf16, #tpu.memory_space<vmem>>, vector<128x128xbf16>
    %cst_22 = arith.constant dense<0.000000e+00> : vector<10x128xf32>
    %28 = tpu.matmul %18, %27, %cst_22 {dimension_numbers = #tpu.dot_dimension_numbers<[1], [0], [0], [1], [0, 0, 1, 1], [], []>} : vector<10x128xbf16>, vector<128x128xbf16>, vector<10x128xf32> -> vector<10x128xf32>
    %29 = vector.extract_strided_slice %28 {offsets = [2, 0], sizes = [8, 128], strides = [1, 1]} : vector<10x128xf32> to vector<8x128xf32>
    %30 = arith.addf %26, %29 : vector<8x128xf32>
    %c2 = arith.constant 2 : index
    %c0_23 = arith.constant 0 : index
    %c0_24 = arith.constant 0 : index
    %c0_25 = arith.constant 0 : index
    %31 = vector.load %arg1[%c2, %c0_23, %c0_24, %c0_25] : memref<3x8x10x128xbf16, #tpu.memory_space<vmem>>, vector<1x1x10x128xbf16>
    %32 = vector.shape_cast %31 : vector<1x1x10x128xbf16> to vector<10x128xbf16>
    %c768 = arith.constant 768 : index
    %c0_26 = arith.constant 0 : index
    %33 = vector.load %arg2[%c768, %c0_26] : memref<1152x128xbf16, #tpu.memory_space<vmem>>, vector<128x128xbf16>
    %cst_27 = arith.constant dense<0.000000e+00> : vector<10x128xf32>
    %34 = tpu.matmul %32, %33, %cst_27 {dimension_numbers = #tpu.dot_dimension_numbers<[1], [0], [0], [1], [0, 0, 1, 1], [], []>} : vector<10x128xbf16>, vector<128x128xbf16>, vector<10x128xf32> -> vector<10x128xf32>
    %35 = vector.extract_strided_slice %34 {offsets = [0, 0], sizes = [8, 128], strides = [1, 1]} : vector<10x128xf32> to vector<8x128xf32>
    %36 = arith.addf %30, %35 : vector<8x128xf32>
    %c896 = arith.constant 896 : index
    %c0_28 = arith.constant 0 : index
    %37 = vector.load %arg2[%c896, %c0_28] : memref<1152x128xbf16, #tpu.memory_space<vmem>>, vector<128x128xbf16>
    %cst_29 = arith.constant dense<0.000000e+00> : vector<10x128xf32>
    %38 = tpu.matmul %32, %37, %cst_29 {dimension_numbers = #tpu.dot_dimension_numbers<[1], [0], [0], [1], [0, 0, 1, 1], [], []>} : vector<10x128xbf16>, vector<128x128xbf16>, vector<10x128xf32> -> vector<10x128xf32>
    %39 = vector.extract_strided_slice %38 {offsets = [1, 0], sizes = [8, 128], strides = [1, 1]} : vector<10x128xf32> to vector<8x128xf32>
    %40 = arith.addf %36, %39 : vector<8x128xf32>
    %c1024 = arith.constant 1024 : index
    %c0_30 = arith.constant 0 : index
    %41 = vector.load %arg2[%c1024, %c0_30] : memref<1152x128xbf16, #tpu.memory_space<vmem>>, vector<128x128xbf16>
    %cst_31 = arith.constant dense<0.000000e+00> : vector<10x128xf32>
    %42 = tpu.matmul %32, %41, %cst_31 {dimension_numbers = #tpu.dot_dimension_numbers<[1], [0], [0], [1], [0, 0, 1, 1], [], []>} : vector<10x128xbf16>, vector<128x128xbf16>, vector<10x128xf32> -> vector<10x128xf32>
    %43 = vector.extract_strided_slice %42 {offsets = [2, 0], sizes = [8, 128], strides = [1, 1]} : vector<10x128xf32> to vector<8x128xf32>
    %44 = arith.addf %40, %43 : vector<8x128xf32>
    %45 = vector.broadcast %0 : vector<1x128xf32> to vector<8x128xf32>
    %46 = arith.mulf %44, %45 : vector<8x128xf32>
    %47 = vector.broadcast %1 : vector<1x128xf32> to vector<8x128xf32>
    %48 = arith.addf %46, %47 : vector<8x128xf32>
    %cst_32 = arith.constant 0.000000e+00 : f32
    %49 = vector.broadcast %cst_32 : f32 to vector<8x128xf32>
    %50 = arith.maximumf %48, %49 : vector<8x128xf32>
    %51 = arith.truncf %50 : vector<8x128xf32> to vector<8x128xbf16>
    %c0_33 = arith.constant 0 : index
    %c0_34 = arith.constant 0 : index
    %c0_35 = arith.constant 0 : index
    %52 = vector.load %arg5[%c0_33, %c0_34, %c0_35] : memref<8x8x128xbf16, #tpu.memory_space<vmem>>, vector<1x8x128xbf16>
    %53 = vector.shape_cast %52 : vector<1x8x128xbf16> to vector<8x128xbf16>
    %54 = vector.shape_cast %51 : vector<8x128xbf16> to vector<1x8x128xbf16>
    tpu.vector_store %arg5[%c0_33, %c0_34, %c0_35], %54 {strides = array<i32>} : memref<8x8x128xbf16, #tpu.memory_space<vmem>>, vector<1x8x128xbf16>,
    %cst_36 = arith.constant 0.000000e+00 : f32
    %55 = vector.broadcast %cst_36 : f32 to vector<8x128xf32>
    %c0_37 = arith.constant 0 : index
    %c1_38 = arith.constant 1 : index
    %c0_39 = arith.constant 0 : index
    %c0_40 = arith.constant 0 : index
    %56 = vector.load %arg1[%c0_37, %c1_38, %c0_39, %c0_40] : memref<3x8x10x128xbf16, #tpu.memory_space<vmem>>, vector<1x1x10x128xbf16>
    %57 = vector.shape_cast %56 : vector<1x1x10x128xbf16> to vector<10x128xbf16>
    %c0_41 = arith.constant 0 : index
    %c0_42 = arith.constant 0 : index
    %58 = vector.load %arg2[%c0_41, %c0_42] : memref<1152x128xbf16, #tpu.memory_space<vmem>>, vector<128x128xbf16>
    %cst_43 = arith.constant dense<0.000000e+00> : vector<10x128xf32>
    %59 = tpu.matmul %57, %58, %cst_43 {dimension_numbers = #tpu.dot_dimension_numbers<[1], [0], [0], [1], [0, 0, 1, 1], [], []>} : vector<10x128xbf16>, vector<128x128xbf16>, vector<10x128xf32> -> vector<10x128xf32>
    %60 = vector.extract_strided_slice %59 {offsets = [0, 0], sizes = [8, 128], strides = [1, 1]} : vector<10x128xf32> to vector<8x128xf32>
    %61 = arith.addf %55, %60 : vector<8x128xf32>
    %c128_44 = arith.constant 128 : index
    %c0_45 = arith.constant 0 : index
    %62 = vector.load %arg2[%c128_44, %c0_45] : memref<1152x128xbf16, #tpu.memory_space<vmem>>, vector<128x128xbf16>
    %cst_46 = arith.constant dense<0.000000e+00> : vector<10x128xf32>
    %63 = tpu.matmul %57, %62, %cst_46 {dimension_numbers = #tpu.dot_dimension_numbers<[1], [0], [0], [1], [0, 0, 1, 1], [], []>} : vector<10x128xbf16>, vector<128x128xbf16>, vector<10x128xf32> -> vector<10x128xf32>
    %64 = vector.extract_strided_slice %63 {offsets = [1, 0], sizes = [8, 128], strides = [1, 1]} : vector<10x128xf32> to vector<8x128xf32>
    %65 = arith.addf %61, %64 : vector<8x128xf32>
    %c256_47 = arith.constant 256 : index
    %c0_48 = arith.constant 0 : index
    %66 = vector.load %arg2[%c256_47, %c0_48] : memref<1152x128xbf16, #tpu.memory_space<vmem>>, vector<128x128xbf16>
    %cst_49 = arith.constant dense<0.000000e+00> : vector<10x128xf32>
    %67 = tpu.matmul %57, %66, %cst_49 {dimension_numbers = #tpu.dot_dimension_numbers<[1], [0], [0], [1], [0, 0, 1, 1], [], []>} : vector<10x128xbf16>, vector<128x128xbf16>, vector<10x128xf32> -> vector<10x128xf32>
    %68 = vector.extract_strided_slice %67 {offsets = [2, 0], sizes = [8, 128], strides = [1, 1]} : vector<10x128xf32> to vector<8x128xf32>
    %69 = arith.addf %65, %68 : vector<8x128xf32>
    %c1_50 = arith.constant 1 : index
    %c1_51 = arith.constant 1 : index
    %c0_52 = arith.constant 0 : index
    %c0_53 = arith.constant 0 : index
    %70 = vector.load %arg1[%c1_50, %c1_51, %c0_52, %c0_53] : memref<3x8x10x128xbf16, #tpu.memory_space<vmem>>, vector<1x1x10x128xbf16>
    %71 = vector.shape_cast %70 : vector<1x1x10x128xbf16> to vector<10x128xbf16>
    %c384_54 = arith.constant 384 : index
    %c0_55 = arith.constant 0 : index
    %72 = vector.load %arg2[%c384_54, %c0_55] : memref<1152x128xbf16, #tpu.memory_space<vmem>>, vector<128x128xbf16>
    %cst_56 = arith.constant dense<0.000000e+00> : vector<10x128xf32>
    %73 = tpu.matmul %71, %72, %cst_56 {dimension_numbers = #tpu.dot_dimension_numbers<[1], [0], [0], [1], [0, 0, 1, 1], [], []>} : vector<10x128xbf16>, vector<128x128xbf16>, vector<10x128xf32> -> vector<10x128xf32>
    %74 = vector.extract_strided_slice %73 {offsets = [0, 0], sizes = [8, 128], strides = [1, 1]} : vector<10x128xf32> to vector<8x128xf32>
    %75 = arith.addf %69, %74 : vector<8x128xf32>
    %c512_57 = arith.constant 512 : index
    %c0_58 = arith.constant 0 : index
    %76 = vector.load %arg2[%c512_57, %c0_58] : memref<1152x128xbf16, #tpu.memory_space<vmem>>, vector<128x128xbf16>
    %cst_59 = arith.constant dense<0.000000e+00> : vector<10x128xf32>
    %77 = tpu.matmul %71, %76, %cst_59 {dimension_numbers = #tpu.dot_dimension_numbers<[1], [0], [0], [1], [0, 0, 1, 1], [], []>} : vector<10x128xbf16>, vector<128x128xbf16>, vector<10x128xf32> -> vector<10x128xf32>
    %78 = vector.extract_strided_slice %77 {offsets = [1, 0], sizes = [8, 128], strides = [1, 1]} : vector<10x128xf32> to vector<8x128xf32>
    %79 = arith.addf %75, %78 : vector<8x128xf32>
    %c640_60 = arith.constant 640 : index
    %c0_61 = arith.constant 0 : index
    %80 = vector.load %arg2[%c640_60, %c0_61] : memref<1152x128xbf16, #tpu.memory_space<vmem>>, vector<128x128xbf16>
    %cst_62 = arith.constant dense<0.000000e+00> : vector<10x128xf32>
    %81 = tpu.matmul %71, %80, %cst_62 {dimension_numbers = #tpu.dot_dimension_numbers<[1], [0], [0], [1], [0, 0, 1, 1], [], []>} : vector<10x128xbf16>, vector<128x128xbf16>, vector<10x128xf32> -> vector<10x128xf32>
    %82 = vector.extract_strided_slice %81 {offsets = [2, 0], sizes = [8, 128], strides = [1, 1]} : vector<10x128xf32> to vector<8x128xf32>
    %83 = arith.addf %79, %82 : vector<8x128xf32>
    %c2_63 = arith.constant 2 : index
    %c1_64 = arith.constant 1 : index
    %c0_65 = arith.constant 0 : index
    %c0_66 = arith.constant 0 : index
    %84 = vector.load %arg1[%c2_63, %c1_64, %c0_65, %c0_66] : memref<3x8x10x128xbf16, #tpu.memory_space<vmem>>, vector<1x1x10x128xbf16>
    %85 = vector.shape_cast %84 : vector<1x1x10x128xbf16> to vector<10x128xbf16>
    %c768_67 = arith.constant 768 : index
    %c0_68 = arith.constant 0 : index
    %86 = vector.load %arg2[%c768_67, %c0_68] : memref<1152x128xbf16, #tpu.memory_space<vmem>>, vector<128x128xbf16>
    %cst_69 = arith.constant dense<0.000000e+00> : vector<10x128xf32>
    %87 = tpu.matmul %85, %86, %cst_69 {dimension_numbers = #tpu.dot_dimension_numbers<[1], [0], [0], [1], [0, 0, 1, 1], [], []>} : vector<10x128xbf16>, vector<128x128xbf16>, vector<10x128xf32> -> vector<10x128xf32>
    %88 = vector.extract_strided_slice %87 {offsets = [0, 0], sizes = [8, 128], strides = [1, 1]} : vector<10x128xf32> to vector<8x128xf32>
    %89 = arith.addf %83, %88 : vector<8x128xf32>
    %c896_70 = arith.constant 896 : index
    %c0_71 = arith.constant 0 : index
    %90 = vector.load %arg2[%c896_70, %c0_71] : memref<1152x128xbf16, #tpu.memory_space<vmem>>, vector<128x128xbf16>
    %cst_72 = arith.constant dense<0.000000e+00> : vector<10x128xf32>
    %91 = tpu.matmul %85, %90, %cst_72 {dimension_numbers = #tpu.dot_dimension_numbers<[1], [0], [0], [1], [0, 0, 1, 1], [], []>} : vector<10x128xbf16>, vector<128x128xbf16>, vector<10x128xf32> -> vector<10x128xf32>
    %92 = vector.extract_strided_slice %91 {offsets = [1, 0], sizes = [8, 128], strides = [1, 1]} : vector<10x128xf32> to vector<8x128xf32>
    %93 = arith.addf %89, %92 : vector<8x128xf32>
    %c1024_73 = arith.constant 1024 : index
    %c0_74 = arith.constant 0 : index
    %94 = vector.load %arg2[%c1024_73, %c0_74] : memref<1152x128xbf16, #tpu.memory_space<vmem>>, vector<128x128xbf16>
    %cst_75 = arith.constant dense<0.000000e+00> : vector<10x128xf32>
    %95 = tpu.matmul %85, %94, %cst_75 {dimension_numbers = #tpu.dot_dimension_numbers<[1], [0], [0], [1], [0, 0, 1, 1], [], []>} : vector<10x128xbf16>, vector<128x128xbf16>, vector<10x128xf32> -> vector<10x128xf32>
    %96 = vector.extract_strided_slice %95 {offsets = [2, 0], sizes = [8, 128], strides = [1, 1]} : vector<10x128xf32> to vector<8x128xf32>
    %97 = arith.addf %93, %96 : vector<8x128xf32>
    %98 = vector.broadcast %0 : vector<1x128xf32> to vector<8x128xf32>
    %99 = arith.mulf %97, %98 : vector<8x128xf32>
    %100 = vector.broadcast %1 : vector<1x128xf32> to vector<8x128xf32>
    %101 = arith.addf %99, %100 : vector<8x128xf32>
    %cst_76 = arith.constant 0.000000e+00 : f32
    %102 = vector.broadcast %cst_76 : f32 to vector<8x128xf32>
    %103 = arith.maximumf %101, %102 : vector<8x128xf32>
    %104 = arith.truncf %103 : vector<8x128xf32> to vector<8x128xbf16>
    %c1_77 = arith.constant 1 : index
    %c0_78 = arith.constant 0 : index
    %c0_79 = arith.constant 0 : index
    %105 = vector.load %arg5[%c1_77, %c0_78, %c0_79] : memref<8x8x128xbf16, #tpu.memory_space<vmem>>, vector<1x8x128xbf16>
    %106 = vector.shape_cast %105 : vector<1x8x128xbf16> to vector<8x128xbf16>
    %107 = vector.shape_cast %104 : vector<8x128xbf16> to vector<1x8x128xbf16>
    tpu.vector_store %arg5[%c1_77, %c0_78, %c0_79], %107 {strides = array<i32>} : memref<8x8x128xbf16, #tpu.memory_space<vmem>>, vector<1x8x128xbf16>,
    %cst_80 = arith.constant 0.000000e+00 : f32
    %108 = vector.broadcast %cst_80 : f32 to vector<8x128xf32>
    %c0_81 = arith.constant 0 : index
    %c2_82 = arith.constant 2 : index
    %c0_83 = arith.constant 0 : index
    %c0_84 = arith.constant 0 : index
    %109 = vector.load %arg1[%c0_81, %c2_82, %c0_83, %c0_84] : memref<3x8x10x128xbf16, #tpu.memory_space<vmem>>, vector<1x1x10x128xbf16>
    %110 = vector.shape_cast %109 : vector<1x1x10x128xbf16> to vector<10x128xbf16>
    %c0_85 = arith.constant 0 : index
    %c0_86 = arith.constant 0 : index
    %111 = vector.load %arg2[%c0_85, %c0_86] : memref<1152x128xbf16, #tpu.memory_space<vmem>>, vector<128x128xbf16>
    %cst_87 = arith.constant dense<0.000000e+00> : vector<10x128xf32>
    %112 = tpu.matmul %110, %111, %cst_87 {dimension_numbers = #tpu.dot_dimension_numbers<[1], [0], [0], [1], [0, 0, 1, 1], [], []>} : vector<10x128xbf16>, vector<128x128xbf16>, vector<10x128xf32> -> vector<10x128xf32>
    %113 = vector.extract_strided_slice %112 {offsets = [0, 0], sizes = [8, 128], strides = [1, 1]} : vector<10x128xf32> to vector<8x128xf32>
    %114 = arith.addf %108, %113 : vector<8x128xf32>
    %c128_88 = arith.constant 128 : index
    %c0_89 = arith.constant 0 : index
    %115 = vector.load %arg2[%c128_88, %c0_89] : memref<1152x128xbf16, #tpu.memory_space<vmem>>, vector<128x128xbf16>
    %cst_90 = arith.constant dense<0.000000e+00> : vector<10x128xf32>
    %116 = tpu.matmul %110, %115, %cst_90 {dimension_numbers = #tpu.dot_dimension_numbers<[1], [0], [0], [1], [0, 0, 1, 1], [], []>} : vector<10x128xbf16>, vector<128x128xbf16>, vector<10x128xf32> -> vector<10x128xf32>
    %117 = vector.extract_strided_slice %116 {offsets = [1, 0], sizes = [8, 128], strides = [1, 1]} : vector<10x128xf32> to vector<8x128xf32>
    %118 = arith.addf %114, %117 : vector<8x128xf32>
    %c256_91 = arith.constant 256 : index
    %c0_92 = arith.constant 0 : index
    %119 = vector.load %arg2[%c256_91, %c0_92] : memref<1152x128xbf16, #tpu.memory_space<vmem>>, vector<128x128xbf16>
    %cst_93 = arith.constant dense<0.000000e+00> : vector<10x128xf32>
    %120 = tpu.matmul %110, %119, %cst_93 {dimension_numbers = #tpu.dot_dimension_numbers<[1], [0], [0], [1], [0, 0, 1, 1], [], []>} : vector<10x128xbf16>, vector<128x128xbf16>, vector<10x128xf32> -> vector<10x128xf32>
    %121 = vector.extract_strided_slice %120 {offsets = [2, 0], sizes = [8, 128], strides = [1, 1]} : vector<10x128xf32> to vector<8x128xf32>
    %122 = arith.addf %118, %121 : vector<8x128xf32>
    %c1_94 = arith.constant 1 : index
    %c2_95 = arith.constant 2 : index
    %c0_96 = arith.constant 0 : index
    %c0_97 = arith.constant 0 : index
    %123 = vector.load %arg1[%c1_94, %c2_95, %c0_96, %c0_97] : memref<3x8x10x128xbf16, #tpu.memory_space<vmem>>, vector<1x1x10x128xbf16>
    %124 = vector.shape_cast %123 : vector<1x1x10x128xbf16> to vector<10x128xbf16>
    %c384_98 = arith.constant 384 : index
    %c0_99 = arith.constant 0 : index
    %125 = vector.load %arg2[%c384_98, %c0_99] : memref<1152x128xbf16, #tpu.memory_space<vmem>>, vector<128x128xbf16>
    %cst_100 = arith.constant dense<0.000000e+00> : vector<10x128xf32>
    %126 = tpu.matmul %124, %125, %cst_100 {dimension_numbers = #tpu.dot_dimension_numbers<[1], [0], [0], [1], [0, 0, 1, 1], [], []>} : vector<10x128xbf16>, vector<128x128xbf16>, vector<10x128xf32> -> vector<10x128xf32>
    %127 = vector.extract_strided_slice %126 {offsets = [0, 0], sizes = [8, 128], strides = [1, 1]} : vector<10x128xf32> to vector<8x128xf32>
    %128 = arith.addf %122, %127 : vector<8x128xf32>
    %c512_101 = arith.constant 512 : index
    %c0_102 = arith.constant 0 : index
    %129 = vector.load %arg2[%c512_101, %c0_102] : memref<1152x128xbf16, #tpu.memory_space<vmem>>, vector<128x128xbf16>
    %cst_103 = arith.constant dense<0.000000e+00> : vector<10x128xf32>
    %130 = tpu.matmul %124, %129, %cst_103 {dimension_numbers = #tpu.dot_dimension_numbers<[1], [0], [0], [1], [0, 0, 1, 1], [], []>} : vector<10x128xbf16>, vector<128x128xbf16>, vector<10x128xf32> -> vector<10x128xf32>
    %131 = vector.extract_strided_slice %130 {offsets = [1, 0], sizes = [8, 128], strides = [1, 1]} : vector<10x128xf32> to vector<8x128xf32>
    %132 = arith.addf %128, %131 : vector<8x128xf32>
    %c640_104 = arith.constant 640 : index
    %c0_105 = arith.constant 0 : index
    %133 = vector.load %arg2[%c640_104, %c0_105] : memref<1152x128xbf16, #tpu.memory_space<vmem>>, vector<128x128xbf16>
    %cst_106 = arith.constant dense<0.000000e+00> : vector<10x128xf32>
    %134 = tpu.matmul %124, %133, %cst_106 {dimension_numbers = #tpu.dot_dimension_numbers<[1], [0], [0], [1], [0, 0, 1, 1], [], []>} : vector<10x128xbf16>, vector<128x128xbf16>, vector<10x128xf32> -> vector<10x128xf32>
    %135 = vector.extract_strided_slice %134 {offsets = [2, 0], sizes = [8, 128], strides = [1, 1]} : vector<10x128xf32> to vector<8x128xf32>
    %136 = arith.addf %132, %135 : vector<8x128xf32>
    %c2_107 = arith.constant 2 : index
    %c2_108 = arith.constant 2 : index
    %c0_109 = arith.constant 0 : index
    %c0_110 = arith.constant 0 : index
    %137 = vector.load %arg1[%c2_107, %c2_108, %c0_109, %c0_110] : memref<3x8x10x128xbf16, #tpu.memory_space<vmem>>, vector<1x1x10x128xbf16>
    %138 = vector.shape_cast %137 : vector<1x1x10x128xbf16> to vector<10x128xbf16>
    %c768_111 = arith.constant 768 : index
    %c0_112 = arith.constant 0 : index
    %139 = vector.load %arg2[%c768_111, %c0_112] : memref<1152x128xbf16, #tpu.memory_space<vmem>>, vector<128x128xbf16>
    %cst_113 = arith.constant dense<0.000000e+00> : vector<10x128xf32>
    %140 = tpu.matmul %138, %139, %cst_113 {dimension_numbers = #tpu.dot_dimension_numbers<[1], [0], [0], [1], [0, 0, 1, 1], [], []>} : vector<10x128xbf16>, vector<128x128xbf16>, vector<10x128xf32> -> vector<10x128xf32>
    %141 = vector.extract_strided_slice %140 {offsets = [0, 0], sizes = [8, 128], strides = [1, 1]} : vector<10x128xf32> to vector<8x128xf32>
    %142 = arith.addf %136, %141 : vector<8x128xf32>
    %c896_114 = arith.constant 896 : index
    %c0_115 = arith.constant 0 : index
    %143 = vector.load %arg2[%c896_114, %c0_115] : memref<1152x128xbf16, #tpu.memory_space<vmem>>, vector<128x128xbf16>
    %cst_116 = arith.constant dense<0.000000e+00> : vector<10x128xf32>
    %144 = tpu.matmul %138, %143, %cst_116 {dimension_numbers = #tpu.dot_dimension_numbers<[1], [0], [0], [1], [0, 0, 1, 1], [], []>} : vector<10x128xbf16>, vector<128x128xbf16>, vector<10x128xf32> -> vector<10x128xf32>
    %145 = vector.extract_strided_slice %144 {offsets = [1, 0], sizes = [8, 128], strides = [1, 1]} : vector<10x128xf32> to vector<8x128xf32>
    %146 = arith.addf %142, %145 : vector<8x128xf32>
    %c1024_117 = arith.constant 1024 : index
    %c0_118 = arith.constant 0 : index
    %147 = vector.load %arg2[%c1024_117, %c0_118] : memref<1152x128xbf16, #tpu.memory_space<vmem>>, vector<128x128xbf16>
    %cst_119 = arith.constant dense<0.000000e+00> : vector<10x128xf32>
    %148 = tpu.matmul %138, %147, %cst_119 {dimension_numbers = #tpu.dot_dimension_numbers<[1], [0], [0], [1], [0, 0, 1, 1], [], []>} : vector<10x128xbf16>, vector<128x128xbf16>, vector<10x128xf32> -> vector<10x128xf32>
    %149 = vector.extract_strided_slice %148 {offsets = [2, 0], sizes = [8, 128], strides = [1, 1]} : vector<10x128xf32> to vector<8x128xf32>
    %150 = arith.addf %146, %149 : vector<8x128xf32>
    %151 = vector.broadcast %0 : vector<1x128xf32> to vector<8x128xf32>
    %152 = arith.mulf %150, %151 : vector<8x128xf32>
    %153 = vector.broadcast %1 : vector<1x128xf32> to vector<8x128xf32>
    %154 = arith.addf %152, %153 : vector<8x128xf32>
    %cst_120 = arith.constant 0.000000e+00 : f32
    %155 = vector.broadcast %cst_120 : f32 to vector<8x128xf32>
    %156 = arith.maximumf %154, %155 : vector<8x128xf32>
    %157 = arith.truncf %156 : vector<8x128xf32> to vector<8x128xbf16>
    %c2_121 = arith.constant 2 : index
    %c0_122 = arith.constant 0 : index
    %c0_123 = arith.constant 0 : index
    %158 = vector.load %arg5[%c2_121, %c0_122, %c0_123] : memref<8x8x128xbf16, #tpu.memory_space<vmem>>, vector<1x8x128xbf16>
    %159 = vector.shape_cast %158 : vector<1x8x128xbf16> to vector<8x128xbf16>
    %160 = vector.shape_cast %157 : vector<8x128xbf16> to vector<1x8x128xbf16>
    tpu.vector_store %arg5[%c2_121, %c0_122, %c0_123], %160 {strides = array<i32>} : memref<8x8x128xbf16, #tpu.memory_space<vmem>>, vector<1x8x128xbf16>,
    %cst_124 = arith.constant 0.000000e+00 : f32
    %161 = vector.broadcast %cst_124 : f32 to vector<8x128xf32>
    %c0_125 = arith.constant 0 : index
    %c3 = arith.constant 3 : index
    %c0_126 = arith.constant 0 : index
    %c0_127 = arith.constant 0 : index
    %162 = vector.load %arg1[%c0_125, %c3, %c0_126, %c0_127] : memref<3x8x10x128xbf16, #tpu.memory_space<vmem>>, vector<1x1x10x128xbf16>
    %163 = vector.shape_cast %162 : vector<1x1x10x128xbf16> to vector<10x128xbf16>
    %c0_128 = arith.constant 0 : index
    %c0_129 = arith.constant 0 : index
    %164 = vector.load %arg2[%c0_128, %c0_129] : memref<1152x128xbf16, #tpu.memory_space<vmem>>, vector<128x128xbf16>
    %cst_130 = arith.constant dense<0.000000e+00> : vector<10x128xf32>
    %165 = tpu.matmul %163, %164, %cst_130 {dimension_numbers = #tpu.dot_dimension_numbers<[1], [0], [0], [1], [0, 0, 1, 1], [], []>} : vector<10x128xbf16>, vector<128x128xbf16>, vector<10x128xf32> -> vector<10x128xf32>
    %166 = vector.extract_strided_slice %165 {offsets = [0, 0], sizes = [8, 128], strides = [1, 1]} : vector<10x128xf32> to vector<8x128xf32>
    %167 = arith.addf %161, %166 : vector<8x128xf32>
    %c128_131 = arith.constant 128 : index
    %c0_132 = arith.constant 0 : index
    %168 = vector.load %arg2[%c128_131, %c0_132] : memref<1152x128xbf16, #tpu.memory_space<vmem>>, vector<128x128xbf16>
    %cst_133 = arith.constant dense<0.000000e+00> : vector<10x128xf32>
    %169 = tpu.matmul %163, %168, %cst_133 {dimension_numbers = #tpu.dot_dimension_numbers<[1], [0], [0], [1], [0, 0, 1, 1], [], []>} : vector<10x128xbf16>, vector<128x128xbf16>, vector<10x128xf32> -> vector<10x128xf32>
    %170 = vector.extract_strided_slice %169 {offsets = [1, 0], sizes = [8, 128], strides = [1, 1]} : vector<10x128xf32> to vector<8x128xf32>
    %171 = arith.addf %167, %170 : vector<8x128xf32>
    %c256_134 = arith.constant 256 : index
    %c0_135 = arith.constant 0 : index
    %172 = vector.load %arg2[%c256_134, %c0_135] : memref<1152x128xbf16, #tpu.memory_space<vmem>>, vector<128x128xbf16>
    %cst_136 = arith.constant dense<0.000000e+00> : vector<10x128xf32>
    %173 = tpu.matmul %163, %172, %cst_136 {dimension_numbers = #tpu.dot_dimension_numbers<[1], [0], [0], [1], [0, 0, 1, 1], [], []>} : vector<10x128xbf16>, vector<128x128xbf16>, vector<10x128xf32> -> vector<10x128xf32>
    %174 = vector.extract_strided_slice %173 {offsets = [2, 0], sizes = [8, 128], strides = [1, 1]} : vector<10x128xf32> to vector<8x128xf32>
    %175 = arith.addf %171, %174 : vector<8x128xf32>
    %c1_137 = arith.constant 1 : index
    %c3_138 = arith.constant 3 : index
    %c0_139 = arith.constant 0 : index
    %c0_140 = arith.constant 0 : index
    %176 = vector.load %arg1[%c1_137, %c3_138, %c0_139, %c0_140] : memref<3x8x10x128xbf16, #tpu.memory_space<vmem>>, vector<1x1x10x128xbf16>
    %177 = vector.shape_cast %176 : vector<1x1x10x128xbf16> to vector<10x128xbf16>
    %c384_141 = arith.constant 384 : index
    %c0_142 = arith.constant 0 : index
    %178 = vector.load %arg2[%c384_141, %c0_142] : memref<1152x128xbf16, #tpu.memory_space<vmem>>, vector<128x128xbf16>
    %cst_143 = arith.constant dense<0.000000e+00> : vector<10x128xf32>
    %179 = tpu.matmul %177, %178, %cst_143 {dimension_numbers = #tpu.dot_dimension_numbers<[1], [0], [0], [1], [0, 0, 1, 1], [], []>} : vector<10x128xbf16>, vector<128x128xbf16>, vector<10x128xf32> -> vector<10x128xf32>
    %180 = vector.extract_strided_slice %179 {offsets = [0, 0], sizes = [8, 128], strides = [1, 1]} : vector<10x128xf32> to vector<8x128xf32>
    %181 = arith.addf %175, %180 : vector<8x128xf32>
    %c512_144 = arith.constant 512 : index
    %c0_145 = arith.constant 0 : index
    %182 = vector.load %arg2[%c512_144, %c0_145] : memref<1152x128xbf16, #tpu.memory_space<vmem>>, vector<128x128xbf16>
    %cst_146 = arith.constant dense<0.000000e+00> : vector<10x128xf32>
    %183 = tpu.matmul %177, %182, %cst_146 {dimension_numbers = #tpu.dot_dimension_numbers<[1], [0], [0], [1], [0, 0, 1, 1], [], []>} : vector<10x128xbf16>, vector<128x128xbf16>, vector<10x128xf32> -> vector<10x128xf32>
    %184 = vector.extract_strided_slice %183 {offsets = [1, 0], sizes = [8, 128], strides = [1, 1]} : vector<10x128xf32> to vector<8x128xf32>
    %185 = arith.addf %181, %184 : vector<8x128xf32>
    %c640_147 = arith.constant 640 : index
    %c0_148 = arith.constant 0 : index
    %186 = vector.load %arg2[%c640_147, %c0_148] : memref<1152x128xbf16, #tpu.memory_space<vmem>>, vector<128x128xbf16>
    %cst_149 = arith.constant dense<0.000000e+00> : vector<10x128xf32>
    %187 = tpu.matmul %177, %186, %cst_149 {dimension_numbers = #tpu.dot_dimension_numbers<[1], [0], [0], [1], [0, 0, 1, 1], [], []>} : vector<10x128xbf16>, vector<128x128xbf16>, vector<10x128xf32> -> vector<10x128xf32>
    %188 = vector.extract_strided_slice %187 {offsets = [2, 0], sizes = [8, 128], strides = [1, 1]} : vector<10x128xf32> to vector<8x128xf32>
    %189 = arith.addf %185, %188 : vector<8x128xf32>
    %c2_150 = arith.constant 2 : index
    %c3_151 = arith.constant 3 : index
    %c0_152 = arith.constant 0 : index
    %c0_153 = arith.constant 0 : index
    %190 = vector.load %arg1[%c2_150, %c3_151, %c0_152, %c0_153] : memref<3x8x10x128xbf16, #tpu.memory_space<vmem>>, vector<1x1x10x128xbf16>
    %191 = vector.shape_cast %190 : vector<1x1x10x128xbf16> to vector<10x128xbf16>
    %c768_154 = arith.constant 768 : index
    %c0_155 = arith.constant 0 : index
    %192 = vector.load %arg2[%c768_154, %c0_155] : memref<1152x128xbf16, #tpu.memory_space<vmem>>, vector<128x128xbf16>
    %cst_156 = arith.constant dense<0.000000e+00> : vector<10x128xf32>
    %193 = tpu.matmul %191, %192, %cst_156 {dimension_numbers = #tpu.dot_dimension_numbers<[1], [0], [0], [1], [0, 0, 1, 1], [], []>} : vector<10x128xbf16>, vector<128x128xbf16>, vector<10x128xf32> -> vector<10x128xf32>
    %194 = vector.extract_strided_slice %193 {offsets = [0, 0], sizes = [8, 128], strides = [1, 1]} : vector<10x128xf32> to vector<8x128xf32>
    %195 = arith.addf %189, %194 : vector<8x128xf32>
    %c896_157 = arith.constant 896 : index
    %c0_158 = arith.constant 0 : index
    %196 = vector.load %arg2[%c896_157, %c0_158] : memref<1152x128xbf16, #tpu.memory_space<vmem>>, vector<128x128xbf16>
    %cst_159 = arith.constant dense<0.000000e+00> : vector<10x128xf32>
    %197 = tpu.matmul %191, %196, %cst_159 {dimension_numbers = #tpu.dot_dimension_numbers<[1], [0], [0], [1], [0, 0, 1, 1], [], []>} : vector<10x128xbf16>, vector<128x128xbf16>, vector<10x128xf32> -> vector<10x128xf32>
    %198 = vector.extract_strided_slice %197 {offsets = [1, 0], sizes = [8, 128], strides = [1, 1]} : vector<10x128xf32> to vector<8x128xf32>
    %199 = arith.addf %195, %198 : vector<8x128xf32>
    %c1024_160 = arith.constant 1024 : index
    %c0_161 = arith.constant 0 : index
    %200 = vector.load %arg2[%c1024_160, %c0_161] : memref<1152x128xbf16, #tpu.memory_space<vmem>>, vector<128x128xbf16>
    %cst_162 = arith.constant dense<0.000000e+00> : vector<10x128xf32>
    %201 = tpu.matmul %191, %200, %cst_162 {dimension_numbers = #tpu.dot_dimension_numbers<[1], [0], [0], [1], [0, 0, 1, 1], [], []>} : vector<10x128xbf16>, vector<128x128xbf16>, vector<10x128xf32> -> vector<10x128xf32>
    %202 = vector.extract_strided_slice %201 {offsets = [2, 0], sizes = [8, 128], strides = [1, 1]} : vector<10x128xf32> to vector<8x128xf32>
    %203 = arith.addf %199, %202 : vector<8x128xf32>
    %204 = vector.broadcast %0 : vector<1x128xf32> to vector<8x128xf32>
    %205 = arith.mulf %203, %204 : vector<8x128xf32>
    %206 = vector.broadcast %1 : vector<1x128xf32> to vector<8x128xf32>
    %207 = arith.addf %205, %206 : vector<8x128xf32>
    %cst_163 = arith.constant 0.000000e+00 : f32
    %208 = vector.broadcast %cst_163 : f32 to vector<8x128xf32>
    %209 = arith.maximumf %207, %208 : vector<8x128xf32>
    %210 = arith.truncf %209 : vector<8x128xf32> to vector<8x128xbf16>
    %c3_164 = arith.constant 3 : index
    %c0_165 = arith.constant 0 : index
    %c0_166 = arith.constant 0 : index
    %211 = vector.load %arg5[%c3_164, %c0_165, %c0_166] : memref<8x8x128xbf16, #tpu.memory_space<vmem>>, vector<1x8x128xbf16>
    %212 = vector.shape_cast %211 : vector<1x8x128xbf16> to vector<8x128xbf16>
    %213 = vector.shape_cast %210 : vector<8x128xbf16> to vector<1x8x128xbf16>
    tpu.vector_store %arg5[%c3_164, %c0_165, %c0_166], %213 {strides = array<i32>} : memref<8x8x128xbf16, #tpu.memory_space<vmem>>, vector<1x8x128xbf16>,
    %cst_167 = arith.constant 0.000000e+00 : f32
    %214 = vector.broadcast %cst_167 : f32 to vector<8x128xf32>
    %c0_168 = arith.constant 0 : index
    %c4 = arith.constant 4 : index
    %c0_169 = arith.constant 0 : index
    %c0_170 = arith.constant 0 : index
    %215 = vector.load %arg1[%c0_168, %c4, %c0_169, %c0_170] : memref<3x8x10x128xbf16, #tpu.memory_space<vmem>>, vector<1x1x10x128xbf16>
    %216 = vector.shape_cast %215 : vector<1x1x10x128xbf16> to vector<10x128xbf16>
    %c0_171 = arith.constant 0 : index
    %c0_172 = arith.constant 0 : index
    %217 = vector.load %arg2[%c0_171, %c0_172] : memref<1152x128xbf16, #tpu.memory_space<vmem>>, vector<128x128xbf16>
    %cst_173 = arith.constant dense<0.000000e+00> : vector<10x128xf32>
    %218 = tpu.matmul %216, %217, %cst_173 {dimension_numbers = #tpu.dot_dimension_numbers<[1], [0], [0], [1], [0, 0, 1, 1], [], []>} : vector<10x128xbf16>, vector<128x128xbf16>, vector<10x128xf32> -> vector<10x128xf32>
    %219 = vector.extract_strided_slice %218 {offsets = [0, 0], sizes = [8, 128], strides = [1, 1]} : vector<10x128xf32> to vector<8x128xf32>
    %220 = arith.addf %214, %219 : vector<8x128xf32>
    %c128_174 = arith.constant 128 : index
    %c0_175 = arith.constant 0 : index
    %221 = vector.load %arg2[%c128_174, %c0_175] : memref<1152x128xbf16, #tpu.memory_space<vmem>>, vector<128x128xbf16>
    %cst_176 = arith.constant dense<0.000000e+00> : vector<10x128xf32>
    %222 = tpu.matmul %216, %221, %cst_176 {dimension_numbers = #tpu.dot_dimension_numbers<[1], [0], [0], [1], [0, 0, 1, 1], [], []>} : vector<10x128xbf16>, vector<128x128xbf16>, vector<10x128xf32> -> vector<10x128xf32>
    %223 = vector.extract_strided_slice %222 {offsets = [1, 0], sizes = [8, 128], strides = [1, 1]} : vector<10x128xf32> to vector<8x128xf32>
    %224 = arith.addf %220, %223 : vector<8x128xf32>
    %c256_177 = arith.constant 256 : index
    %c0_178 = arith.constant 0 : index
    %225 = vector.load %arg2[%c256_177, %c0_178] : memref<1152x128xbf16, #tpu.memory_space<vmem>>, vector<128x128xbf16>
    %cst_179 = arith.constant dense<0.000000e+00> : vector<10x128xf32>
    %226 = tpu.matmul %216, %225, %cst_179 {dimension_numbers = #tpu.dot_dimension_numbers<[1], [0], [0], [1], [0, 0, 1, 1], [], []>} : vector<10x128xbf16>, vector<128x128xbf16>, vector<10x128xf32> -> vector<10x128xf32>
    %227 = vector.extract_strided_slice %226 {offsets = [2, 0], sizes = [8, 128], strides = [1, 1]} : vector<10x128xf32> to vector<8x128xf32>
    %228 = arith.addf %224, %227 : vector<8x128xf32>
    %c1_180 = arith.constant 1 : index
    %c4_181 = arith.constant 4 : index
    %c0_182 = arith.constant 0 : index
    %c0_183 = arith.constant 0 : index
    %229 = vector.load %arg1[%c1_180, %c4_181, %c0_182, %c0_183] : memref<3x8x10x128xbf16, #tpu.memory_space<vmem>>, vector<1x1x10x128xbf16>
    %230 = vector.shape_cast %229 : vector<1x1x10x128xbf16> to vector<10x128xbf16>
    %c384_184 = arith.constant 384 : index
    %c0_185 = arith.constant 0 : index
    %231 = vector.load %arg2[%c384_184, %c0_185] : memref<1152x128xbf16, #tpu.memory_space<vmem>>, vector<128x128xbf16>
    %cst_186 = arith.constant dense<0.000000e+00> : vector<10x128xf32>
    %232 = tpu.matmul %230, %231, %cst_186 {dimension_numbers = #tpu.dot_dimension_numbers<[1], [0], [0], [1], [0, 0, 1, 1], [], []>} : vector<10x128xbf16>, vector<128x128xbf16>, vector<10x128xf32> -> vector<10x128xf32>
    %233 = vector.extract_strided_slice %232 {offsets = [0, 0], sizes = [8, 128], strides = [1, 1]} : vector<10x128xf32> to vector<8x128xf32>
    %234 = arith.addf %228, %233 : vector<8x128xf32>
    %c512_187 = arith.constant 512 : index
    %c0_188 = arith.constant 0 : index
    %235 = vector.load %arg2[%c512_187, %c0_188] : memref<1152x128xbf16, #tpu.memory_space<vmem>>, vector<128x128xbf16>
    %cst_189 = arith.constant dense<0.000000e+00> : vector<10x128xf32>
    %236 = tpu.matmul %230, %235, %cst_189 {dimension_numbers = #tpu.dot_dimension_numbers<[1], [0], [0], [1], [0, 0, 1, 1], [], []>} : vector<10x128xbf16>, vector<128x128xbf16>, vector<10x128xf32> -> vector<10x128xf32>
    %237 = vector.extract_strided_slice %236 {offsets = [1, 0], sizes = [8, 128], strides = [1, 1]} : vector<10x128xf32> to vector<8x128xf32>
    %238 = arith.addf %234, %237 : vector<8x128xf32>
    %c640_190 = arith.constant 640 : index
    %c0_191 = arith.constant 0 : index
    %239 = vector.load %arg2[%c640_190, %c0_191] : memref<1152x128xbf16, #tpu.memory_space<vmem>>, vector<128x128xbf16>
    %cst_192 = arith.constant dense<0.000000e+00> : vector<10x128xf32>
    %240 = tpu.matmul %230, %239, %cst_192 {dimension_numbers = #tpu.dot_dimension_numbers<[1], [0], [0], [1], [0, 0, 1, 1], [], []>} : vector<10x128xbf16>, vector<128x128xbf16>, vector<10x128xf32> -> vector<10x128xf32>
    %241 = vector.extract_strided_slice %240 {offsets = [2, 0], sizes = [8, 128], strides = [1, 1]} : vector<10x128xf32> to vector<8x128xf32>
    %242 = arith.addf %238, %241 : vector<8x128xf32>
    %c2_193 = arith.constant 2 : index
    %c4_194 = arith.constant 4 : index
    %c0_195 = arith.constant 0 : index
    %c0_196 = arith.constant 0 : index
    %243 = vector.load %arg1[%c2_193, %c4_194, %c0_195, %c0_196] : memref<3x8x10x128xbf16, #tpu.memory_space<vmem>>, vector<1x1x10x128xbf16>
    %244 = vector.shape_cast %243 : vector<1x1x10x128xbf16> to vector<10x128xbf16>
    %c768_197 = arith.constant 768 : index
    %c0_198 = arith.constant 0 : index
    %245 = vector.load %arg2[%c768_197, %c0_198] : memref<1152x128xbf16, #tpu.memory_space<vmem>>, vector<128x128xbf16>
    %cst_199 = arith.constant dense<0.000000e+00> : vector<10x128xf32>
    %246 = tpu.matmul %244, %245, %cst_199 {dimension_numbers = #tpu.dot_dimension_numbers<[1], [0], [0], [1], [0, 0, 1, 1], [], []>} : vector<10x128xbf16>, vector<128x128xbf16>, vector<10x128xf32> -> vector<10x128xf32>
    %247 = vector.extract_strided_slice %246 {offsets = [0, 0], sizes = [8, 128], strides = [1, 1]} : vector<10x128xf32> to vector<8x128xf32>
    %248 = arith.addf %242, %247 : vector<8x128xf32>
    %c896_200 = arith.constant 896 : index
    %c0_201 = arith.constant 0 : index
    %249 = vector.load %arg2[%c896_200, %c0_201] : memref<1152x128xbf16, #tpu.memory_space<vmem>>, vector<128x128xbf16>
    %cst_202 = arith.constant dense<0.000000e+00> : vector<10x128xf32>
    %250 = tpu.matmul %244, %249, %cst_202 {dimension_numbers = #tpu.dot_dimension_numbers<[1], [0], [0], [1], [0, 0, 1, 1], [], []>} : vector<10x128xbf16>, vector<128x128xbf16>, vector<10x128xf32> -> vector<10x128xf32>
    %251 = vector.extract_strided_slice %250 {offsets = [1, 0], sizes = [8, 128], strides = [1, 1]} : vector<10x128xf32> to vector<8x128xf32>
    %252 = arith.addf %248, %251 : vector<8x128xf32>
    %c1024_203 = arith.constant 1024 : index
    %c0_204 = arith.constant 0 : index
    %253 = vector.load %arg2[%c1024_203, %c0_204] : memref<1152x128xbf16, #tpu.memory_space<vmem>>, vector<128x128xbf16>
    %cst_205 = arith.constant dense<0.000000e+00> : vector<10x128xf32>
    %254 = tpu.matmul %244, %253, %cst_205 {dimension_numbers = #tpu.dot_dimension_numbers<[1], [0], [0], [1], [0, 0, 1, 1], [], []>} : vector<10x128xbf16>, vector<128x128xbf16>, vector<10x128xf32> -> vector<10x128xf32>
    %255 = vector.extract_strided_slice %254 {offsets = [2, 0], sizes = [8, 128], strides = [1, 1]} : vector<10x128xf32> to vector<8x128xf32>
    %256 = arith.addf %252, %255 : vector<8x128xf32>
    %257 = vector.broadcast %0 : vector<1x128xf32> to vector<8x128xf32>
    %258 = arith.mulf %256, %257 : vector<8x128xf32>
    %259 = vector.broadcast %1 : vector<1x128xf32> to vector<8x128xf32>
    %260 = arith.addf %258, %259 : vector<8x128xf32>
    %cst_206 = arith.constant 0.000000e+00 : f32
    %261 = vector.broadcast %cst_206 : f32 to vector<8x128xf32>
    %262 = arith.maximumf %260, %261 : vector<8x128xf32>
    %263 = arith.truncf %262 : vector<8x128xf32> to vector<8x128xbf16>
    %c4_207 = arith.constant 4 : index
    %c0_208 = arith.constant 0 : index
    %c0_209 = arith.constant 0 : index
    %264 = vector.load %arg5[%c4_207, %c0_208, %c0_209] : memref<8x8x128xbf16, #tpu.memory_space<vmem>>, vector<1x8x128xbf16>
    %265 = vector.shape_cast %264 : vector<1x8x128xbf16> to vector<8x128xbf16>
    %266 = vector.shape_cast %263 : vector<8x128xbf16> to vector<1x8x128xbf16>
    tpu.vector_store %arg5[%c4_207, %c0_208, %c0_209], %266 {strides = array<i32>} : memref<8x8x128xbf16, #tpu.memory_space<vmem>>, vector<1x8x128xbf16>,
    %cst_210 = arith.constant 0.000000e+00 : f32
    %267 = vector.broadcast %cst_210 : f32 to vector<8x128xf32>
    %c0_211 = arith.constant 0 : index
    %c5 = arith.constant 5 : index
    %c0_212 = arith.constant 0 : index
    %c0_213 = arith.constant 0 : index
    %268 = vector.load %arg1[%c0_211, %c5, %c0_212, %c0_213] : memref<3x8x10x128xbf16, #tpu.memory_space<vmem>>, vector<1x1x10x128xbf16>
    %269 = vector.shape_cast %268 : vector<1x1x10x128xbf16> to vector<10x128xbf16>
    %c0_214 = arith.constant 0 : index
    %c0_215 = arith.constant 0 : index
    %270 = vector.load %arg2[%c0_214, %c0_215] : memref<1152x128xbf16, #tpu.memory_space<vmem>>, vector<128x128xbf16>
    %cst_216 = arith.constant dense<0.000000e+00> : vector<10x128xf32>
    %271 = tpu.matmul %269, %270, %cst_216 {dimension_numbers = #tpu.dot_dimension_numbers<[1], [0], [0], [1], [0, 0, 1, 1], [], []>} : vector<10x128xbf16>, vector<128x128xbf16>, vector<10x128xf32> -> vector<10x128xf32>
    %272 = vector.extract_strided_slice %271 {offsets = [0, 0], sizes = [8, 128], strides = [1, 1]} : vector<10x128xf32> to vector<8x128xf32>
    %273 = arith.addf %267, %272 : vector<8x128xf32>
    %c128_217 = arith.constant 128 : index
    %c0_218 = arith.constant 0 : index
    %274 = vector.load %arg2[%c128_217, %c0_218] : memref<1152x128xbf16, #tpu.memory_space<vmem>>, vector<128x128xbf16>
    %cst_219 = arith.constant dense<0.000000e+00> : vector<10x128xf32>
    %275 = tpu.matmul %269, %274, %cst_219 {dimension_numbers = #tpu.dot_dimension_numbers<[1], [0], [0], [1], [0, 0, 1, 1], [], []>} : vector<10x128xbf16>, vector<128x128xbf16>, vector<10x128xf32> -> vector<10x128xf32>
    %276 = vector.extract_strided_slice %275 {offsets = [1, 0], sizes = [8, 128], strides = [1, 1]} : vector<10x128xf32> to vector<8x128xf32>
    %277 = arith.addf %273, %276 : vector<8x128xf32>
    %c256_220 = arith.constant 256 : index
    %c0_221 = arith.constant 0 : index
    %278 = vector.load %arg2[%c256_220, %c0_221] : memref<1152x128xbf16, #tpu.memory_space<vmem>>, vector<128x128xbf16>
    %cst_222 = arith.constant dense<0.000000e+00> : vector<10x128xf32>
    %279 = tpu.matmul %269, %278, %cst_222 {dimension_numbers = #tpu.dot_dimension_numbers<[1], [0], [0], [1], [0, 0, 1, 1], [], []>} : vector<10x128xbf16>, vector<128x128xbf16>, vector<10x128xf32> -> vector<10x128xf32>
    %280 = vector.extract_strided_slice %279 {offsets = [2, 0], sizes = [8, 128], strides = [1, 1]} : vector<10x128xf32> to vector<8x128xf32>
    %281 = arith.addf %277, %280 : vector<8x128xf32>
    %c1_223 = arith.constant 1 : index
    %c5_224 = arith.constant 5 : index
    %c0_225 = arith.constant 0 : index
    %c0_226 = arith.constant 0 : index
    %282 = vector.load %arg1[%c1_223, %c5_224, %c0_225, %c0_226] : memref<3x8x10x128xbf16, #tpu.memory_space<vmem>>, vector<1x1x10x128xbf16>
    %283 = vector.shape_cast %282 : vector<1x1x10x128xbf16> to vector<10x128xbf16>
    %c384_227 = arith.constant 384 : index
    %c0_228 = arith.constant 0 : index
    %284 = vector.load %arg2[%c384_227, %c0_228] : memref<1152x128xbf16, #tpu.memory_space<vmem>>, vector<128x128xbf16>
    %cst_229 = arith.constant dense<0.000000e+00> : vector<10x128xf32>
    %285 = tpu.matmul %283, %284, %cst_229 {dimension_numbers = #tpu.dot_dimension_numbers<[1], [0], [0], [1], [0, 0, 1, 1], [], []>} : vector<10x128xbf16>, vector<128x128xbf16>, vector<10x128xf32> -> vector<10x128xf32>
    %286 = vector.extract_strided_slice %285 {offsets = [0, 0], sizes = [8, 128], strides = [1, 1]} : vector<10x128xf32> to vector<8x128xf32>
    %287 = arith.addf %281, %286 : vector<8x128xf32>
    %c512_230 = arith.constant 512 : index
    %c0_231 = arith.constant 0 : index
    %288 = vector.load %arg2[%c512_230, %c0_231] : memref<1152x128xbf16, #tpu.memory_space<vmem>>, vector<128x128xbf16>
    %cst_232 = arith.constant dense<0.000000e+00> : vector<10x128xf32>
    %289 = tpu.matmul %283, %288, %cst_232 {dimension_numbers = #tpu.dot_dimension_numbers<[1], [0], [0], [1], [0, 0, 1, 1], [], []>} : vector<10x128xbf16>, vector<128x128xbf16>, vector<10x128xf32> -> vector<10x128xf32>
    %290 = vector.extract_strided_slice %289 {offsets = [1, 0], sizes = [8, 128], strides = [1, 1]} : vector<10x128xf32> to vector<8x128xf32>
    %291 = arith.addf %287, %290 : vector<8x128xf32>
    %c640_233 = arith.constant 640 : index
    %c0_234 = arith.constant 0 : index
    %292 = vector.load %arg2[%c640_233, %c0_234] : memref<1152x128xbf16, #tpu.memory_space<vmem>>, vector<128x128xbf16>
    %cst_235 = arith.constant dense<0.000000e+00> : vector<10x128xf32>
    %293 = tpu.matmul %283, %292, %cst_235 {dimension_numbers = #tpu.dot_dimension_numbers<[1], [0], [0], [1], [0, 0, 1, 1], [], []>} : vector<10x128xbf16>, vector<128x128xbf16>, vector<10x128xf32> -> vector<10x128xf32>
    %294 = vector.extract_strided_slice %293 {offsets = [2, 0], sizes = [8, 128], strides = [1, 1]} : vector<10x128xf32> to vector<8x128xf32>
    %295 = arith.addf %291, %294 : vector<8x128xf32>
    %c2_236 = arith.constant 2 : index
    %c5_237 = arith.constant 5 : index
    %c0_238 = arith.constant 0 : index
    %c0_239 = arith.constant 0 : index
    %296 = vector.load %arg1[%c2_236, %c5_237, %c0_238, %c0_239] : memref<3x8x10x128xbf16, #tpu.memory_space<vmem>>, vector<1x1x10x128xbf16>
    %297 = vector.shape_cast %296 : vector<1x1x10x128xbf16> to vector<10x128xbf16>
    %c768_240 = arith.constant 768 : index
    %c0_241 = arith.constant 0 : index
    %298 = vector.load %arg2[%c768_240, %c0_241] : memref<1152x128xbf16, #tpu.memory_space<vmem>>, vector<128x128xbf16>
    %cst_242 = arith.constant dense<0.000000e+00> : vector<10x128xf32>
    %299 = tpu.matmul %297, %298, %cst_242 {dimension_numbers = #tpu.dot_dimension_numbers<[1], [0], [0], [1], [0, 0, 1, 1], [], []>} : vector<10x128xbf16>, vector<128x128xbf16>, vector<10x128xf32> -> vector<10x128xf32>
    %300 = vector.extract_strided_slice %299 {offsets = [0, 0], sizes = [8, 128], strides = [1, 1]} : vector<10x128xf32> to vector<8x128xf32>
    %301 = arith.addf %295, %300 : vector<8x128xf32>
    %c896_243 = arith.constant 896 : index
    %c0_244 = arith.constant 0 : index
    %302 = vector.load %arg2[%c896_243, %c0_244] : memref<1152x128xbf16, #tpu.memory_space<vmem>>, vector<128x128xbf16>
    %cst_245 = arith.constant dense<0.000000e+00> : vector<10x128xf32>
    %303 = tpu.matmul %297, %302, %cst_245 {dimension_numbers = #tpu.dot_dimension_numbers<[1], [0], [0], [1], [0, 0, 1, 1], [], []>} : vector<10x128xbf16>, vector<128x128xbf16>, vector<10x128xf32> -> vector<10x128xf32>
    %304 = vector.extract_strided_slice %303 {offsets = [1, 0], sizes = [8, 128], strides = [1, 1]} : vector<10x128xf32> to vector<8x128xf32>
    %305 = arith.addf %301, %304 : vector<8x128xf32>
    %c1024_246 = arith.constant 1024 : index
    %c0_247 = arith.constant 0 : index
    %306 = vector.load %arg2[%c1024_246, %c0_247] : memref<1152x128xbf16, #tpu.memory_space<vmem>>, vector<128x128xbf16>
    %cst_248 = arith.constant dense<0.000000e+00> : vector<10x128xf32>
    %307 = tpu.matmul %297, %306, %cst_248 {dimension_numbers = #tpu.dot_dimension_numbers<[1], [0], [0], [1], [0, 0, 1, 1], [], []>} : vector<10x128xbf16>, vector<128x128xbf16>, vector<10x128xf32> -> vector<10x128xf32>
    %308 = vector.extract_strided_slice %307 {offsets = [2, 0], sizes = [8, 128], strides = [1, 1]} : vector<10x128xf32> to vector<8x128xf32>
    %309 = arith.addf %305, %308 : vector<8x128xf32>
    %310 = vector.broadcast %0 : vector<1x128xf32> to vector<8x128xf32>
    %311 = arith.mulf %309, %310 : vector<8x128xf32>
    %312 = vector.broadcast %1 : vector<1x128xf32> to vector<8x128xf32>
    %313 = arith.addf %311, %312 : vector<8x128xf32>
    %cst_249 = arith.constant 0.000000e+00 : f32
    %314 = vector.broadcast %cst_249 : f32 to vector<8x128xf32>
    %315 = arith.maximumf %313, %314 : vector<8x128xf32>
    %316 = arith.truncf %315 : vector<8x128xf32> to vector<8x128xbf16>
    %c5_250 = arith.constant 5 : index
    %c0_251 = arith.constant 0 : index
    %c0_252 = arith.constant 0 : index
    %317 = vector.load %arg5[%c5_250, %c0_251, %c0_252] : memref<8x8x128xbf16, #tpu.memory_space<vmem>>, vector<1x8x128xbf16>
    %318 = vector.shape_cast %317 : vector<1x8x128xbf16> to vector<8x128xbf16>
    %319 = vector.shape_cast %316 : vector<8x128xbf16> to vector<1x8x128xbf16>
    tpu.vector_store %arg5[%c5_250, %c0_251, %c0_252], %319 {strides = array<i32>} : memref<8x8x128xbf16, #tpu.memory_space<vmem>>, vector<1x8x128xbf16>,
    %cst_253 = arith.constant 0.000000e+00 : f32
    %320 = vector.broadcast %cst_253 : f32 to vector<8x128xf32>
    %c0_254 = arith.constant 0 : index
    %c6 = arith.constant 6 : index
    %c0_255 = arith.constant 0 : index
    %c0_256 = arith.constant 0 : index
    %321 = vector.load %arg1[%c0_254, %c6, %c0_255, %c0_256] : memref<3x8x10x128xbf16, #tpu.memory_space<vmem>>, vector<1x1x10x128xbf16>
    %322 = vector.shape_cast %321 : vector<1x1x10x128xbf16> to vector<10x128xbf16>
    %c0_257 = arith.constant 0 : index
    %c0_258 = arith.constant 0 : index
    %323 = vector.load %arg2[%c0_257, %c0_258] : memref<1152x128xbf16, #tpu.memory_space<vmem>>, vector<128x128xbf16>
    %cst_259 = arith.constant dense<0.000000e+00> : vector<10x128xf32>
    %324 = tpu.matmul %322, %323, %cst_259 {dimension_numbers = #tpu.dot_dimension_numbers<[1], [0], [0], [1], [0, 0, 1, 1], [], []>} : vector<10x128xbf16>, vector<128x128xbf16>, vector<10x128xf32> -> vector<10x128xf32>
    %325 = vector.extract_strided_slice %324 {offsets = [0, 0], sizes = [8, 128], strides = [1, 1]} : vector<10x128xf32> to vector<8x128xf32>
    %326 = arith.addf %320, %325 : vector<8x128xf32>
    %c128_260 = arith.constant 128 : index
    %c0_261 = arith.constant 0 : index
    %327 = vector.load %arg2[%c128_260, %c0_261] : memref<1152x128xbf16, #tpu.memory_space<vmem>>, vector<128x128xbf16>
    %cst_262 = arith.constant dense<0.000000e+00> : vector<10x128xf32>
    %328 = tpu.matmul %322, %327, %cst_262 {dimension_numbers = #tpu.dot_dimension_numbers<[1], [0], [0], [1], [0, 0, 1, 1], [], []>} : vector<10x128xbf16>, vector<128x128xbf16>, vector<10x128xf32> -> vector<10x128xf32>
    %329 = vector.extract_strided_slice %328 {offsets = [1, 0], sizes = [8, 128], strides = [1, 1]} : vector<10x128xf32> to vector<8x128xf32>
    %330 = arith.addf %326, %329 : vector<8x128xf32>
    %c256_263 = arith.constant 256 : index
    %c0_264 = arith.constant 0 : index
    %331 = vector.load %arg2[%c256_263, %c0_264] : memref<1152x128xbf16, #tpu.memory_space<vmem>>, vector<128x128xbf16>
    %cst_265 = arith.constant dense<0.000000e+00> : vector<10x128xf32>
    %332 = tpu.matmul %322, %331, %cst_265 {dimension_numbers = #tpu.dot_dimension_numbers<[1], [0], [0], [1], [0, 0, 1, 1], [], []>} : vector<10x128xbf16>, vector<128x128xbf16>, vector<10x128xf32> -> vector<10x128xf32>
    %333 = vector.extract_strided_slice %332 {offsets = [2, 0], sizes = [8, 128], strides = [1, 1]} : vector<10x128xf32> to vector<8x128xf32>
    %334 = arith.addf %330, %333 : vector<8x128xf32>
    %c1_266 = arith.constant 1 : index
    %c6_267 = arith.constant 6 : index
    %c0_268 = arith.constant 0 : index
    %c0_269 = arith.constant 0 : index
    %335 = vector.load %arg1[%c1_266, %c6_267, %c0_268, %c0_269] : memref<3x8x10x128xbf16, #tpu.memory_space<vmem>>, vector<1x1x10x128xbf16>
    %336 = vector.shape_cast %335 : vector<1x1x10x128xbf16> to vector<10x128xbf16>
    %c384_270 = arith.constant 384 : index
    %c0_271 = arith.constant 0 : index
    %337 = vector.load %arg2[%c384_270, %c0_271] : memref<1152x128xbf16, #tpu.memory_space<vmem>>, vector<128x128xbf16>
    %cst_272 = arith.constant dense<0.000000e+00> : vector<10x128xf32>
    %338 = tpu.matmul %336, %337, %cst_272 {dimension_numbers = #tpu.dot_dimension_numbers<[1], [0], [0], [1], [0, 0, 1, 1], [], []>} : vector<10x128xbf16>, vector<128x128xbf16>, vector<10x128xf32> -> vector<10x128xf32>
    %339 = vector.extract_strided_slice %338 {offsets = [0, 0], sizes = [8, 128], strides = [1, 1]} : vector<10x128xf32> to vector<8x128xf32>
    %340 = arith.addf %334, %339 : vector<8x128xf32>
    %c512_273 = arith.constant 512 : index
    %c0_274 = arith.constant 0 : index
    %341 = vector.load %arg2[%c512_273, %c0_274] : memref<1152x128xbf16, #tpu.memory_space<vmem>>, vector<128x128xbf16>
    %cst_275 = arith.constant dense<0.000000e+00> : vector<10x128xf32>
    %342 = tpu.matmul %336, %341, %cst_275 {dimension_numbers = #tpu.dot_dimension_numbers<[1], [0], [0], [1], [0, 0, 1, 1], [], []>} : vector<10x128xbf16>, vector<128x128xbf16>, vector<10x128xf32> -> vector<10x128xf32>
    %343 = vector.extract_strided_slice %342 {offsets = [1, 0], sizes = [8, 128], strides = [1, 1]} : vector<10x128xf32> to vector<8x128xf32>
    %344 = arith.addf %340, %343 : vector<8x128xf32>
    %c640_276 = arith.constant 640 : index
    %c0_277 = arith.constant 0 : index
    %345 = vector.load %arg2[%c640_276, %c0_277] : memref<1152x128xbf16, #tpu.memory_space<vmem>>, vector<128x128xbf16>
    %cst_278 = arith.constant dense<0.000000e+00> : vector<10x128xf32>
    %346 = tpu.matmul %336, %345, %cst_278 {dimension_numbers = #tpu.dot_dimension_numbers<[1], [0], [0], [1], [0, 0, 1, 1], [], []>} : vector<10x128xbf16>, vector<128x128xbf16>, vector<10x128xf32> -> vector<10x128xf32>
    %347 = vector.extract_strided_slice %346 {offsets = [2, 0], sizes = [8, 128], strides = [1, 1]} : vector<10x128xf32> to vector<8x128xf32>
    %348 = arith.addf %344, %347 : vector<8x128xf32>
    %c2_279 = arith.constant 2 : index
    %c6_280 = arith.constant 6 : index
    %c0_281 = arith.constant 0 : index
    %c0_282 = arith.constant 0 : index
    %349 = vector.load %arg1[%c2_279, %c6_280, %c0_281, %c0_282] : memref<3x8x10x128xbf16, #tpu.memory_space<vmem>>, vector<1x1x10x128xbf16>
    %350 = vector.shape_cast %349 : vector<1x1x10x128xbf16> to vector<10x128xbf16>
    %c768_283 = arith.constant 768 : index
    %c0_284 = arith.constant 0 : index
    %351 = vector.load %arg2[%c768_283, %c0_284] : memref<1152x128xbf16, #tpu.memory_space<vmem>>, vector<128x128xbf16>
    %cst_285 = arith.constant dense<0.000000e+00> : vector<10x128xf32>
    %352 = tpu.matmul %350, %351, %cst_285 {dimension_numbers = #tpu.dot_dimension_numbers<[1], [0], [0], [1], [0, 0, 1, 1], [], []>} : vector<10x128xbf16>, vector<128x128xbf16>, vector<10x128xf32> -> vector<10x128xf32>
    %353 = vector.extract_strided_slice %352 {offsets = [0, 0], sizes = [8, 128], strides = [1, 1]} : vector<10x128xf32> to vector<8x128xf32>
    %354 = arith.addf %348, %353 : vector<8x128xf32>
    %c896_286 = arith.constant 896 : index
    %c0_287 = arith.constant 0 : index
    %355 = vector.load %arg2[%c896_286, %c0_287] : memref<1152x128xbf16, #tpu.memory_space<vmem>>, vector<128x128xbf16>
    %cst_288 = arith.constant dense<0.000000e+00> : vector<10x128xf32>
    %356 = tpu.matmul %350, %355, %cst_288 {dimension_numbers = #tpu.dot_dimension_numbers<[1], [0], [0], [1], [0, 0, 1, 1], [], []>} : vector<10x128xbf16>, vector<128x128xbf16>, vector<10x128xf32> -> vector<10x128xf32>
    %357 = vector.extract_strided_slice %356 {offsets = [1, 0], sizes = [8, 128], strides = [1, 1]} : vector<10x128xf32> to vector<8x128xf32>
    %358 = arith.addf %354, %357 : vector<8x128xf32>
    %c1024_289 = arith.constant 1024 : index
    %c0_290 = arith.constant 0 : index
    %359 = vector.load %arg2[%c1024_289, %c0_290] : memref<1152x128xbf16, #tpu.memory_space<vmem>>, vector<128x128xbf16>
    %cst_291 = arith.constant dense<0.000000e+00> : vector<10x128xf32>
    %360 = tpu.matmul %350, %359, %cst_291 {dimension_numbers = #tpu.dot_dimension_numbers<[1], [0], [0], [1], [0, 0, 1, 1], [], []>} : vector<10x128xbf16>, vector<128x128xbf16>, vector<10x128xf32> -> vector<10x128xf32>
    %361 = vector.extract_strided_slice %360 {offsets = [2, 0], sizes = [8, 128], strides = [1, 1]} : vector<10x128xf32> to vector<8x128xf32>
    %362 = arith.addf %358, %361 : vector<8x128xf32>
    %363 = vector.broadcast %0 : vector<1x128xf32> to vector<8x128xf32>
    %364 = arith.mulf %362, %363 : vector<8x128xf32>
    %365 = vector.broadcast %1 : vector<1x128xf32> to vector<8x128xf32>
    %366 = arith.addf %364, %365 : vector<8x128xf32>
    %cst_292 = arith.constant 0.000000e+00 : f32
    %367 = vector.broadcast %cst_292 : f32 to vector<8x128xf32>
    %368 = arith.maximumf %366, %367 : vector<8x128xf32>
    %369 = arith.truncf %368 : vector<8x128xf32> to vector<8x128xbf16>
    %c6_293 = arith.constant 6 : index
    %c0_294 = arith.constant 0 : index
    %c0_295 = arith.constant 0 : index
    %370 = vector.load %arg5[%c6_293, %c0_294, %c0_295] : memref<8x8x128xbf16, #tpu.memory_space<vmem>>, vector<1x8x128xbf16>
    %371 = vector.shape_cast %370 : vector<1x8x128xbf16> to vector<8x128xbf16>
    %372 = vector.shape_cast %369 : vector<8x128xbf16> to vector<1x8x128xbf16>
    tpu.vector_store %arg5[%c6_293, %c0_294, %c0_295], %372 {strides = array<i32>} : memref<8x8x128xbf16, #tpu.memory_space<vmem>>, vector<1x8x128xbf16>,
    %cst_296 = arith.constant 0.000000e+00 : f32
    %373 = vector.broadcast %cst_296 : f32 to vector<8x128xf32>
    %c0_297 = arith.constant 0 : index
    %c7 = arith.constant 7 : index
    %c0_298 = arith.constant 0 : index
    %c0_299 = arith.constant 0 : index
    %374 = vector.load %arg1[%c0_297, %c7, %c0_298, %c0_299] : memref<3x8x10x128xbf16, #tpu.memory_space<vmem>>, vector<1x1x10x128xbf16>
    %375 = vector.shape_cast %374 : vector<1x1x10x128xbf16> to vector<10x128xbf16>
    %c0_300 = arith.constant 0 : index
    %c0_301 = arith.constant 0 : index
    %376 = vector.load %arg2[%c0_300, %c0_301] : memref<1152x128xbf16, #tpu.memory_space<vmem>>, vector<128x128xbf16>
    %cst_302 = arith.constant dense<0.000000e+00> : vector<10x128xf32>
    %377 = tpu.matmul %375, %376, %cst_302 {dimension_numbers = #tpu.dot_dimension_numbers<[1], [0], [0], [1], [0, 0, 1, 1], [], []>} : vector<10x128xbf16>, vector<128x128xbf16>, vector<10x128xf32> -> vector<10x128xf32>
    %378 = vector.extract_strided_slice %377 {offsets = [0, 0], sizes = [8, 128], strides = [1, 1]} : vector<10x128xf32> to vector<8x128xf32>
    %379 = arith.addf %373, %378 : vector<8x128xf32>
    %c128_303 = arith.constant 128 : index
    %c0_304 = arith.constant 0 : index
    %380 = vector.load %arg2[%c128_303, %c0_304] : memref<1152x128xbf16, #tpu.memory_space<vmem>>, vector<128x128xbf16>
    %cst_305 = arith.constant dense<0.000000e+00> : vector<10x128xf32>
    %381 = tpu.matmul %375, %380, %cst_305 {dimension_numbers = #tpu.dot_dimension_numbers<[1], [0], [0], [1], [0, 0, 1, 1], [], []>} : vector<10x128xbf16>, vector<128x128xbf16>, vector<10x128xf32> -> vector<10x128xf32>
    %382 = vector.extract_strided_slice %381 {offsets = [1, 0], sizes = [8, 128], strides = [1, 1]} : vector<10x128xf32> to vector<8x128xf32>
    %383 = arith.addf %379, %382 : vector<8x128xf32>
    %c256_306 = arith.constant 256 : index
    %c0_307 = arith.constant 0 : index
    %384 = vector.load %arg2[%c256_306, %c0_307] : memref<1152x128xbf16, #tpu.memory_space<vmem>>, vector<128x128xbf16>
    %cst_308 = arith.constant dense<0.000000e+00> : vector<10x128xf32>
    %385 = tpu.matmul %375, %384, %cst_308 {dimension_numbers = #tpu.dot_dimension_numbers<[1], [0], [0], [1], [0, 0, 1, 1], [], []>} : vector<10x128xbf16>, vector<128x128xbf16>, vector<10x128xf32> -> vector<10x128xf32>
    %386 = vector.extract_strided_slice %385 {offsets = [2, 0], sizes = [8, 128], strides = [1, 1]} : vector<10x128xf32> to vector<8x128xf32>
    %387 = arith.addf %383, %386 : vector<8x128xf32>
    %c1_309 = arith.constant 1 : index
    %c7_310 = arith.constant 7 : index
    %c0_311 = arith.constant 0 : index
    %c0_312 = arith.constant 0 : index
    %388 = vector.load %arg1[%c1_309, %c7_310, %c0_311, %c0_312] : memref<3x8x10x128xbf16, #tpu.memory_space<vmem>>, vector<1x1x10x128xbf16>
    %389 = vector.shape_cast %388 : vector<1x1x10x128xbf16> to vector<10x128xbf16>
    %c384_313 = arith.constant 384 : index
    %c0_314 = arith.constant 0 : index
    %390 = vector.load %arg2[%c384_313, %c0_314] : memref<1152x128xbf16, #tpu.memory_space<vmem>>, vector<128x128xbf16>
    %cst_315 = arith.constant dense<0.000000e+00> : vector<10x128xf32>
    %391 = tpu.matmul %389, %390, %cst_315 {dimension_numbers = #tpu.dot_dimension_numbers<[1], [0], [0], [1], [0, 0, 1, 1], [], []>} : vector<10x128xbf16>, vector<128x128xbf16>, vector<10x128xf32> -> vector<10x128xf32>
    %392 = vector.extract_strided_slice %391 {offsets = [0, 0], sizes = [8, 128], strides = [1, 1]} : vector<10x128xf32> to vector<8x128xf32>
    %393 = arith.addf %387, %392 : vector<8x128xf32>
    %c512_316 = arith.constant 512 : index
    %c0_317 = arith.constant 0 : index
    %394 = vector.load %arg2[%c512_316, %c0_317] : memref<1152x128xbf16, #tpu.memory_space<vmem>>, vector<128x128xbf16>
    %cst_318 = arith.constant dense<0.000000e+00> : vector<10x128xf32>
    %395 = tpu.matmul %389, %394, %cst_318 {dimension_numbers = #tpu.dot_dimension_numbers<[1], [0], [0], [1], [0, 0, 1, 1], [], []>} : vector<10x128xbf16>, vector<128x128xbf16>, vector<10x128xf32> -> vector<10x128xf32>
    %396 = vector.extract_strided_slice %395 {offsets = [1, 0], sizes = [8, 128], strides = [1, 1]} : vector<10x128xf32> to vector<8x128xf32>
    %397 = arith.addf %393, %396 : vector<8x128xf32>
    %c640_319 = arith.constant 640 : index
    %c0_320 = arith.constant 0 : index
    %398 = vector.load %arg2[%c640_319, %c0_320] : memref<1152x128xbf16, #tpu.memory_space<vmem>>, vector<128x128xbf16>
    %cst_321 = arith.constant dense<0.000000e+00> : vector<10x128xf32>
    %399 = tpu.matmul %389, %398, %cst_321 {dimension_numbers = #tpu.dot_dimension_numbers<[1], [0], [0], [1], [0, 0, 1, 1], [], []>} : vector<10x128xbf16>, vector<128x128xbf16>, vector<10x128xf32> -> vector<10x128xf32>
    %400 = vector.extract_strided_slice %399 {offsets = [2, 0], sizes = [8, 128], strides = [1, 1]} : vector<10x128xf32> to vector<8x128xf32>
    %401 = arith.addf %397, %400 : vector<8x128xf32>
    %c2_322 = arith.constant 2 : index
    %c7_323 = arith.constant 7 : index
    %c0_324 = arith.constant 0 : index
    %c0_325 = arith.constant 0 : index
    %402 = vector.load %arg1[%c2_322, %c7_323, %c0_324, %c0_325] : memref<3x8x10x128xbf16, #tpu.memory_space<vmem>>, vector<1x1x10x128xbf16>
    %403 = vector.shape_cast %402 : vector<1x1x10x128xbf16> to vector<10x128xbf16>
    %c768_326 = arith.constant 768 : index
    %c0_327 = arith.constant 0 : index
    %404 = vector.load %arg2[%c768_326, %c0_327] : memref<1152x128xbf16, #tpu.memory_space<vmem>>, vector<128x128xbf16>
    %cst_328 = arith.constant dense<0.000000e+00> : vector<10x128xf32>
    %405 = tpu.matmul %403, %404, %cst_328 {dimension_numbers = #tpu.dot_dimension_numbers<[1], [0], [0], [1], [0, 0, 1, 1], [], []>} : vector<10x128xbf16>, vector<128x128xbf16>, vector<10x128xf32> -> vector<10x128xf32>
    %406 = vector.extract_strided_slice %405 {offsets = [0, 0], sizes = [8, 128], strides = [1, 1]} : vector<10x128xf32> to vector<8x128xf32>
    %407 = arith.addf %401, %406 : vector<8x128xf32>
    %c896_329 = arith.constant 896 : index
    %c0_330 = arith.constant 0 : index
    %408 = vector.load %arg2[%c896_329, %c0_330] : memref<1152x128xbf16, #tpu.memory_space<vmem>>, vector<128x128xbf16>
    %cst_331 = arith.constant dense<0.000000e+00> : vector<10x128xf32>
    %409 = tpu.matmul %403, %408, %cst_331 {dimension_numbers = #tpu.dot_dimension_numbers<[1], [0], [0], [1], [0, 0, 1, 1], [], []>} : vector<10x128xbf16>, vector<128x128xbf16>, vector<10x128xf32> -> vector<10x128xf32>
    %410 = vector.extract_strided_slice %409 {offsets = [1, 0], sizes = [8, 128], strides = [1, 1]} : vector<10x128xf32> to vector<8x128xf32>
    %411 = arith.addf %407, %410 : vector<8x128xf32>
    %c1024_332 = arith.constant 1024 : index
    %c0_333 = arith.constant 0 : index
    %412 = vector.load %arg2[%c1024_332, %c0_333] : memref<1152x128xbf16, #tpu.memory_space<vmem>>, vector<128x128xbf16>
    %cst_334 = arith.constant dense<0.000000e+00> : vector<10x128xf32>
    %413 = tpu.matmul %403, %412, %cst_334 {dimension_numbers = #tpu.dot_dimension_numbers<[1], [0], [0], [1], [0, 0, 1, 1], [], []>} : vector<10x128xbf16>, vector<128x128xbf16>, vector<10x128xf32> -> vector<10x128xf32>
    %414 = vector.extract_strided_slice %413 {offsets = [2, 0], sizes = [8, 128], strides = [1, 1]} : vector<10x128xf32> to vector<8x128xf32>
    %415 = arith.addf %411, %414 : vector<8x128xf32>
    %416 = vector.broadcast %0 : vector<1x128xf32> to vector<8x128xf32>
    %417 = arith.mulf %415, %416 : vector<8x128xf32>
    %418 = vector.broadcast %1 : vector<1x128xf32> to vector<8x128xf32>
    %419 = arith.addf %417, %418 : vector<8x128xf32>
    %cst_335 = arith.constant 0.000000e+00 : f32
    %420 = vector.broadcast %cst_335 : f32 to vector<8x128xf32>
    %421 = arith.maximumf %419, %420 : vector<8x128xf32>
    %422 = arith.truncf %421 : vector<8x128xf32> to vector<8x128xbf16>
    %c7_336 = arith.constant 7 : index
    %c0_337 = arith.constant 0 : index
    %c0_338 = arith.constant 0 : index
    %423 = vector.load %arg5[%c7_336, %c0_337, %c0_338] : memref<8x8x128xbf16, #tpu.memory_space<vmem>>, vector<1x8x128xbf16>
    %424 = vector.shape_cast %423 : vector<1x8x128xbf16> to vector<8x128xbf16>
    %425 = vector.shape_cast %422 : vector<8x128xbf16> to vector<1x8x128xbf16>
    tpu.vector_store %arg5[%c7_336, %c0_337, %c0_338], %425 {strides = array<i32>} : memref<8x8x128xbf16, #tpu.memory_space<vmem>>, vector<1x8x128xbf16>,
    return
  }
  func.func @transform_0(%arg0: i32) -> (i32, i32, i32, i32) {
    %c0_i32 = arith.constant 0 : i32
    %c0_i32_0 = arith.constant 0 : i32
    %c0_i32_1 = arith.constant 0 : i32
    %c0_i32_2 = arith.constant 0 : i32
    return %c0_i32, %arg0, %c0_i32_0, %c0_i32_1 : i32, i32, i32, i32
  }
  func.func @transform_1(%arg0: i32) -> (i32, i32) {
    %c0_i32 = arith.constant 0 : i32
    %c0_i32_0 = arith.constant 0 : i32
    %c0_i32_1 = arith.constant 0 : i32
    return %c0_i32, %c0_i32_0 : i32, i32
  }
  func.func @transform_2(%arg0: i32) -> (i32, i32) {
    %c0_i32 = arith.constant 0 : i32
    %c0_i32_0 = arith.constant 0 : i32
    %c0_i32_1 = arith.constant 0 : i32
    return %c0_i32, %c0_i32_0 : i32, i32
  }
  func.func @transform_3(%arg0: i32) -> (i32, i32) {
    %c0_i32 = arith.constant 0 : i32
    %c0_i32_0 = arith.constant 0 : i32
    %c0_i32_1 = arith.constant 0 : i32
    return %c0_i32, %c0_i32_0 : i32, i32
  }
  func.func @transform_4(%arg0: i32) -> (i32, i32, i32) {
    %c0_i32 = arith.constant 0 : i32
    %c0_i32_0 = arith.constant 0 : i32
    %c0_i32_1 = arith.constant 0 : i32
    return %arg0, %c0_i32, %c0_i32_0 : i32, i32, i32
  }
}

module attributes {stable_mosaic.version = 11 : i64} {
  func.func @_maxpool_kernel(%arg0: i32, %arg1: memref<9x32x128xbf16, #tpu.memory_space<vmem>>, %arg2: memref<32x128xbf16, #tpu.memory_space<vmem>>) attributes {dimension_semantics = [#tpu.dimension_semantics<parallel>], iteration_bounds = array<i64: 1>, scalar_prefetch = 0 : i64, scratch_operands = 0 : i64, tpu.core_type = #tpu.core_type<tc>, window_params = [{transform_indices = @transform_0, window_bounds = array<i64: 9, 32, 128>}, {transform_indices = @transform_1, window_bounds = array<i64: 32, 128>}]} {
    %c0 = arith.constant 0 : index
    %c0_0 = arith.constant 0 : index
    %c0_1 = arith.constant 0 : index
    %0 = vector.load %arg1[%c0, %c0_0, %c0_1] : memref<9x32x128xbf16, #tpu.memory_space<vmem>>, vector<9x32x128xbf16>
    %cst = arith.constant dense<0xFF80> : vector<32x128xbf16>
    %1 = vector.multi_reduction <maximumf>, %0, %cst [0] : vector<9x32x128xbf16> to vector<32x128xbf16>
    %c0_2 = arith.constant 0 : index
    %c0_3 = arith.constant 0 : index
    %2 = vector.load %arg2[%c0_2, %c0_3] : memref<32x128xbf16, #tpu.memory_space<vmem>>, vector<32x128xbf16>
    tpu.vector_store %arg2[%c0_2, %c0_3], %1 {strides = array<i32>} : memref<32x128xbf16, #tpu.memory_space<vmem>>, vector<32x128xbf16>,
    return
  }
  func.func @transform_0(%arg0: i32) -> (i32, i32, i32) {
    %c0_i32 = arith.constant 0 : i32
    %c0_i32_0 = arith.constant 0 : i32
    %c0_i32_1 = arith.constant 0 : i32
    return %c0_i32, %arg0, %c0_i32_0 : i32, i32, i32
  }
  func.func @transform_1(%arg0: i32) -> (i32, i32) {
    %c0_i32 = arith.constant 0 : i32
    %c0_i32_0 = arith.constant 0 : i32
    return %arg0, %c0_i32 : i32, i32
  }
}

</mosaic_0001>

<bundles_post_ra>
// kernel: feature_map_convolution.4
= control target key start
LH: loop header
LB: loop body
LE: loop exit
PB: predicated region body
PF: predicated region fallthrough
CT: control target
= control target key end

     0   :  { %vm114_vm0 = vcmask 1044480   ;;  %vm115_vm1 = vcmask 1045504   ;;  %v508_v1 = vmov 65535   ;;  %vm89_vm2 = vcmask 220160   ;;  %s620_s1 = inlined_call_operand.vmem [shape: bf16[27,128], index: 1, kind: input, shape index: {}]   ;;  %s621_s0 = inlined_call_operand.vmem [shape: bf16[128,27], index: 0, kind: input, shape index: {}]   ;;  %s622_s2 = inlined_call_operand.vmem [shape: f32[1,128], index: 2, kind: input, shape index: {}]   ;;  %s623_s3 = inlined_call_operand.vmem [shape: f32[1,128], index: 3, kind: input, shape index: {}]   ;;  %s624_s4 = inlined_call_operand.vmem [shape: bf16[128,128], index: 4, kind: output, shape index: {}]  }
   0x1   :  { %v498_v0 = vld [vmem:[%s620_s1 + $0x8] sm:$0x3f]   ;;  %v116_v2 = vsel %vm114_vm0, 4294967295, %v508_v1  ;;  %v500_v4 = vld [vmem:[%s621_s0] sm:$0xff]   ;;  %v504_v10 = vld [vmem:[%s621_s0 + $0x10] sm:$0xff]  }
   0x2   :  { %v117_v3 = vsel %vm115_vm1, %v116_v2, 0  ;;  %v499_v6 = vld [vmem:[%s620_s1] sm:$0xff]   ;;  %477 = vmatprep.mubr.msk.bf16.mxu0 %vm89_vm2, %v500_v4  ;;  %v502_v8 = vld [vmem:[%s621_s0 + $0x8] sm:$0xff]   ;;  %v505_v11 = vld [vmem:[%s621_s0 + $0x30] sm:$0xff]  }
   0x3   :  { %v119_v5 = vand.u32 %v498_v0, %v117_v3  ;;  %v501_v7 = vld [vmem:[%s621_s0 + $0x20] sm:$0xff]   ;;  %v503_v9 = vld [vmem:[%s621_s0 + $0x28] sm:$0xff]   ;;  %v506_v12 = vld [vmem:[%s621_s0 + $0x18] sm:$0xff]  }
   0x4   :  { %485 = vmatprep.mubr.msk.bf16.mxu1 %vm89_vm2, %v501_v7  ;;  %v507_v13 = vld [vmem:[%s621_s0 + $0x38] sm:$0xff]   ;;  %v575_v14 = vld [vmem:[%s622_s2] ss:$0 sm:$0xff] }
   0x5   :  { %473 = vmatprep.subr.bf16.mxu0 %v119_v5  ;;  %493 = vmatprep.subr.bf16.mxu1 %v119_v5  ;;  %v383_v19 = vld [vmem:[%s623_s3] ss:$0 sm:$0xff] }
   0x6   :  { %474 = vmatpush3.bf16.msra.mxu0 %v119_v5  ;;  %495 = vmatpush3.bf16.msra.mxu1 %v119_v5 }
   0x7   :  { %475 = vmatprep.subr.bf16.mxu0 %v499_v6  ;;  %494 = vmatprep.subr.bf16.mxu1 %v499_v6 }
   0xa   :  { %476 = vmatpush3.bf16.msra.mxu0 %v499_v6  ;;  %496 = vmatpush3.bf16.msra.mxu1 %v499_v6 }
   0xd   :  { %478 = vmatmul.mubr.msk.bf16.vlgmr.msra.gmra.mxu0 %vm89_vm2, %v502_v8  ;;  %486 = vmatmul.mubr.msk.bf16.vlgmr.msra.gmra.mxu1 %vm89_vm2, %v503_v9 }
   0xe   :  { %481 = vmatprep.mubr.msk.bf16.mxu0 %vm89_vm2, %v504_v10  ;;  %489 = vmatprep.mubr.msk.bf16.mxu1 %vm89_vm2, %v505_v11 }
  0x15   :  { %482 = vmatmul.mubr.msk.bf16.gmra.mxu0 %vm89_vm2, %v506_v12  ;;  %490 = vmatmul.mubr.msk.bf16.gmra.mxu1 %vm89_vm2, %v507_v13 }
  0xcd   :  { %v479_v15 = vpop.f32.mrf.mxu0  ;;  %v487_v16 = vpop.f32.mrf.mxu1 }
  0xce   :  { %v227_v17 = vmul.f32 %v479_v15, %v575_v14  ;;  %v235_v18 = vmul.f32 %v487_v16, %v575_v14 }
  0xcf   :  { %v155_v20 = vpop.f32.mrf.mxu0  ;;  %v187_v21 = vpop.f32.mrf.mxu1 }
  0xd0   :  { %v225_v22 = vmul.f32 %v575_v14, %v155_v20  ;;  %v233_v23 = vmul.f32 %v575_v14, %v187_v21  ;;  %v250_v26 = vadd.f32 %v383_v19, %v227_v17  ;;  %v258_v27 = vadd.f32 %v383_v19, %v235_v18 }
  0xd1   :  { %v480_v24 = vpop.f32.mrf.mxu0  ;;  %v488_v25 = vpop.f32.mrf.mxu1 }
  0xd2   :  { %v228_v28 = vmul.f32 %v480_v24, %v575_v14  ;;  %v236_v29 = vmul.f32 %v488_v25, %v575_v14  ;;  %v248_v32 = vadd.f32 %v383_v19, %v225_v22  ;;  %v256_v33 = vadd.f32 %v383_v19, %v233_v23 }
  0xd3   :  { %v158_v30 = vpop.f32.mrf.mxu0  ;;  %v190_v31 = vpop.f32.mrf.mxu1  ;;  %v266_v40 = vmax.f32 %v250_v26, 0.0  ;;  %v274_v41 = vmax.f32 %v258_v27, 0.0 }
  0xd4   :  { %v226_v34 = vmul.f32 %v575_v14, %v158_v30  ;;  %v234_v35 = vmul.f32 %v575_v14, %v190_v31  ;;  %v251_v36 = vadd.f32 %v383_v19, %v228_v28  ;;  %v259_v37 = vadd.f32 %v383_v19, %v236_v29 }
  0xd5   :  { %v483_v38 = vpop.f32.mrf.mxu0  ;;  %v491_v39 = vpop.f32.mrf.mxu1  ;;  %v264_v50 = vmax.f32 %v248_v32, 0.0  ;;  %v272_v51 = vmax.f32 %v256_v33, 0.0 }
  0xd6   :  { %v249_v42 = vadd.f32 %v383_v19, %v226_v34  ;;  %v257_v43 = vadd.f32 %v383_v19, %v234_v35  ;;  %v267_v44 = vmax.f32 %v251_v36, 0.0  ;;  %v275_v45 = vmax.f32 %v259_v37, 0.0 }
  0xd7   :  { %v231_v46 = vmul.f32 %v483_v38, %v575_v14  ;;  %v239_v47 = vmul.f32 %v491_v39, %v575_v14  ;;  %v171_v48 = vpop.f32.mrf.mxu0  ;;  %v203_v49 = vpop.f32.mrf.mxu1 }
  0xd8   :  { %v265_v52 = vmax.f32 %v249_v42, 0.0  ;;  %v273_v53 = vmax.f32 %v257_v43, 0.0  ;;  %v424_v54 = vpack.c.bf16 %v267_v44, %v266_v40  ;;  %v444_v55 = vpack.c.bf16 %v275_v45, %v274_v41 }
  0xd9   :  { %v229_v56 = vmul.f32 %v575_v14, %v171_v48  ;;  %v237_v57 = vmul.f32 %v575_v14, %v203_v49  ;;  %v484_v58 = vpop.f32.mrf.mxu0  ;;  %v492_v59 = vpop.f32.mrf.mxu1  ;;  %v254_v62 = vadd.f32 %v383_v19, %v231_v46  ;;  %v262_v63 = vadd.f32 %v383_v19, %v239_v47 }
  0xda   :  { %v419_v60 = vpack.c.bf16 %v265_v52, %v264_v50  ;;  %v439_v61 = vpack.c.bf16 %v273_v53, %v272_v51  ;;  %456 = vst [vmem:[%s624_s4 + $0x8] sm:$0xff] %v424_v54   ;;  %460 = vst [vmem:[%s624_s4 + $0x28] sm:$0xff] %v444_v55   ;;  %v232_v0 = vmul.f32 %v484_v58, %v575_v14 }
  0xdb   :  { %v240_v1 = vmul.f32 %v492_v59, %v575_v14  ;;  %v174_v2 = vpop.f32.mrf.mxu0  ;;  %v206_v3 = vpop.f32.mrf.mxu1  ;;  %v252_v4 = vadd.f32 %v383_v19, %v229_v56  ;;  %v260_v5 = vadd.f32 %v383_v19, %v237_v57  ;;  %v270_v12 = vmax.f32 %v254_v62, 0.0 }
  0xdc   :  { %420 = vst [vmem:[%s624_s4] sm:$0xff] %v419_v60   ;;  %459 = vst [vmem:[%s624_s4 + $0x20] sm:$0xff] %v439_v61   ;;  %v230_v6 = vmul.f32 %v575_v14, %v174_v2  ;;  %v238_v7 = vmul.f32 %v575_v14, %v206_v3  ;;  %v255_v8 = vadd.f32 %v383_v19, %v232_v0  ;;  %v278_v13 = vmax.f32 %v262_v63, 0.0 }
  0xdd   :  { %v263_v9 = vadd.f32 %v383_v19, %v240_v1  ;;  %v268_v17 = vmax.f32 %v252_v4, 0.0  ;;  %v276_v18 = vmax.f32 %v260_v5, 0.0 }
  0xde   :  { %v253_v10 = vadd.f32 %v383_v19, %v230_v6  ;;  %v261_v11 = vadd.f32 %v383_v19, %v238_v7  ;;  %v271_v15 = vmax.f32 %v255_v8, 0.0 }
  0xdf   :  { %v279_v16 = vmax.f32 %v263_v9, 0.0 }
  0xe0   :  { %v269_v20 = vmax.f32 %v253_v10, 0.0  ;;  %v277_v21 = vmax.f32 %v261_v11, 0.0  ;;  %v434_v22 = vpack.c.bf16 %v271_v15, %v270_v12 }
  0xe1   :  { %v454_v23 = vpack.c.bf16 %v279_v16, %v278_v13 }
  0xe2   :  { %v429_v24 = vpack.c.bf16 %v269_v20, %v268_v17  ;;  %v449_v25 = vpack.c.bf16 %v277_v21, %v276_v18  ;;  %458 = vst [vmem:[%s624_s4 + $0x18] sm:$0xff] %v434_v22  }
  0xe3   :  { %462 = vst [vmem:[%s624_s4 + $0x38] sm:$0xff] %v454_v23  }
  0xe4   :  { %457 = vst [vmem:[%s624_s4 + $0x10] sm:$0xff] %v429_v24   ;;  %461 = vst [vmem:[%s624_s4 + $0x30] sm:$0xff] %v449_v25  }

// kernel: feature_map_convolution.7
= control target key start
LH: loop header
LB: loop body
LE: loop exit
PB: predicated region body
PF: predicated region fallthrough
CT: control target
= control target key end

     0   :  { %vm45_vm0 = vcmask 1043456   ;;  %s368_s0 = inlined_call_operand.vmem [shape: bf16[9,32,128], index: 0, kind: input, shape index: {}]   ;;  %s369_s1 = inlined_call_operand.vmem [shape: bf16[32,128], index: 1, kind: output, shape index: {}]  }
   0x1   :  { %v9_v0 = vld [vmem:[%s368_s0] sm:$0xf]  ;;  %v13_v1 = vld [vmem:[%s368_s0 + $0x10] sm:$0xf]  ;;  %v10_v3 = vld [vmem:[%s368_s0 + $0x4] sm:$0xf] }
   0x2   :  { %v17_v2 = vld [vmem:[%s368_s0 + $0x20] sm:$0xf]  ;;  %v14_v4 = vld [vmem:[%s368_s0 + $0x14] sm:$0xf]  ;;  %v18_v5 = vld [vmem:[%s368_s0 + $0x24] sm:$0xf] }
   0x3   :  { %v21_v6 = vld [vmem:[%s368_s0 + $0x30] sm:$0xf]  ;;  %v48_v7 = vsel %vm45_vm0, %v9_v0, 4286644096  ;;  %v51_v8 = vsel %vm45_vm0, %v13_v1, 4286644096 }
   0x4   :  { %v55_v9 = vsel %vm45_vm0, %v17_v2, 4286644096  ;;  %v25_v10 = vld [vmem:[%s368_s0 + $0x40] sm:$0xf]  ;;  %v53_v11 = vmax.bf16 %v51_v8, %v48_v7  ;;  %v22_v12 = vld [vmem:[%s368_s0 + $0x34] sm:$0xf] }
   0x5   :  { %v29_v13 = vld [vmem:[%s368_s0 + $0x50] sm:$0xf]  ;;  %v59_v14 = vsel %vm45_vm0, %v21_v6, 4286644096  ;;  %v83_v16 = vsel %vm45_vm0, %v10_v3, 4286644096 }
   0x6   :  { %v57_v15 = vmax.bf16 %v55_v9, %v53_v11  ;;  %v86_v17 = vsel %vm45_vm0, %v14_v4, 4286644096  ;;  %v90_v18 = vsel %vm45_vm0, %v18_v5, 4286644096  ;;  %v26_v19 = vld [vmem:[%s368_s0 + $0x44] sm:$0xf] }
   0x7   :  { %v63_v20 = vsel %vm45_vm0, %v25_v10, 4286644096  ;;  %v88_v21 = vmax.bf16 %v86_v17, %v83_v16  ;;  %v30_v22 = vld [vmem:[%s368_s0 + $0x54] sm:$0xf]  ;;  %v33_v23 = vld [vmem:[%s368_s0 + $0x60] sm:$0xf] }
   0x8   :  { %v61_v24 = vmax.bf16 %v59_v14, %v57_v15  ;;  %v94_v25 = vsel %vm45_vm0, %v22_v12, 4286644096  ;;  %v34_v26 = vld [vmem:[%s368_s0 + $0x64] sm:$0xf]  ;;  %v67_v27 = vsel %vm45_vm0, %v29_v13, 4286644096 }
   0x9   :  { %v92_v28 = vmax.bf16 %v90_v18, %v88_v21  ;;  %v37_v29 = vld [vmem:[%s368_s0 + $0x70] sm:$0xf]  ;;  %v41_v30 = vld [vmem:[%s368_s0 + $0x80] sm:$0xf]  ;;  %v98_v32 = vsel %vm45_vm0, %v26_v19, 4286644096 }
   0xa   :  { %v65_v31 = vmax.bf16 %v63_v20, %v61_v24  ;;  %v38_v33 = vld [vmem:[%s368_s0 + $0x74] sm:$0xf]  ;;  %v71_v34 = vsel %vm45_vm0, %v33_v23, 4286644096  ;;  %v102_v36 = vsel %vm45_vm0, %v30_v22, 4286644096 }
   0xb   :  { %v96_v35 = vmax.bf16 %v94_v25, %v92_v28  ;;  %v42_v37 = vld [vmem:[%s368_s0 + $0x84] sm:$0xf]  ;;  %v11_v39 = vld [vmem:[%s368_s0 + $0x8] sm:$0xf]  ;;  %v15_v40 = vld [vmem:[%s368_s0 + $0x18] sm:$0xf] }
   0xc   :  { %v69_v38 = vmax.bf16 %v67_v27, %v65_v31  ;;  %v19_v41 = vld [vmem:[%s368_s0 + $0x28] sm:$0xf]  ;;  %v75_v42 = vsel %vm45_vm0, %v37_v29, 4286644096  ;;  %v79_v43 = vsel %vm45_vm0, %v41_v30, 4286644096 }
   0xd   :  { %v100_v44 = vmax.bf16 %v98_v32, %v96_v35  ;;  %v106_v45 = vsel %vm45_vm0, %v34_v26, 4286644096  ;;  %v12_v47 = vld [vmem:[%s368_s0 + $0xc] sm:$0xf]  ;;  %v23_v48 = vld [vmem:[%s368_s0 + $0x38] sm:$0xf] }
   0xe   :  { %v73_v46 = vmax.bf16 %v71_v34, %v69_v38  ;;  %v27_v49 = vld [vmem:[%s368_s0 + $0x48] sm:$0xf]  ;;  %v118_v51 = vsel %vm45_vm0, %v11_v39, 4286644096  ;;  %v121_v52 = vsel %vm45_vm0, %v15_v40, 4286644096 }
   0xf   :  { %v104_v50 = vmax.bf16 %v102_v36, %v100_v44  ;;  %v125_v53 = vsel %vm45_vm0, %v19_v41, 4286644096  ;;  %v110_v55 = vsel %vm45_vm0, %v38_v33, 4286644096  ;;  %v16_v56 = vld [vmem:[%s368_s0 + $0x1c] sm:$0xf]  ;;  %v123_v58 = vmax.bf16 %v121_v52, %v118_v51 }
  0x10   :  { %v77_v54 = vmax.bf16 %v75_v42, %v73_v46  ;;  %v20_v57 = vld [vmem:[%s368_s0 + $0x2c] sm:$0xf]  ;;  %v114_v60 = vsel %vm45_vm0, %v42_v37, 4286644096  ;;  %v24_v61 = vld [vmem:[%s368_s0 + $0x3c] sm:$0xf] }
  0x11   :  { %v108_v59 = vmax.bf16 %v106_v45, %v104_v50  ;;  %v129_v62 = vsel %vm45_vm0, %v23_v48, 4286644096  ;;  %v31_v63 = vld [vmem:[%s368_s0 + $0x58] sm:$0xf]  ;;  %v127_v0 = vmax.bf16 %v125_v53, %v123_v58  ;;  %v133_v1 = vsel %vm45_vm0, %v27_v49, 4286644096 }
  0x12   :  { %v153_v2 = vsel %vm45_vm0, %v12_v47, 4286644096  ;;  %v81_v3 = vmax.bf16 %v79_v43, %v77_v54  ;;  %v156_v5 = vsel %vm45_vm0, %v16_v56, 4286644096  ;;  %v160_v6 = vsel %vm45_vm0, %v20_v57, 4286644096 }
  0x13   :  { %v112_v4 = vmax.bf16 %v110_v55, %v108_v59  ;;  %v28_v7 = vld [vmem:[%s368_s0 + $0x4c] sm:$0xf]  ;;  %v35_v8 = vld [vmem:[%s368_s0 + $0x68] sm:$0xf]  ;;  %v131_v9 = vmax.bf16 %v129_v62, %v127_v0  ;;  %v158_v10 = vmax.bf16 %v156_v5, %v153_v2  ;;  %v137_v12 = vsel %vm45_vm0, %v31_v63, 4286644096 }
  0x14   :  { %v164_v13 = vsel %vm45_vm0, %v24_v61, 4286644096  ;;  %v32_v14 = vld [vmem:[%s368_s0 + $0x5c] sm:$0xf]  ;;  %v39_v15 = vld [vmem:[%s368_s0 + $0x78] sm:$0xf] }
  0x15   :  { %v116_v11 = vmax.bf16 %v114_v60, %v112_v4  ;;  %v135_v16 = vmax.bf16 %v133_v1, %v131_v9  ;;  %v162_v17 = vmax.bf16 %v160_v6, %v158_v10  ;;  %v141_v19 = vsel %vm45_vm0, %v35_v8, 4286644096  ;;  %v36_v21 = vld [vmem:[%s368_s0 + $0x6c] sm:$0xf]  ;;  %v40_v26 = vld [vmem:[%s368_s0 + $0x7c] sm:$0xf] }
  0x16   :  { %v168_v20 = vsel %vm45_vm0, %v28_v7, 4286644096  ;;  %v145_v24 = vsel %vm45_vm0, %v39_v15, 4286644096  ;;  %v172_v25 = vsel %vm45_vm0, %v32_v14, 4286644096 }
  0x17   :  { %v205_v18 = vcombine.low %v81_v3, %v116_v11  ;;  %v139_v22 = vmax.bf16 %v137_v12, %v135_v16  ;;  %v166_v23 = vmax.bf16 %v164_v13, %v162_v17  ;;  %v43_v27 = vld [vmem:[%s368_s0 + $0x88] sm:$0xf]  ;;  %v176_v30 = vsel %vm45_vm0, %v36_v21, 4286644096  ;;  %v44_v31 = vld [vmem:[%s368_s0 + $0x8c] sm:$0xf] }
  0x18   :  { %v149_v34 = vsel %vm45_vm0, %v43_v27, 4286644096  ;;  %v180_v35 = vsel %vm45_vm0, %v40_v26, 4286644096  ;;  %v184_v37 = vsel %vm45_vm0, %v44_v31, 4286644096 }
  0x19   :  { %199 = vst [vmem:[%s369_s1] sm:$0xff] %v205_v18   ;;  %v143_v28 = vmax.bf16 %v141_v19, %v139_v22  ;;  %v170_v29 = vmax.bf16 %v168_v20, %v166_v23 }
  0x1b   :  { %v147_v32 = vmax.bf16 %v145_v24, %v143_v28  ;;  %v174_v33 = vmax.bf16 %v172_v25, %v170_v29 }
  0x1d   :  { %v178_v36 = vmax.bf16 %v176_v30, %v174_v33  ;;  %v151_v38 = vmax.bf16 %v149_v34, %v147_v32 }
  0x1f   :  { %v182_v39 = vmax.bf16 %v180_v35, %v178_v36 }
  0x21   :  { %v186_v40 = vmax.bf16 %v184_v37, %v182_v39 }
  0x23   :  { %v206_v41 = vcombine.low %v151_v38, %v186_v40 }
  0x25   :  { %207 = vst [vmem:[%s369_s1 + $0x8] sm:$0xff] %v206_v41  }

// kernel: feature_map_convolution.5
= control target key start
LH: loop header
LB: loop body
LE: loop exit
PB: predicated region body
PF: predicated region fallthrough
CT: control target
= control target key end

     0   :  { %s12112_s15 = smov 0   ;;  %s12114_s16 = smov 0   ;;  %s15046_s0 = inlined_call_operand.vmem [shape: bf16[3,16,10,128], index: 0, kind: input, shape index: {}]   ;;  %s15047_s1 = inlined_call_operand.vmem [shape: bf16[1152,128], index: 1, kind: input, shape index: {}]   ;;  %s15048_s2 = inlined_call_operand.vmem [shape: f32[1,128], index: 2, kind: input, shape index: {}]   ;;  %s15049_s3 = inlined_call_operand.vmem [shape: f32[1,128], index: 3, kind: input, shape index: {}]   ;;  %s15050_s4 = inlined_call_operand.vmem [shape: bf16[16,8,128], index: 4, kind: output, shape index: {}]  }
   0x1   :  { %s12116_s17 = smov 0  }
   0x2 LB: > { %s8670_s18 = sadd.s32 4294967295, %s12083_s17   ;;  %s12129_s19 = sadd.s32 1, %s12083_s17   ;;  %s12083_s17 = sphi %s12116_s17, %s15053_s17   ;;  %s12079_s16 = sphi %s12114_s16, %s15052_s16   ;;  %s12075_s15 = sphi %s12112_s15, %s15051_s15  }
   0x3   : > { %s18_s20 = ssub.s32 %s12083_s17, %s12129_s19  ;;  %s21_s21 = sadd.s32 1, %s12079_s16 }
   0x4   : > { %p19_p0 = scmp.eq.s32.totalorder %s18_s20, 0  ;;  %p28_p1 = scmp.ne.s32.totalorder %s12079_s16, %s12075_s15 }
   0x5   : > { %p29_p2 = scmp.eq.s32.totalorder %s12083_s17, 0  ;;  %p8673_p4 = scmp.ge.s32.totalorder %s12083_s17, 2 }
   0x6   : > { %s12138_s22 = scalar_select %p19_p0, %s12079_s16, %s21_s21  }
   0x7   : > { %p30_p3 = por %p29_p2, %p28_p1  ;;  %152 = sbr.rel (%p8673_p4) target bundleno = 29 (0x1d), region = 28 }
   0xc   : > { %155 = sbr.rel (!%p30_p3) target bundleno = 29 (0x1d), region = 32  ;;  %s157_s23 = sand.u32 (%p30_p3), 1, %s12079_s16  }
   0xd   : > { %s9338_s24 = sshll.u32 (%p30_p3), %s12083_s17, 6  ;;  %s11427_s25 = smul.u32 (%p30_p3), 192, %s157_s23 }
   0xe   : > { %s12146_s28 = scalar_lea.vmem (%p30_p3), %s15046_s0, %s9338_s24 }
   0xf   : > { %v180_v0 = vld [vmem:[%s12146_s28] sm:$0xff] (%p30_p3)   ;;  %v184_v1 = vld [vmem:[%s12146_s28 + $0x8] sm:$0xff] (%p30_p3)   ;;  %v188_v2 = vld [vmem:[%s12146_s28 + $0x10] sm:$0xff] (%p30_p3)   ;;  %s12154_s29 = scalar_lea.vmem (%p30_p3), [#allocation2], %s11427_s25 }
  0x10   : > { %v192_v3 = vld [vmem:[%s12146_s28 + $0x18] sm:$0xff] (%p30_p3)   ;;  %v196_v4 = vld [vmem:[%s12146_s28 + $0x20] sm:$0xff] (%p30_p3)   ;;  %v200_v5 = vld [vmem:[%s12146_s28 + $0x28] sm:$0xff] (%p30_p3)   ;;  %181 = vst [vmem:[%s12154_s29] sm:$0xff] (%p30_p3), %v180_v0  }
  0x11   : > { %185 = vst [vmem:[%s12154_s29 + $0x8] sm:$0xff] %v184_v1   ;;  %189 = vst [vmem:[%s12154_s29 + $0x10] sm:$0xff] %v188_v2   ;;  %v204_v6 = vld [vmem:[%s12146_s28 + $0x30] sm:$0xff]   ;;  %v208_v7 = vld [vmem:[%s12146_s28 + $0x38] sm:$0xff]  }
  0x12   : > { %193 = vst [vmem:[%s12154_s29 + $0x18] sm:$0xff] %v192_v3   ;;  %197 = vst [vmem:[%s12154_s29 + $0x20] sm:$0xff] %v196_v4   ;;  %v212_v8 = vld [vmem:[%s12146_s28 + $0x80] sm:$0xff]   ;;  %v216_v9 = vld [vmem:[%s12146_s28 + $0x88] sm:$0xff]  }
  0x13   : > { %201 = vst [vmem:[%s12154_s29 + $0x28] sm:$0xff] %v200_v5   ;;  %205 = vst [vmem:[%s12154_s29 + $0x30] sm:$0xff] %v204_v6   ;;  %v220_v10 = vld [vmem:[%s12146_s28 + $0x90] sm:$0xff]   ;;  %v224_v11 = vld [vmem:[%s12146_s28 + $0x98] sm:$0xff]  }
  0x14   : > { %209 = vst [vmem:[%s12154_s29 + $0x38] sm:$0xff] %v208_v7   ;;  %213 = vst [vmem:[%s12154_s29 + $0x40] sm:$0xff] %v212_v8   ;;  %v228_v12 = vld [vmem:[%s12146_s28 + $0xa0] sm:$0xff]   ;;  %v232_v13 = vld [vmem:[%s12146_s28 + $0xa8] sm:$0xff]  }
  0x15   : > { %217 = vst [vmem:[%s12154_s29 + $0x48] sm:$0xff] %v216_v9   ;;  %221 = vst [vmem:[%s12154_s29 + $0x50] sm:$0xff] %v220_v10   ;;  %v236_v14 = vld [vmem:[%s12146_s28 + $0xb0] sm:$0xff]   ;;  %v240_v15 = vld [vmem:[%s12146_s28 + $0xb8] sm:$0xff]  }
  0x16   : > { %225 = vst [vmem:[%s12154_s29 + $0x58] sm:$0xff] %v224_v11   ;;  %229 = vst [vmem:[%s12154_s29 + $0x60] sm:$0xff] %v228_v12   ;;  %v244_v16 = vld [vmem:[%s12146_s28 + $0x100] sm:$0xff]   ;;  %v248_v17 = vld [vmem:[%s12146_s28 + $0x108] sm:$0xff]  }
  0x17   : > { %233 = vst [vmem:[%s12154_s29 + $0x68] sm:$0xff] %v232_v13   ;;  %237 = vst [vmem:[%s12154_s29 + $0x70] sm:$0xff] %v236_v14   ;;  %v252_v18 = vld [vmem:[%s12146_s28 + $0x110] sm:$0xff]   ;;  %v256_v19 = vld [vmem:[%s12146_s28 + $0x118] sm:$0xff]  }
  0x18   : > { %241 = vst [vmem:[%s12154_s29 + $0x78] sm:$0xff] %v240_v15   ;;  %245 = vst [vmem:[%s12154_s29 + $0x80] sm:$0xff] %v244_v16   ;;  %v260_v20 = vld [vmem:[%s12146_s28 + $0x120] sm:$0xff]   ;;  %v264_v21 = vld [vmem:[%s12146_s28 + $0x128] sm:$0xff]  }
  0x19   : > { %249 = vst [vmem:[%s12154_s29 + $0x88] sm:$0xff] %v248_v17   ;;  %253 = vst [vmem:[%s12154_s29 + $0x90] sm:$0xff] %v252_v18   ;;  %v268_v22 = vld [vmem:[%s12146_s28 + $0x130] sm:$0xff]   ;;  %v272_v23 = vld [vmem:[%s12146_s28 + $0x138] sm:$0xff]  }
  0x1a   : > { %257 = vst [vmem:[%s12154_s29 + $0x98] sm:$0xff] %v256_v19   ;;  %261 = vst [vmem:[%s12154_s29 + $0xa0] sm:$0xff] %v260_v20  }
  0x1b   : > { %265 = vst [vmem:[%s12154_s29 + $0xa8] sm:$0xff] %v264_v21   ;;  %269 = vst [vmem:[%s12154_s29 + $0xb0] sm:$0xff] %v268_v22  }
  0x1c   : > { %273 = vst [vmem:[%s12154_s29 + $0xb8] sm:$0xff] %v272_v23  }
  0x1d PF: > { %p8677_p5 = scmp.ge.s32.totalorder %s12083_s17, 1  ;;  %p394_p6 = scmp.lt.s32.totalorder %s12083_s17, 3 }
  0x1f   : > { %p395_p7 = pnand %p8677_p5, %p394_p6 }
  0x20   : > { %s401_s21 = sand.u32 (!%p395_p7), 1, %s12075_s15   ;;  %s8678_s15 = sshll.u32 (!%p395_p7), %s8670_s18, 3 }
  0x21   : > { %398 = sbr.rel (%p395_p7) target bundleno = 1404 (0x57c), region = 73  ;;  %p428_p8 = scmp.lt.s32.totalorder (!%p395_p7), %s8678_s15, 15 }
  0x22   : > { %s11428_s27 = smul.u32 (!%p395_p7), 192, %s401_s21 }
  0x24   : > { %s12245_s5 = scalar_lea.vmem (!%p395_p7), [#allocation2], %s11428_s27 }
  0x26   : > { %v11455_v24 = vld [vmem:[%s15047_s1 + $0x38] sm:$0xff]   ;;  %v12085_v25 = vmov 0.0   ;;  %v11457_v27 = vld [vmem:[%s15047_s1 + $0x30] sm:$0xff]   ;;  %vm12086_vm0 = vmmov 0   ;;  %v11459_v29 = vld [vmem:[%s15047_s1 + $0x28] sm:$0xff]   ;;  %vm656_vm1 = vcmask 1046528  }
  0x27   : > { %9987 = vmatprep.subr.bf16.mxu0 %v12085_v25  ;;  %10007 = vmatprep.subr.bf16.mxu1 %v12085_v25  ;;  %v11456_v26 = vld [vmem:[%s15047_s1 + $0x78] sm:$0xff]   ;;  %v11458_v28 = vld [vmem:[%s15047_s1 + $0x70] sm:$0xff]   ;;  %v11460_v30 = vld [vmem:[%s15047_s1 + $0x68] sm:$0xff]   ;;  %vm769_vm2 = vcmask 1045504   ;;  %s15055_s15 = smov (!%p428_p8, %s8678_s15), 15 }
  0x28   : > { %9988 = vmatpush3.bf16.msra.mxu0 %v11455_v24  ;;  %10003 = vmatprep.mubr.msk.bf16.mxu0 %vm12086_vm0, %v12085_v25  ;;  %v11461_v31 = vld [vmem:[%s15047_s1 + $0x20] sm:$0xff]   ;;  %v11463_v33 = vld [vmem:[%s15047_s1 + $0x18] sm:$0xff]   ;;  %v11465_v35 = vld [vmem:[%s15047_s1 + $0x10] sm:$0xff]   ;;  %s8679_s23 = sshll.u32 %s15055_s15, 2 }
  0x29   : > { %10008 = vmatpush3.bf16.msra.mxu1 %v11456_v26  ;;  %9989 = vmatprep.subr.bf16.mxu0 %v12085_v25  ;;  %v11462_v32 = vld [vmem:[%s15047_s1 + $0x60] sm:$0xff]   ;;  %v11464_v34 = vld [vmem:[%s15047_s1 + $0x58] sm:$0xff]   ;;  %v11466_v36 = vld [vmem:[%s15047_s1 + $0x50] sm:$0xff]   ;;  %s13067_s30 = scalar_lea.vmem %s15050_s4, %s8679_s23 }
  0x2a   : > { %10009 = vmatprep.subr.bf16.mxu1 %v12085_v25  ;;  %10023 = vmatprep.mubr.msk.bf16.mxu1 %vm12086_vm0, %v12085_v25  ;;  %v11467_v37 = vld [vmem:[%s15047_s1 + $0x8] sm:$0xff]   ;;  %v11469_v39 = vld [vmem:[%s15047_s1] sm:$0xff]   ;;  %v11472_v42 = vld [vmem:[%s15047_s1 + $0xb8] sm:$0xff]  }
  0x2b   : > { %v11468_v38 = vld [vmem:[%s15047_s1 + $0x48] sm:$0xff]   ;;  %v11470_v40 = vld [vmem:[%s15047_s1 + $0x40] sm:$0xff]   ;;  %v11473_v43 = vld [vmem:[%s15047_s1 + $0xf8] sm:$0xff]  }
  0x2c   : > { %9990 = vmatpush3.bf16.msra.mxu0 %v11457_v27  ;;  %v11471_v41 = vld [vmem:[%s12245_s5] sm:$0x1f]   ;;  %v11474_v44 = vld [vmem:[%s15047_s1 + $0xb0] sm:$0xff]   ;;  %v11476_v46 = vld [vmem:[%s15047_s1 + $0xa8] sm:$0xff]  }
  0x2d   : > { %10010 = vmatpush3.bf16.msra.mxu1 %v11458_v28  ;;  %9991 = vmatprep.subr.bf16.mxu0 %v12085_v25  ;;  %v11475_v45 = vld [vmem:[%s15047_s1 + $0xf0] sm:$0xff]   ;;  %v11477_v47 = vld [vmem:[%s15047_s1 + $0xe8] sm:$0xff]   ;;  %v11478_v48 = vld [vmem:[%s15047_s1 + $0xa0] sm:$0xff]  }
  0x2e   : > { %10011 = vmatprep.subr.bf16.mxu1 %v12085_v25  ;;  %v11479_v49 = vld [vmem:[%s15047_s1 + $0xe0] sm:$0xff]   ;;  %v11480_v50 = vld [vmem:[%s15047_s1 + $0x98] sm:$0xff]   ;;  %v11482_v52 = vld [vmem:[%s15047_s1 + $0x90] sm:$0xff]  }
  0x2f   : > { %v11481_v51 = vld [vmem:[%s15047_s1 + $0xd8] sm:$0xff]   ;;  %v11483_v53 = vld [vmem:[%s15047_s1 + $0xd0] sm:$0xff]   ;;  %v11484_v54 = vld [vmem:[%s15047_s1 + $0x88] sm:$0xff]  }
  0x30   : > { %9992 = vmatpush3.bf16.msra.mxu0 %v11459_v29  ;;  %v11485_v55 = vld [vmem:[%s15047_s1 + $0xc8] sm:$0xff]   ;;  %v11486_v56 = vld [vmem:[%s15047_s1 + $0x80] sm:$0xff]   ;;  %v11489_v59 = vld [vmem:[%s15047_s1 + $0x138] sm:$0xff]  }
  0x31   : > { %10012 = vmatpush3.bf16.msra.mxu1 %v11460_v30  ;;  %9993 = vmatprep.subr.bf16.mxu0 %v12085_v25  ;;  %v11487_v57 = vld [vmem:[%s15047_s1 + $0xc0] sm:$0xff]   ;;  %v11490_v60 = vld [vmem:[%s15047_s1 + $0x178] sm:$0xff]   ;;  %v11491_v61 = vld [vmem:[%s15047_s1 + $0x130] sm:$0xff]  }
  0x32   : > { %10013 = vmatprep.subr.bf16.mxu1 %v12085_v25  ;;  %v11488_v58 = vld [vmem:[%s12245_s5 + $0x40] sm:$0x1f]   ;;  %v11492_v62 = vld [vmem:[%s15047_s1 + $0x170] sm:$0xff]   ;;  %v11493_v63 = vld [vmem:[%s15047_s1 + $0x128] sm:$0xff]  }
  0x33   : > { %v11494_v0 = vld [vmem:[%s15047_s1 + $0x168] sm:$0xff]   ;;  %v11495_v1 = vld [vmem:[%s15047_s1 + $0x120] sm:$0xff]   ;;  %v11497_v3 = vld [vmem:[%s15047_s1 + $0x118] sm:$0xff]  }
  0x34   : > { %9994 = vmatpush3.bf16.msra.mxu0 %v11461_v31  ;;  %v11496_v2 = vld [vmem:[%s15047_s1 + $0x160] sm:$0xff]   ;;  %v11498_v4 = vld [vmem:[%s15047_s1 + $0x158] sm:$0xff]   ;;  %v11499_v5 = vld [vmem:[%s15047_s1 + $0x110] sm:$0xff]  }
  0x35   : > { %10014 = vmatpush3.bf16.msra.mxu1 %v11462_v32  ;;  %9995 = vmatprep.subr.bf16.mxu0 %v12085_v25  ;;  %v11500_v6 = vld [vmem:[%s15047_s1 + $0x150] sm:$0xff]   ;;  %v11501_v7 = vld [vmem:[%s15047_s1 + $0x108] sm:$0xff]   ;;  %v11503_v9 = vld [vmem:[%s15047_s1 + $0x100] sm:$0xff]  }
  0x36   : > { %10015 = vmatprep.subr.bf16.mxu1 %v12085_v25  ;;  %v11502_v8 = vld [vmem:[%s15047_s1 + $0x148] sm:$0xff]   ;;  %v11504_v10 = vld [vmem:[%s15047_s1 + $0x140] sm:$0xff]   ;;  %v11505_v11 = vld [vmem:[%s15047_s1 + $0x1b8] sm:$0xff]  }
  0x37   : > { %v11506_v12 = vld [vmem:[%s15047_s1 + $0x1f8] sm:$0xff]   ;;  %v11507_v13 = vld [vmem:[%s15047_s1 + $0x1b0] sm:$0xff]   ;;  %v11509_v15 = vld [vmem:[%s15047_s1 + $0x1a8] sm:$0xff]  }
  0x38   : > { %9996 = vmatpush3.bf16.msra.mxu0 %v11463_v33  ;;  %v11508_v14 = vld [vmem:[%s15047_s1 + $0x1f0] sm:$0xff]   ;;  %v11510_v16 = vld [vmem:[%s15047_s1 + $0x1e8] sm:$0xff]   ;;  %v11511_v17 = vld [vmem:[%s15047_s1 + $0x1a0] sm:$0xff]  }
  0x39   : > { %10016 = vmatpush3.bf16.msra.mxu1 %v11464_v34  ;;  %9997 = vmatprep.subr.bf16.mxu0 %v12085_v25  ;;  %v11512_v18 = vld [vmem:[%s15047_s1 + $0x1e0] sm:$0xff]   ;;  %v11513_v19 = vld [vmem:[%s15047_s1 + $0x198] sm:$0xff]   ;;  %v11515_v21 = vld [vmem:[%s15047_s1 + $0x190] sm:$0xff]  }
  0x3a   : > { %10017 = vmatprep.subr.bf16.mxu1 %v12085_v25  ;;  %v11514_v20 = vld [vmem:[%s15047_s1 + $0x1d8] sm:$0xff]   ;;  %v11516_v22 = vld [vmem:[%s15047_s1 + $0x1d0] sm:$0xff]   ;;  %v11517_v23 = vld [vmem:[%s15047_s1 + $0x188] sm:$0xff]  }
  0x3b   : > { %v11518_v24 = vld [vmem:[%s15047_s1 + $0x1c8] sm:$0xff]   ;;  %v11519_v26 = vld [vmem:[%s15047_s1 + $0x180] sm:$0xff]   ;;  %v11522_v29 = vld [vmem:[%s15047_s1 + $0x238] sm:$0xff]  }
  0x3c   : > { %9998 = vmatpush3.bf16.msra.mxu0 %v11465_v35  ;;  %v11520_v27 = vld [vmem:[%s15047_s1 + $0x1c0] sm:$0xff]   ;;  %v11523_v30 = vld [vmem:[%s15047_s1 + $0x38] sm:$0xff]   ;;  %v11524_v31 = vld [vmem:[%s15047_s1 + $0x230] sm:$0xff]  }
  0x3d   : > { %10018 = vmatpush3.bf16.msra.mxu1 %v11466_v36  ;;  %9999 = vmatprep.subr.bf16.mxu0 %v12085_v25  ;;  %v11521_v28 = vld [vmem:[%s12245_s5 + $0x80] sm:$0x1f]   ;;  %v11525_v32 = vld [vmem:[%s15047_s1 + $0x30] sm:$0xff]   ;;  %v11526_v33 = vld [vmem:[%s15047_s1 + $0x228] sm:$0xff]  }
  0x3e   : > { %10019 = vmatprep.subr.bf16.mxu1 %v12085_v25  ;;  %v11527_v34 = vld [vmem:[%s15047_s1 + $0x28] sm:$0xff]   ;;  %v11528_v35 = vld [vmem:[%s15047_s1 + $0x220] sm:$0xff]  }
  0x3f   : > { %v11529_v36 = vld [vmem:[%s15047_s1 + $0x20] sm:$0xff]  }
  0x40   : > { %10000 = vmatpush3.bf16.msra.mxu0 %v11467_v37  ;;  %v11530_v37 = vld [vmem:[%s15047_s1 + $0x218] sm:$0xff]  }
  0x41   : > { %10020 = vmatpush3.bf16.msra.mxu1 %v11468_v38  ;;  %10001 = vmatprep.subr.bf16.mxu0 %v12085_v25  ;;  %v11531_v38 = vld [vmem:[%s15047_s1 + $0x18] sm:$0xff]  }
  0x42   : > { %10021 = vmatprep.subr.bf16.mxu1 %v12085_v25 }
  0x44   : > { %10002 = vmatpush3.bf16.msra.mxu0 %v11469_v39  ;;  %v11532_v39 = vld [vmem:[%s15047_s1 + $0x210] sm:$0xff]  }
  0x45   : > { %10022 = vmatpush3.bf16.msra.mxu1 %v11470_v40  ;;  %10027 = vmatprep.subr.bf16.mxu0 %v12085_v25  ;;  %v11533_v40 = vld [vmem:[%s15047_s1 + $0x10] sm:$0xff]  }
  0x46   : > { %10047 = vmatprep.subr.bf16.mxu1 %v12085_v25 }
  0x47   : > { %10004 = vmatmul.mubr.bf16.vlgmr.msra.gmra.mxu0 %v11471_v41 }
  0x48   : > { %10024 = vmatmul.mubr.bf16.vlgmr.msra.gmra.mxu1 %v11471_v41  ;;  %10028 = vmatpush3.bf16.msra.mxu0 %v11472_v42  ;;  %v11535_v42 = vld [vmem:[%s15047_s1 + $0x8] sm:$0xff]  }
  0x49   : > { %10048 = vmatpush3.bf16.msra.mxu1 %v11473_v43  ;;  %10029 = vmatprep.subr.bf16.mxu0 %v12085_v25  ;;  %v11536_v43 = vld [vmem:[%s15047_s1 + $0x200] sm:$0xff]  }
  0x4a   : > { %10049 = vmatprep.subr.bf16.mxu1 %v12085_v25  ;;  %10043 = vmatprep.mubr.msk.bf16.mxu0 %vm12086_vm0, %v12085_v25 }
  0x4b   : > { %10063 = vmatprep.mubr.msk.bf16.mxu1 %vm12086_vm0, %v12085_v25 }
  0x4c   : > { %10030 = vmatpush3.bf16.msra.mxu0 %v11474_v44  ;;  %v11537_v44 = vld [vmem:[%s15047_s1] sm:$0xff]  }
  0x4d   : > { %10050 = vmatpush3.bf16.msra.mxu1 %v11475_v45  ;;  %10031 = vmatprep.subr.bf16.mxu0 %v12085_v25  ;;  %v11538_v45 = vld [vmem:[%s12245_s5 + $0x8] sm:$0x1f]  }
  0x4e   : > { %10051 = vmatprep.subr.bf16.mxu1 %v12085_v25 }
  0x50   : > { %10032 = vmatpush3.bf16.msra.mxu0 %v11476_v46  ;;  %v11539_v46 = vld [vmem:[%s15047_s1 + $0x78] sm:$0xff]  }
  0x51   : > { %10052 = vmatpush3.bf16.msra.mxu1 %v11477_v47  ;;  %10033 = vmatprep.subr.bf16.mxu0 %v12085_v25  ;;  %v11540_v47 = vld [vmem:[%s15047_s1 + $0xb8] sm:$0xff]  }
  0x52   : > { %10053 = vmatprep.subr.bf16.mxu1 %v12085_v25 }
  0x54   : > { %10034 = vmatpush3.bf16.msra.mxu0 %v11478_v48  ;;  %v11541_v48 = vld [vmem:[%s15047_s1 + $0x70] sm:$0xff]  }
  0x55   : > { %10054 = vmatpush3.bf16.msra.mxu1 %v11479_v49  ;;  %10035 = vmatprep.subr.bf16.mxu0 %v12085_v25  ;;  %v11542_v49 = vld [vmem:[%s15047_s1 + $0xb0] sm:$0xff]  }
  0x56   : > { %10055 = vmatprep.subr.bf16.mxu1 %v12085_v25 }
  0x58   : > { %10036 = vmatpush3.bf16.msra.mxu0 %v11480_v50  ;;  %v11543_v50 = vld [vmem:[%s15047_s1 + $0x68] sm:$0xff]  }
  0x59   : > { %10056 = vmatpush3.bf16.msra.mxu1 %v11481_v51  ;;  %10037 = vmatprep.subr.bf16.mxu0 %v12085_v25  ;;  %v11544_v51 = vld [vmem:[%s15047_s1 + $0xa8] sm:$0xff]  }
  0x5a   : > { %10057 = vmatprep.subr.bf16.mxu1 %v12085_v25 }
  0x5c   : > { %10038 = vmatpush3.bf16.msra.mxu0 %v11482_v52  ;;  %v11545_v52 = vld [vmem:[%s15047_s1 + $0x60] sm:$0xff]  }
  0x5d   : > { %10058 = vmatpush3.bf16.msra.mxu1 %v11483_v53  ;;  %10039 = vmatprep.subr.bf16.mxu0 %v12085_v25  ;;  %v11546_v53 = vld [vmem:[%s15047_s1 + $0xa0] sm:$0xff]  }
  0x5e   : > { %10059 = vmatprep.subr.bf16.mxu1 %v12085_v25 }
  0x60   : > { %10040 = vmatpush3.bf16.msra.mxu0 %v11484_v54  ;;  %v11547_v54 = vld [vmem:[%s15047_s1 + $0x58] sm:$0xff]  }
  0x61   : > { %10060 = vmatpush3.bf16.msra.mxu1 %v11485_v55  ;;  %10041 = vmatprep.subr.bf16.mxu0 %v12085_v25  ;;  %v11548_v55 = vld [vmem:[%s15047_s1 + $0x98] sm:$0xff]  }
  0x62   : > { %10061 = vmatprep.subr.bf16.mxu1 %v12085_v25 }
  0x64   : > { %10042 = vmatpush3.bf16.msra.mxu0 %v11486_v56  ;;  %v11549_v56 = vld [vmem:[%s15047_s1 + $0x50] sm:$0xff]  }
  0x65   : > { %10062 = vmatpush3.bf16.msra.mxu1 %v11487_v57  ;;  %10067 = vmatprep.subr.bf16.mxu0 %v12085_v25  ;;  %v11550_v57 = vld [vmem:[%s15047_s1 + $0x90] sm:$0xff]  }
  0x66   : > { %10087 = vmatprep.subr.bf16.mxu1 %v12085_v25 }
  0x67   : > { %10044 = vmatmul.mubr.bf16.vlgmr.msra.gmra.mxu0 %v11471_v41  ;;  %v11534_v41 = vld [vmem:[%s15047_s1 + $0x208] sm:$0xff]  }
  0x68   : > { %10064 = vmatmul.mubr.bf16.vlgmr.msra.gmra.mxu1 %v11488_v58  ;;  %10068 = vmatpush3.bf16.msra.mxu0 %v11489_v59  ;;  %v11552_v59 = vld [vmem:[%s15047_s1 + $0x88] sm:$0xff]  }
  0x69   : > { %10088 = vmatpush3.bf16.msra.mxu1 %v11490_v60  ;;  %10069 = vmatprep.subr.bf16.mxu0 %v12085_v25  ;;  %v11553_v60 = vld [vmem:[%s15047_s1 + $0x40] sm:$0xff]  }
  0x6a   : > { %10089 = vmatprep.subr.bf16.mxu1 %v12085_v25  ;;  %10083 = vmatprep.mubr.msk.bf16.mxu0 %vm12086_vm0, %v12085_v25 }
  0x6b   : > { %10103 = vmatprep.mubr.msk.bf16.mxu1 %vm12086_vm0, %v12085_v25 }
  0x6c   : > { %10070 = vmatpush3.bf16.msra.mxu0 %v11491_v61  ;;  %v11554_v61 = vld [vmem:[%s15047_s1 + $0x80] sm:$0xff]  }
  0x6d   : > { %10090 = vmatpush3.bf16.msra.mxu1 %v11492_v62  ;;  %10071 = vmatprep.subr.bf16.mxu0 %v12085_v25  ;;  %v11555_v62 = vld [vmem:[%s15047_s1 + $0xf8] sm:$0xff]  }
  0x6e   : > { %10091 = vmatprep.subr.bf16.mxu1 %v12085_v25 }
  0x70   : > { %10072 = vmatpush3.bf16.msra.mxu0 %v11493_v63  ;;  %v11556_v63 = vld [vmem:[%s15047_s1 + $0x138] sm:$0xff]  }
  0x71   : > { %10092 = vmatpush3.bf16.msra.mxu1 %v11494_v0  ;;  %10073 = vmatprep.subr.bf16.mxu0 %v12085_v25  ;;  %v11557_v0 = vld [vmem:[%s15047_s1 + $0xf0] sm:$0xff]  }
  0x72   : > { %10093 = vmatprep.subr.bf16.mxu1 %v12085_v25 }
  0x74   : > { %10074 = vmatpush3.bf16.msra.mxu0 %v11495_v1  ;;  %v11558_v1 = vld [vmem:[%s15047_s1 + $0x130] sm:$0xff]  }
  0x75   : > { %10094 = vmatpush3.bf16.msra.mxu1 %v11496_v2  ;;  %10075 = vmatprep.subr.bf16.mxu0 %v12085_v25  ;;  %v11559_v2 = vld [vmem:[%s15047_s1 + $0xe8] sm:$0xff]  }
  0x76   : > { %10095 = vmatprep.subr.bf16.mxu1 %v12085_v25 }
  0x78   : > { %10076 = vmatpush3.bf16.msra.mxu0 %v11497_v3  ;;  %v11560_v3 = vld [vmem:[%s15047_s1 + $0x128] sm:$0xff]  }
  0x79   : > { %10096 = vmatpush3.bf16.msra.mxu1 %v11498_v4  ;;  %10077 = vmatprep.subr.bf16.mxu0 %v12085_v25  ;;  %v11561_v4 = vld [vmem:[%s15047_s1 + $0xe0] sm:$0xff]  }
  0x7a   : > { %10097 = vmatprep.subr.bf16.mxu1 %v12085_v25 }
  0x7c   : > { %10078 = vmatpush3.bf16.msra.mxu0 %v11499_v5  ;;  %v11562_v5 = vld [vmem:[%s15047_s1 + $0x120] sm:$0xff]  }
  0x7d   : > { %10098 = vmatpush3.bf16.msra.mxu1 %v11500_v6  ;;  %10079 = vmatprep.subr.bf16.mxu0 %v12085_v25  ;;  %v11563_v6 = vld [vmem:[%s15047_s1 + $0xd8] sm:$0xff]  }
  0x7e   : > { %10099 = vmatprep.subr.bf16.mxu1 %v12085_v25 }
  0x80   : > { %10080 = vmatpush3.bf16.msra.mxu0 %v11501_v7  ;;  %v11564_v7 = vld [vmem:[%s15047_s1 + $0x118] sm:$0xff]  }
  0x81   : > { %10100 = vmatpush3.bf16.msra.mxu1 %v11502_v8  ;;  %10081 = vmatprep.subr.bf16.mxu0 %v12085_v25  ;;  %v11565_v8 = vld [vmem:[%s15047_s1 + $0xd0] sm:$0xff]  }
  0x82   : > { %10101 = vmatprep.subr.bf16.mxu1 %v12085_v25 }
  0x84   : > { %10082 = vmatpush3.bf16.msra.mxu0 %v11503_v9  ;;  %v11566_v9 = vld [vmem:[%s15047_s1 + $0x110] sm:$0xff]  }
  0x85   : > { %10102 = vmatpush3.bf16.msra.mxu1 %v11504_v10  ;;  %10107 = vmatprep.subr.bf16.mxu0 %v12085_v25  ;;  %v11567_v10 = vld [vmem:[%s15047_s1 + $0xc8] sm:$0xff]  }
  0x86   : > { %10127 = vmatprep.subr.bf16.mxu1 %v12085_v25 }
  0x87   : > { %10084 = vmatmul.mubr.bf16.vlgmr.msra.gmra.mxu0 %v11488_v58 }
  0x88   : > { %10104 = vmatmul.mubr.bf16.vlgmr.msra.gmra.mxu1 %v11488_v58  ;;  %10108 = vmatpush3.bf16.msra.mxu0 %v11505_v11  ;;  %v11551_v58 = vld [vmem:[%s15047_s1 + $0x48] sm:$0xff]  }
  0x89   : > { %10128 = vmatpush3.bf16.msra.mxu1 %v11506_v12  ;;  %10109 = vmatprep.subr.bf16.mxu0 %v12085_v25  ;;  %v11568_v11 = vld [vmem:[%s15047_s1 + $0x108] sm:$0xff]   ;;  %v11569_v12 = vld [vmem:[%s15047_s1 + $0xc0] sm:$0xff]  }
  0x8a   : > { %10129 = vmatprep.subr.bf16.mxu1 %v12085_v25  ;;  %10123 = vmatprep.mubr.msk.bf16.mxu0 %vm12086_vm0, %v12085_v25 }
  0x8b   : > { %10143 = vmatprep.mubr.msk.bf16.mxu1 %vm12086_vm0, %v12085_v25 }
  0x8c   : > { %10110 = vmatpush3.bf16.msra.mxu0 %v11507_v13  ;;  %v11570_v13 = vld [vmem:[%s15047_s1 + $0x100] sm:$0xff]  }
  0x8d   : > { %10130 = vmatpush3.bf16.msra.mxu1 %v11508_v14  ;;  %10111 = vmatprep.subr.bf16.mxu0 %v12085_v25  ;;  %v12683_v14 = vld [vmem:[%s12245_s5 + $0x48] sm:$0x1f]  }
  0x8e   : > { %10131 = vmatprep.subr.bf16.mxu1 %v12085_v25 }
  0x90   : > { %10112 = vmatpush3.bf16.msra.mxu0 %v11509_v15  ;;  %v11572_v15 = vld [vmem:[%s15047_s1 + $0x178] sm:$0xff]  }
  0x91   : > { %10132 = vmatpush3.bf16.msra.mxu1 %v11510_v16  ;;  %10113 = vmatprep.subr.bf16.mxu0 %v12085_v25  ;;  %v11573_v16 = vld [vmem:[%s15047_s1 + $0x1b8] sm:$0xff]  }
  0x92   : > { %10133 = vmatprep.subr.bf16.mxu1 %v12085_v25 }
  0x94   : > { %10114 = vmatpush3.bf16.msra.mxu0 %v11511_v17 }
  0x95   : > { %10134 = vmatpush3.bf16.msra.mxu1 %v11512_v18  ;;  %10115 = vmatprep.subr.bf16.mxu0 %v12085_v25  ;;  %v11574_v18 = vld [vmem:[%s15047_s1 + $0x170] sm:$0xff]  }
  0x96   : > { %10135 = vmatprep.subr.bf16.mxu1 %v12085_v25 }
  0x98   : > { %10116 = vmatpush3.bf16.msra.mxu0 %v11513_v19 }
  0x99   : > { %10136 = vmatpush3.bf16.msra.mxu1 %v11514_v20  ;;  %10117 = vmatprep.subr.bf16.mxu0 %v12085_v25 }
  0x9a   : > { %10137 = vmatprep.subr.bf16.mxu1 %v12085_v25 }
  0x9c   : > { %10118 = vmatpush3.bf16.msra.mxu0 %v11515_v21  ;;  %v11575_v21 = vld [vmem:[%s15047_s1 + $0x1b0] sm:$0xff]  }
  0x9d   : > { %10138 = vmatpush3.bf16.msra.mxu1 %v11516_v22  ;;  %10119 = vmatprep.subr.bf16.mxu0 %v12085_v25 }
  0x9e   : > { %10139 = vmatprep.subr.bf16.mxu1 %v12085_v25 }
  0xa0   : > { %10120 = vmatpush3.bf16.msra.mxu0 %v11517_v23 }
  0xa1   : > { %10140 = vmatpush3.bf16.msra.mxu1 %v11518_v24  ;;  %10121 = vmatprep.subr.bf16.mxu0 %v12085_v25 }
  0xa2   : > { %10141 = vmatprep.subr.bf16.mxu1 %v12085_v25 }
  0xa4   : > { %10122 = vmatpush3.bf16.msra.mxu0 %v11519_v26  ;;  %v11576_v26 = vld [vmem:[%s15047_s1 + $0x168] sm:$0xff]  }
  0xa5   : > { %10142 = vmatpush3.bf16.msra.mxu1 %v11520_v27  ;;  %10147 = vmatprep.subr.bf16.mxu0 %v12085_v25 }
  0xa6   : > { %10167 = vmatprep.subr.bf16.mxu1 %v12085_v25 }
  0xa7   : > { %10124 = vmatmul.mubr.bf16.vlgmr.msra.gmra.mxu0 %v11521_v28 }
  0xa8   : > { %10144 = vmatmul.mubr.bf16.vlgmr.msra.gmra.mxu1 %v11521_v28  ;;  %10148 = vmatpush3.bf16.msra.mxu0 %v11522_v29 }
  0xa9   : > { %10168 = vmatpush3.bf16.msra.mxu1 %v11523_v30  ;;  %10149 = vmatprep.subr.bf16.mxu0 %v12085_v25  ;;  %v11577_v30 = vld [vmem:[%s15047_s1 + $0x1a8] sm:$0xff]  }
  0xaa   : > { %10169 = vmatprep.subr.bf16.mxu1 %v12085_v25  ;;  %10163 = vmatprep.mubr.msk.bf16.mxu0 %vm12086_vm0, %v12085_v25 }
  0xab   : > { %10183 = vmatprep.mubr.msk.bf16.mxu1 %vm12086_vm0, %v12085_v25 }
  0xac   : > { %10150 = vmatpush3.bf16.msra.mxu0 %v11524_v31 }
  0xad   : > { %10170 = vmatpush3.bf16.msra.mxu1 %v11525_v32  ;;  %10151 = vmatprep.subr.bf16.mxu0 %v12085_v25 }
  0xae   : > { %10171 = vmatprep.subr.bf16.mxu1 %v12085_v25 }
  0xb0   : > { %10152 = vmatpush3.bf16.msra.mxu0 %v11526_v33  ;;  %v11578_v33 = vld [vmem:[%s15047_s1 + $0x160] sm:$0xff]  }
  0xb1   : > { %10172 = vmatpush3.bf16.msra.mxu1 %v11527_v34  ;;  %10153 = vmatprep.subr.bf16.mxu0 %v12085_v25  ;;  %v11579_v34 = vld [vmem:[%s15047_s1 + $0x1a0] sm:$0xff]  }
  0xb2   : > { %10173 = vmatprep.subr.bf16.mxu1 %v12085_v25 }
  0xb4   : > { %10154 = vmatpush3.bf16.msra.mxu0 %v11528_v35 }
  0xb5   : > { %10174 = vmatpush3.bf16.msra.mxu1 %v11529_v36  ;;  %10155 = vmatprep.subr.bf16.mxu0 %v12085_v25  ;;  %v11580_v36 = vld [vmem:[%s15047_s1 + $0x158] sm:$0xff]  }
  0xb6   : > { %10175 = vmatprep.subr.bf16.mxu1 %v12085_v25 }
  0xb8   : > { %10156 = vmatpush3.bf16.msra.mxu0 %v11530_v37  ;;  %v11581_v37 = vld [vmem:[%s15047_s1 + $0x198] sm:$0xff]  }
  0xb9   : > { %10176 = vmatpush3.bf16.msra.mxu1 %v11531_v38  ;;  %10157 = vmatprep.subr.bf16.mxu0 %v12085_v25  ;;  %v11582_v38 = vld [vmem:[%s15047_s1 + $0x150] sm:$0xff]  }
  0xba   : > { %10177 = vmatprep.subr.bf16.mxu1 %v12085_v25 }
  0xbc   : > { %10158 = vmatpush3.bf16.msra.mxu0 %v11532_v39  ;;  %v11583_v39 = vld [vmem:[%s15047_s1 + $0x190] sm:$0xff]  }
  0xbd   : > { %10178 = vmatpush3.bf16.msra.mxu1 %v11533_v40  ;;  %10159 = vmatprep.subr.bf16.mxu0 %v12085_v25  ;;  %v11584_v40 = vld [vmem:[%s15047_s1 + $0x148] sm:$0xff]  }
  0xbe   : > { %10179 = vmatprep.subr.bf16.mxu1 %v12085_v25 }
  0xc0   : > { %10160 = vmatpush3.bf16.msra.mxu0 %v11534_v41  ;;  %v11585_v41 = vld [vmem:[%s15047_s1 + $0x188] sm:$0xff]  }
  0xc1   : > { %10180 = vmatpush3.bf16.msra.mxu1 %v11535_v42  ;;  %10161 = vmatprep.subr.bf16.mxu0 %v12085_v25  ;;  %v11586_v42 = vld [vmem:[%s15047_s1 + $0x140] sm:$0xff]  }
  0xc2   : > { %10181 = vmatprep.subr.bf16.mxu1 %v12085_v25 }
  0xc4   : > { %10162 = vmatpush3.bf16.msra.mxu0 %v11536_v43  ;;  %v11587_v43 = vld [vmem:[%s15047_s1 + $0x180] sm:$0xff]  }
  0xc5   : > { %10182 = vmatpush3.bf16.msra.mxu1 %v11537_v44  ;;  %10187 = vmatprep.subr.bf16.mxu0 %v12085_v25  ;;  %v12760_v44 = vld [vmem:[%s12245_s5 + $0x88] sm:$0x1f]  }
  0xc6   : > { %10207 = vmatprep.subr.bf16.mxu1 %v12085_v25 }
  0xc7   : > { %10164 = vmatmul.mubr.bf16.vlgmr.msra.gmra.mxu0 %v11521_v28 }
  0xc8   : > { %10184 = vmatmul.mubr.bf16.vlgmr.msra.gmra.mxu1 %v11538_v45  ;;  %10188 = vmatpush3.bf16.msra.mxu0 %v11539_v46  ;;  %v11590_v46 = vld [vmem:[%s15047_s1 + $0x238] sm:$0xff]  }
  0xc9   : > { %10208 = vmatpush3.bf16.msra.mxu1 %v11540_v47  ;;  %10189 = vmatprep.subr.bf16.mxu0 %v12085_v25 }
  0xca   : > { %10209 = vmatprep.subr.bf16.mxu1 %v12085_v25  ;;  %10203 = vmatprep.mubr.msk.bf16.mxu0 %vm12086_vm0, %v12085_v25 }
  0xcb   : > { %10223 = vmatprep.mubr.msk.bf16.mxu1 %vm12086_vm0, %v12085_v25 }
  0xcc   : > { %10190 = vmatpush3.bf16.msra.mxu0 %v11541_v48  ;;  %v11591_v48 = vld [vmem:[%s15047_s1 + $0x1f0] sm:$0xff]  }
  0xcd   : > { %10210 = vmatpush3.bf16.msra.mxu1 %v11542_v49  ;;  %10191 = vmatprep.subr.bf16.mxu0 %v12085_v25 }
  0xce   : > { %10211 = vmatprep.subr.bf16.mxu1 %v12085_v25 }
  0xd0   : > { %10192 = vmatpush3.bf16.msra.mxu0 %v11543_v50  ;;  %v11592_v50 = vld [vmem:[%s15047_s1 + $0x230] sm:$0xff]  }
  0xd1   : > { %10212 = vmatpush3.bf16.msra.mxu1 %v11544_v51  ;;  %10193 = vmatprep.subr.bf16.mxu0 %v12085_v25 }
  0xd2   : > { %10213 = vmatprep.subr.bf16.mxu1 %v12085_v25 }
  0xd4   : > { %10194 = vmatpush3.bf16.msra.mxu0 %v11545_v52 }
  0xd5   : > { %10214 = vmatpush3.bf16.msra.mxu1 %v11546_v53  ;;  %10195 = vmatprep.subr.bf16.mxu0 %v12085_v25 }
  0xd6   : > { %10215 = vmatprep.subr.bf16.mxu1 %v12085_v25 }
  0xd8   : > { %10196 = vmatpush3.bf16.msra.mxu0 %v11547_v54  ;;  %v11593_v54 = vld [vmem:[%s15047_s1 + $0x1e8] sm:$0xff]  }
  0xd9   : > { %10216 = vmatpush3.bf16.msra.mxu1 %v11548_v55  ;;  %10197 = vmatprep.subr.bf16.mxu0 %v12085_v25  ;;  %v11594_v55 = vld [vmem:[%s15047_s1 + $0x228] sm:$0xff]  }
  0xda   : > { %10217 = vmatprep.subr.bf16.mxu1 %v12085_v25 }
  0xdc   : > { %10198 = vmatpush3.bf16.msra.mxu0 %v11549_v56 }
  0xdd   : > { %10218 = vmatpush3.bf16.msra.mxu1 %v11550_v57  ;;  %10199 = vmatprep.subr.bf16.mxu0 %v12085_v25 }
  0xde   : > { %10219 = vmatprep.subr.bf16.mxu1 %v12085_v25 }
  0xe0   : > { %10200 = vmatpush3.bf16.msra.mxu0 %v11551_v58 }
  0xe1   : > { %10220 = vmatpush3.bf16.msra.mxu1 %v11552_v59  ;;  %10201 = vmatprep.subr.bf16.mxu0 %v12085_v25 }
  0xe2   : > { %10221 = vmatprep.subr.bf16.mxu1 %v12085_v25 }
  0xe4   : > { %10202 = vmatpush3.bf16.msra.mxu0 %v11553_v60 }
  0xe5   : > { %10222 = vmatpush3.bf16.msra.mxu1 %v11554_v61  ;;  %10227 = vmatprep.subr.bf16.mxu0 %v12085_v25 }
  0xe6   : > { %10247 = vmatprep.subr.bf16.mxu1 %v12085_v25 }
  0xe7   : > { %10204 = vmatmul.mubr.bf16.vlgmr.msra.gmra.mxu0 %v11538_v45 }
  0xe8   : > { %10224 = vmatmul.mubr.bf16.vlgmr.msra.gmra.mxu1 %v11538_v45  ;;  %10228 = vmatpush3.bf16.msra.mxu0 %v11555_v62  ;;  %v11589_v45 = vld [vmem:[%s15047_s1 + $0x1f8] sm:$0xff]   ;;  %v11595_v62 = vld [vmem:[%s15047_s1 + $0x1e0] sm:$0xff]  }
  0xe9   : > { %10248 = vmatpush3.bf16.msra.mxu1 %v11556_v63  ;;  %10229 = vmatprep.subr.bf16.mxu0 %v12085_v25 }
  0xea   : > { %10249 = vmatprep.subr.bf16.mxu1 %v12085_v25  ;;  %10243 = vmatprep.mubr.msk.bf16.mxu0 %vm12086_vm0, %v12085_v25 }
  0xeb   : > { %10263 = vmatprep.mubr.msk.bf16.mxu1 %vm12086_vm0, %v12085_v25 }
  0xec   : > { %10230 = vmatpush3.bf16.msra.mxu0 %v11557_v0  ;;  %v11596_v0 = vld [vmem:[%s15047_s1 + $0x220] sm:$0xff]  }
  0xed   : > { %10250 = vmatpush3.bf16.msra.mxu1 %v11558_v1  ;;  %10231 = vmatprep.subr.bf16.mxu0 %v12085_v25 }
  0xee   : > { %10251 = vmatprep.subr.bf16.mxu1 %v12085_v25 }
  0xf0   : > { %10232 = vmatpush3.bf16.msra.mxu0 %v11559_v2  ;;  %v11597_v2 = vld [vmem:[%s15047_s1 + $0x1d8] sm:$0xff]  }
  0xf1   : > { %10252 = vmatpush3.bf16.msra.mxu1 %v11560_v3  ;;  %10233 = vmatprep.subr.bf16.mxu0 %v12085_v25  ;;  %v11598_v3 = vld [vmem:[%s15047_s1 + $0x218] sm:$0xff]  }
  0xf2   : > { %10253 = vmatprep.subr.bf16.mxu1 %v12085_v25 }
  0xf4   : > { %10234 = vmatpush3.bf16.msra.mxu0 %v11561_v4  ;;  %v11599_v4 = vld [vmem:[%s15047_s1 + $0x1d0] sm:$0xff]  }
  0xf5   : > { %10254 = vmatpush3.bf16.msra.mxu1 %v11562_v5  ;;  %10235 = vmatprep.subr.bf16.mxu0 %v12085_v25  ;;  %v11600_v5 = vld [vmem:[%s15047_s1 + $0x210] sm:$0xff]  }
  0xf6   : > { %10255 = vmatprep.subr.bf16.mxu1 %v12085_v25 }
  0xf8   : > { %10236 = vmatpush3.bf16.msra.mxu0 %v11563_v6  ;;  %v11601_v6 = vld [vmem:[%s15047_s1 + $0x1c8] sm:$0xff]  }
  0xf9   : > { %10256 = vmatpush3.bf16.msra.mxu1 %v11564_v7  ;;  %10237 = vmatprep.subr.bf16.mxu0 %v12085_v25  ;;  %v11602_v7 = vld [vmem:[%s15047_s1 + $0x208] sm:$0xff]  }
  0xfa   : > { %10257 = vmatprep.subr.bf16.mxu1 %v12085_v25 }
  0xfc   : > { %10238 = vmatpush3.bf16.msra.mxu0 %v11565_v8  ;;  %v11603_v8 = vld [vmem:[%s15047_s1 + $0x1c0] sm:$0xff]  }
  0xfd   : > { %10258 = vmatpush3.bf16.msra.mxu1 %v11566_v9  ;;  %10239 = vmatprep.subr.bf16.mxu0 %v12085_v25  ;;  %v11604_v9 = vld [vmem:[%s15047_s1 + $0x200] sm:$0xff]  }
  0xfe   : > { %10259 = vmatprep.subr.bf16.mxu1 %v12085_v25 }
 0x100   : > { %10240 = vmatpush3.bf16.msra.mxu0 %v11567_v10  ;;  %v11605_v10 = vld [vmem:[%s15047_s1 + $0x38] sm:$0xff]  }
 0x101   : > { %10260 = vmatpush3.bf16.msra.mxu1 %v11568_v11  ;;  %10241 = vmatprep.subr.bf16.mxu0 %v12085_v25  ;;  %v11606_v11 = vld [vmem:[%s15047_s1 + $0x78] sm:$0xff]  }
 0x102   : > { %10261 = vmatprep.subr.bf16.mxu1 %v12085_v25 }
 0x104   : > { %10242 = vmatpush3.bf16.msra.mxu0 %v11569_v12 }
 0x105   : > { %10262 = vmatpush3.bf16.msra.mxu1 %v11570_v13  ;;  %10267 = vmatprep.subr.bf16.mxu0 %v12085_v25 }
 0x106   : > { %10287 = vmatprep.subr.bf16.mxu1 %v12085_v25 }
 0x107   : > { %v542_v17 = vpop.f32.mrf.mxu0  ;;  %10244 = vmatmul.mubr.bf16.vlgmr.msra.gmra.mxu0 %v12683_v14 }
 0x108   : > { %v647_v19 = vpop.f32.mrf.mxu1  ;;  %10264 = vmatmul.mubr.bf16.vlgmr.msra.gmra.mxu1 %v12683_v14  ;;  %10268 = vmatpush3.bf16.msra.mxu0 %v11572_v15 }
 0x109   : > { %10288 = vmatpush3.bf16.msra.mxu1 %v11573_v16  ;;  %v10005_v20 = vpop.f32.mrf.mxu0  ;;  %10269 = vmatprep.subr.bf16.mxu0 %v12085_v25  ;;  %v657_v23 = vrot.slane %v647_v19, 1  ;;  %v11608_v16 = vld [vmem:[%s15047_s1 + $0x70] sm:$0xff]  }
 0x10a   : > { %v10025_v22 = vpop.f32.mrf.mxu1  ;;  %10289 = vmatprep.subr.bf16.mxu1 %v12085_v25  ;;  %10283 = vmatprep.mubr.msk.bf16.mxu0 %vm12086_vm0, %v12085_v25  ;;  %v11609_v20 = vld [vmem:[%s15047_s1 + $0x28] sm:$0xff]  }
 0x10b   : > { %v545_v24 = vpop.f32.mrf.mxu0  ;;  %10303 = vmatprep.mubr.msk.bf16.mxu1 %vm12086_vm0, %v12085_v25  ;;  %v11610_v22 = vld [vmem:[%s15047_s1 + $0x68] sm:$0xff]  }
 0x10c   : > { %v650_v27 = vpop.f32.mrf.mxu1  ;;  %10270 = vmatpush3.bf16.msra.mxu0 %v11574_v18  ;;  %v11611_v24 = vld [vmem:[%s15047_s1 + $0x20] sm:$0xff]  }
 0x10d   : > { %v658_v28 = vrot.slane %v650_v27, 1  ;;  %10290 = vmatpush3.bf16.msra.mxu1 %v11575_v21  ;;  %v10006_v29 = vpop.f32.mrf.mxu0  ;;  %10271 = vmatprep.subr.bf16.mxu0 %v12085_v25  ;;  %v11613_v27 = vld [vmem:[%s15047_s1 + $0x18] sm:$0xff]  }
 0x10e   : > { %v10026_v31 = vpop.f32.mrf.mxu1  ;;  %10291 = vmatprep.subr.bf16.mxu1 %v12085_v25  ;;  %v11615_v29 = vld [vmem:[%s15047_s1 + $0x10] sm:$0xff]  }
 0x10f   : > { %v659_v32 = vsel %vm656_vm1, %v657_v23, %v658_v28  ;;  %v11614_v28 = vld [vmem:[%s15047_s1 + $0x58] sm:$0xff]   ;;  %v11617_v31 = vld [vmem:[%s15047_s1 + $0x8] sm:$0xff]  }
 0x110   : > { %v12723_v35 = vadd.f32 %v659_v32, %v542_v17  ;;  %10272 = vmatpush3.bf16.msra.mxu0 %v11576_v26  ;;  %v11612_v26 = vld [vmem:[%s15047_s1 + $0x60] sm:$0xff]   ;;  %v11618_v32 = vld [vmem:[%s15047_s1 + $0x48] sm:$0xff]  }
 0x111   : > { %10292 = vmatpush3.bf16.msra.mxu1 %v11577_v30  ;;  %10273 = vmatprep.subr.bf16.mxu0 %v12085_v25  ;;  %v11616_v30 = vld [vmem:[%s15047_s1 + $0x50] sm:$0xff]  }
 0x112   : > { %10293 = vmatprep.subr.bf16.mxu1 %v12085_v25 }
 0x114   : > { %10274 = vmatpush3.bf16.msra.mxu0 %v11578_v33  ;;  %v11619_v33 = vld [vmem:[%s15047_s1] sm:$0xff]  }
 0x115   : > { %10294 = vmatpush3.bf16.msra.mxu1 %v11579_v34  ;;  %10275 = vmatprep.subr.bf16.mxu0 %v12085_v25  ;;  %v11620_v34 = vld [vmem:[%s15047_s1 + $0x40] sm:$0xff]  }
 0x116   : > { %10295 = vmatprep.subr.bf16.mxu1 %v12085_v25 }
 0x118   : > { %10276 = vmatpush3.bf16.msra.mxu0 %v11580_v36  ;;  %v11622_v36 = vld [vmem:[%s15047_s1 + $0xb8] sm:$0xff]  }
 0x119   : > { %10296 = vmatpush3.bf16.msra.mxu1 %v11581_v37  ;;  %10277 = vmatprep.subr.bf16.mxu0 %v12085_v25  ;;  %v11623_v37 = vld [vmem:[%s15047_s1 + $0xf8] sm:$0xff]  }
 0x11a   : > { %10297 = vmatprep.subr.bf16.mxu1 %v12085_v25 }
 0x11c   : > { %10278 = vmatpush3.bf16.msra.mxu0 %v11582_v38 }
 0x11d   : > { %10298 = vmatpush3.bf16.msra.mxu1 %v11583_v39  ;;  %10279 = vmatprep.subr.bf16.mxu0 %v12085_v25  ;;  %v11624_v39 = vld [vmem:[%s15047_s1 + $0xb0] sm:$0xff]  }
 0x11e   : > { %10299 = vmatprep.subr.bf16.mxu1 %v12085_v25 }
 0x120   : > { %10280 = vmatpush3.bf16.msra.mxu0 %v11584_v40 }
 0x121   : > { %10300 = vmatpush3.bf16.msra.mxu1 %v11585_v41  ;;  %10281 = vmatprep.subr.bf16.mxu0 %v12085_v25 }
 0x122   : > { %10301 = vmatprep.subr.bf16.mxu1 %v12085_v25 }
 0x124   : > { %10282 = vmatpush3.bf16.msra.mxu0 %v11586_v42  ;;  %v11625_v42 = vld [vmem:[%s15047_s1 + $0xf0] sm:$0xff]  }
 0x125   : > { %10302 = vmatpush3.bf16.msra.mxu1 %v11587_v43  ;;  %10307 = vmatprep.subr.bf16.mxu0 %v12085_v25 }
 0x126   : > { %10327 = vmatprep.subr.bf16.mxu1 %v12085_v25 }
 0x127   : > { %v760_v47 = vpop.f32.mrf.mxu0  ;;  %10284 = vmatmul.mubr.bf16.vlgmr.msra.gmra.mxu0 %v12683_v14  ;;  %v11607_v14 = vld [vmem:[%s15047_s1 + $0x30] sm:$0xff]  }
 0x128   : > { %v882_v49 = vpop.f32.mrf.mxu1  ;;  %10304 = vmatmul.mubr.bf16.vlgmr.msra.gmra.mxu1 %v12760_v44  ;;  %10308 = vmatpush3.bf16.msra.mxu0 %v11589_v45  ;;  %v770_v56 = vrot.slane %v760_v47, 2  ;;  %v11626_v45 = vld [vmem:[%s15047_s1 + $0xa8] sm:$0xff]  }
 0x129   : > { %10328 = vmatpush3.bf16.msra.mxu1 %v11590_v46  ;;  %v10045_v51 = vpop.f32.mrf.mxu0  ;;  %10309 = vmatprep.subr.bf16.mxu0 %v12085_v25 }
 0x12a   : > { %v10065_v52 = vpop.f32.mrf.mxu1  ;;  %10329 = vmatprep.subr.bf16.mxu1 %v12085_v25  ;;  %10323 = vmatprep.mubr.msk.bf16.mxu0 %vm12086_vm0, %v12085_v25  ;;  %v11629_v51 = vld [vmem:[%s15047_s1 + $0xe0] sm:$0xff]  }
 0x12b   : > { %v763_v53 = vpop.f32.mrf.mxu0  ;;  %10343 = vmatprep.mubr.msk.bf16.mxu1 %vm12086_vm0, %v12085_v25  ;;  %v11630_v52 = vld [vmem:[%s15047_s1 + $0x98] sm:$0xff]  }
 0x12c   : > { %v771_v57 = vrot.slane %v763_v53, 2  ;;  %v885_v58 = vpop.f32.mrf.mxu1  ;;  %10310 = vmatpush3.bf16.msra.mxu0 %v11591_v48  ;;  %v11627_v48 = vld [vmem:[%s15047_s1 + $0xe8] sm:$0xff]   ;;  %v11631_v53 = vld [vmem:[%s15047_s1 + $0xd8] sm:$0xff]  }
 0x12d   : > { %10330 = vmatpush3.bf16.msra.mxu1 %v11592_v50  ;;  %v10046_v59 = vpop.f32.mrf.mxu0  ;;  %10311 = vmatprep.subr.bf16.mxu0 %v12085_v25  ;;  %v11628_v50 = vld [vmem:[%s15047_s1 + $0xa0] sm:$0xff]  }
 0x12e   : > { %v772_v60 = vsel %vm769_vm2, %v770_v56, %v771_v57  ;;  %v10066_v61 = vpop.f32.mrf.mxu1  ;;  %10331 = vmatprep.subr.bf16.mxu1 %v12085_v25  ;;  %v11634_v56 = vld [vmem:[%s15047_s1 + $0x88] sm:$0xff]   ;;  %v11636_v59 = vld [vmem:[%s15047_s1 + $0x80] sm:$0xff]  }
 0x12f   : > { %v774_v63 = vadd.f32 %v772_v60, %v12723_v35  ;;  %v12914_v35 = vld [vmem:[%s12245_s5 + $0x10] sm:$0x1f]   ;;  %v11635_v57 = vld [vmem:[%s15047_s1 + $0xc8] sm:$0xff]   ;;  %v11637_v61 = vld [vmem:[%s15047_s1 + $0xc0] sm:$0xff]  }
 0x130   : > { %10312 = vmatpush3.bf16.msra.mxu0 %v11593_v54  ;;  %v11632_v54 = vld [vmem:[%s15047_s1 + $0x90] sm:$0xff]  }
 0x131   : > { %10332 = vmatpush3.bf16.msra.mxu1 %v11594_v55  ;;  %10313 = vmatprep.subr.bf16.mxu0 %v12085_v25  ;;  %v12801_v1 = vadd.f32 %v882_v49, %v774_v63  ;;  %v11633_v55 = vld [vmem:[%s15047_s1 + $0xd0] sm:$0xff]  }
 0x132   : > { %10333 = vmatprep.subr.bf16.mxu1 %v12085_v25 }
 0x134   : > { %10314 = vmatpush3.bf16.msra.mxu0 %v11595_v62 }
 0x135   : > { %10334 = vmatpush3.bf16.msra.mxu1 %v11596_v0  ;;  %10315 = vmatprep.subr.bf16.mxu0 %v12085_v25 }
 0x136   : > { %10335 = vmatprep.subr.bf16.mxu1 %v12085_v25 }
 0x138   : > { %10316 = vmatpush3.bf16.msra.mxu0 %v11597_v2  ;;  %v12999_v2 = vld [vmem:[%s12245_s5 + $0x50] sm:$0x1f]  }
 0x139   : > { %10336 = vmatpush3.bf16.msra.mxu1 %v11598_v3  ;;  %10317 = vmatprep.subr.bf16.mxu0 %v12085_v25  ;;  %v11639_v3 = vld [vmem:[%s15047_s1 + $0x138] sm:$0xff]  }
 0x13a   : > { %10337 = vmatprep.subr.bf16.mxu1 %v12085_v25 }
 0x13c   : > { %10318 = vmatpush3.bf16.msra.mxu0 %v11599_v4 }
 0x13d   : > { %10338 = vmatpush3.bf16.msra.mxu1 %v11600_v5  ;;  %10319 = vmatprep.subr.bf16.mxu0 %v12085_v25 }
 0x13e   : > { %10339 = vmatprep.subr.bf16.mxu1 %v12085_v25 }
 0x140   : > { %10320 = vmatpush3.bf16.msra.mxu0 %v11601_v6  ;;  %v11640_v6 = vld [vmem:[%s15047_s1 + $0x178] sm:$0xff]  }
 0x141   : > { %10340 = vmatpush3.bf16.msra.mxu1 %v11602_v7  ;;  %10321 = vmatprep.subr.bf16.mxu0 %v12085_v25 }
 0x142   : > { %10341 = vmatprep.subr.bf16.mxu1 %v12085_v25 }
 0x144   : > { %10322 = vmatpush3.bf16.msra.mxu0 %v11603_v8 }
 0x145   : > { %10342 = vmatpush3.bf16.msra.mxu1 %v11604_v9  ;;  %10347 = vmatprep.subr.bf16.mxu0 %v12085_v25  ;;  %v11641_v9 = vld [vmem:[%s15047_s1 + $0x130] sm:$0xff]  }
 0x146   : > { %10367 = vmatprep.subr.bf16.mxu1 %v12085_v25 }
 0x147   : > { %v12844_v12 = vpop.f32.mrf.mxu0  ;;  %10324 = vmatmul.mubr.bf16.vlgmr.msra.gmra.mxu0 %v12760_v44 }
 0x148   : > { %v12847_v13 = vpop.f32.mrf.mxu1  ;;  %10344 = vmatmul.mubr.bf16.vlgmr.msra.gmra.mxu1 %v12760_v44  ;;  %10348 = vmatpush3.bf16.msra.mxu0 %v11605_v10  ;;  %v996_v60 = vrot.slane %v12844_v12, 1 }
 0x149   : > { %10368 = vmatpush3.bf16.msra.mxu1 %v11606_v11  ;;  %v10085_v15 = vpop.f32.mrf.mxu0  ;;  %10349 = vmatprep.subr.bf16.mxu0 %v12085_v25  ;;  %v1108_v62 = vrot.slane %v12847_v13, 2 }
 0x14a   : > { %v10105_v17 = vpop.f32.mrf.mxu1  ;;  %10369 = vmatprep.subr.bf16.mxu1 %v12085_v25  ;;  %10363 = vmatprep.mubr.msk.bf16.mxu0 %vm12086_vm0, %v12085_v25 }
 0x14b   : > { %v12860_v18 = vpop.f32.mrf.mxu0  ;;  %10383 = vmatprep.mubr.msk.bf16.mxu1 %vm12086_vm0, %v12085_v25 }
 0x14c   : > { %v12864_v19 = vpop.f32.mrf.mxu1  ;;  %10350 = vmatpush3.bf16.msra.mxu0 %v11607_v14  ;;  %v997_v58 = vrot.slane %v12860_v18, 1  ;;  %v11643_v18 = vld [vmem:[%s15047_s1 + $0x128] sm:$0xff]  }
 0x14d   : > { %10370 = vmatpush3.bf16.msra.mxu1 %v11608_v16  ;;  %v10086_v21 = vpop.f32.mrf.mxu0  ;;  %10351 = vmatprep.subr.bf16.mxu0 %v12085_v25  ;;  %v1109_v0 = vrot.slane %v12864_v19, 2  ;;  %v11644_v19 = vld [vmem:[%s15047_s1 + $0x168] sm:$0xff]  }
 0x14e   : > { %v10106_v23 = vpop.f32.mrf.mxu1  ;;  %10371 = vmatprep.subr.bf16.mxu1 %v12085_v25  ;;  %v998_v63 = vsel %vm656_vm1, %v996_v60, %v997_v58  ;;  %v8759_v21 = vld [vmem:[%s15048_s2] ss:$0 sm:$0xff] }
 0x14f   : > { %v1000_v7 = vadd.f32 %v998_v63, %v12801_v1  ;;  %v1110_v10 = vsel %vm769_vm2, %v1108_v62, %v1109_v0  ;;  %v11642_v1 = vld [vmem:[%s15047_s1 + $0x170] sm:$0xff]   ;;  %v11661_v0 = vld [vmem:[%s15047_s1 + $0x1a0] sm:$0xff]  }
 0x150   : > { %10352 = vmatpush3.bf16.msra.mxu0 %v11609_v20 }
 0x151   : > { %10372 = vmatpush3.bf16.msra.mxu1 %v11610_v22  ;;  %10353 = vmatprep.subr.bf16.mxu0 %v12085_v25  ;;  %v1112_v12 = vadd.f32 %v1110_v10, %v1000_v7  ;;  %v11664_v7 = vld [vmem:[%s15047_s1 + $0x1d8] sm:$0xff]   ;;  %v11667_v10 = vld [vmem:[%s15047_s1 + $0x188] sm:$0xff]  }
 0x152   : > { %10373 = vmatprep.subr.bf16.mxu1 %v12085_v25 }
 0x154   : > { %10354 = vmatpush3.bf16.msra.mxu0 %v11611_v24 }
 0x155   : > { %10374 = vmatpush3.bf16.msra.mxu1 %v11612_v26  ;;  %10355 = vmatprep.subr.bf16.mxu0 %v12085_v25 }
 0x156   : > { %10375 = vmatprep.subr.bf16.mxu1 %v12085_v25 }
 0x158   : > { %10356 = vmatpush3.bf16.msra.mxu0 %v11613_v27  ;;  %v8760_v27 = vld [vmem:[%s15049_s3] ss:$0 sm:$0xff] }
 0x159   : > { %10376 = vmatpush3.bf16.msra.mxu1 %v11614_v28  ;;  %10357 = vmatprep.subr.bf16.mxu0 %v12085_v25 }
 0x15a   : > { %10377 = vmatprep.subr.bf16.mxu1 %v12085_v25 }
 0x15c   : > { %10358 = vmatpush3.bf16.msra.mxu0 %v11615_v29 }
 0x15d   : > { %10378 = vmatpush3.bf16.msra.mxu1 %v11616_v30  ;;  %10359 = vmatprep.subr.bf16.mxu0 %v12085_v25 }
 0x15e   : > { %10379 = vmatprep.subr.bf16.mxu1 %v12085_v25 }
 0x160   : > { %10360 = vmatpush3.bf16.msra.mxu0 %v11617_v31  ;;  %v11645_v31 = vld [vmem:[%s15047_s1 + $0x120] sm:$0xff]  }
 0x161   : > { %10380 = vmatpush3.bf16.msra.mxu1 %v11618_v32  ;;  %10361 = vmatprep.subr.bf16.mxu0 %v12085_v25  ;;  %v11646_v32 = vld [vmem:[%s15047_s1 + $0x160] sm:$0xff]  }
 0x162   : > { %10381 = vmatprep.subr.bf16.mxu1 %v12085_v25 }
 0x164   : > { %10362 = vmatpush3.bf16.msra.mxu0 %v11619_v33 }
 0x165   : > { %10382 = vmatpush3.bf16.msra.mxu1 %v11620_v34  ;;  %10387 = vmatprep.subr.bf16.mxu0 %v12085_v25 }
 0x166   : > { %10407 = vmatprep.subr.bf16.mxu1 %v12085_v25 }
 0x167   : > { %v12925_v38 = vpop.f32.mrf.mxu0  ;;  %10364 = vmatmul.mubr.bf16.vlgmr.msra.gmra.mxu0 %v12914_v35 }
 0x168   : > { %v12931_v40 = vpop.f32.mrf.mxu1  ;;  %10384 = vmatmul.mubr.bf16.vlgmr.msra.gmra.mxu1 %v12914_v35  ;;  %10388 = vmatpush3.bf16.msra.mxu0 %v11622_v36  ;;  %v1226_v16 = vadd.f32 %v12925_v38, %v1112_v12  ;;  %v11670_v12 = vld [vmem:[%s15047_s1 + $0x1c0] sm:$0xff]  }
 0x169   : > { %10408 = vmatpush3.bf16.msra.mxu1 %v11623_v37  ;;  %v10125_v41 = vpop.f32.mrf.mxu0  ;;  %10389 = vmatprep.subr.bf16.mxu0 %v12085_v25  ;;  %v1334_v4 = vrot.slane %v12931_v40, 1  ;;  %v11648_v37 = vld [vmem:[%s15047_s1 + $0x158] sm:$0xff]   ;;  %v11650_v40 = vld [vmem:[%s15047_s1 + $0x150] sm:$0xff]  }
 0x16a   : > { %v10145_v43 = vpop.f32.mrf.mxu1  ;;  %10409 = vmatprep.subr.bf16.mxu1 %v12085_v25  ;;  %10403 = vmatprep.mubr.msk.bf16.mxu0 %vm12086_vm0, %v12085_v25  ;;  %v11651_v41 = vld [vmem:[%s15047_s1 + $0x108] sm:$0xff]  }
 0x16b   : > { %v1223_v44 = vpop.f32.mrf.mxu0  ;;  %10423 = vmatprep.mubr.msk.bf16.mxu1 %vm12086_vm0, %v12085_v25  ;;  %v11653_v43 = vld [vmem:[%s15047_s1 + $0x100] sm:$0xff]  }
 0x16c   : > { %v12946_v46 = vpop.f32.mrf.mxu1  ;;  %10390 = vmatpush3.bf16.msra.mxu0 %v11624_v39  ;;  %v11649_v39 = vld [vmem:[%s15047_s1 + $0x110] sm:$0xff]   ;;  %v11654_v44 = vld [vmem:[%s15047_s1 + $0x140] sm:$0xff]  }
 0x16d   : > { %10410 = vmatpush3.bf16.msra.mxu1 %v11625_v42  ;;  %v10126_v47 = vpop.f32.mrf.mxu0  ;;  %10391 = vmatprep.subr.bf16.mxu0 %v12085_v25  ;;  %v1335_v5 = vrot.slane %v12946_v46, 1  ;;  %v11652_v42 = vld [vmem:[%s15047_s1 + $0x148] sm:$0xff]   ;;  %v11656_v46 = vld [vmem:[%s15047_s1 + $0x1f8] sm:$0xff]  }
 0x16e   : > { %v10146_v49 = vpop.f32.mrf.mxu1  ;;  %10411 = vmatprep.subr.bf16.mxu1 %v12085_v25 }
 0x16f   : > { %v1336_v14 = vsel %vm656_vm1, %v1334_v4, %v1335_v5  ;;  %v11657_v49 = vld [vmem:[%s15047_s1 + $0x1b0] sm:$0xff]  }
 0x170   : > { %10392 = vmatpush3.bf16.msra.mxu0 %v11626_v45  ;;  %v1338_v24 = vadd.f32 %v1336_v14, %v1226_v16  ;;  %v11655_v45 = vld [vmem:[%s15047_s1 + $0x1b8] sm:$0xff]  }
 0x171   : > { %10412 = vmatpush3.bf16.msra.mxu1 %v11627_v48  ;;  %10393 = vmatprep.subr.bf16.mxu0 %v12085_v25  ;;  %v11672_v14 = vld [vmem:[%s15047_s1 + $0x238] sm:$0xff]  }
 0x172   : > { %10413 = vmatprep.subr.bf16.mxu1 %v12085_v25 }
 0x174   : > { %10394 = vmatpush3.bf16.msra.mxu0 %v11628_v50 }
 0x175   : > { %10414 = vmatpush3.bf16.msra.mxu1 %v11629_v51  ;;  %10395 = vmatprep.subr.bf16.mxu0 %v12085_v25  ;;  %v11658_v51 = vld [vmem:[%s15047_s1 + $0x1f0] sm:$0xff]  }
 0x176   : > { %10415 = vmatprep.subr.bf16.mxu1 %v12085_v25 }
 0x178   : > { %10396 = vmatpush3.bf16.msra.mxu0 %v11630_v52 }
 0x179   : > { %10416 = vmatpush3.bf16.msra.mxu1 %v11631_v53  ;;  %10397 = vmatprep.subr.bf16.mxu0 %v12085_v25 }
 0x17a   : > { %10417 = vmatprep.subr.bf16.mxu1 %v12085_v25 }
 0x17c   : > { %10398 = vmatpush3.bf16.msra.mxu0 %v11632_v54 }
 0x17d   : > { %10418 = vmatpush3.bf16.msra.mxu1 %v11633_v55  ;;  %10399 = vmatprep.subr.bf16.mxu0 %v12085_v25  ;;  %v11659_v55 = vld [vmem:[%s15047_s1 + $0x1a8] sm:$0xff]  }
 0x17e   : > { %10419 = vmatprep.subr.bf16.mxu1 %v12085_v25 }
 0x180   : > { %10400 = vmatpush3.bf16.msra.mxu0 %v11634_v56 }
 0x181   : > { %10420 = vmatpush3.bf16.msra.mxu1 %v11635_v57  ;;  %10401 = vmatprep.subr.bf16.mxu0 %v12085_v25 }
 0x182   : > { %10421 = vmatprep.subr.bf16.mxu1 %v12085_v25 }
 0x184   : > { %10402 = vmatpush3.bf16.msra.mxu0 %v11636_v59 }
 0x185   : > { %10422 = vmatpush3.bf16.msra.mxu1 %v11637_v61  ;;  %10427 = vmatprep.subr.bf16.mxu0 %v12085_v25  ;;  %v11660_v61 = vld [vmem:[%s15047_s1 + $0x1e8] sm:$0xff]  }
 0x186   : > { %10447 = vmatprep.subr.bf16.mxu1 %v12085_v25 }
 0x187   : > { %v1437_v8 = vpop.f32.mrf.mxu0  ;;  %10404 = vmatmul.mubr.bf16.vlgmr.msra.gmra.mxu0 %v12914_v35  ;;  %v11647_v35 = vld [vmem:[%s15047_s1 + $0x118] sm:$0xff]  }
 0x188   : > { %v13017_v11 = vpop.f32.mrf.mxu1  ;;  %10424 = vmatmul.mubr.bf16.vlgmr.msra.gmra.mxu1 %v12999_v2  ;;  %10428 = vmatpush3.bf16.msra.mxu0 %v11639_v3  ;;  %v1446_v20 = vrot.slane %v1437_v8, 2  ;;  %v11665_v8 = vld [vmem:[%s15047_s1 + $0x190] sm:$0xff]  }
 0x189   : > { %10448 = vmatpush3.bf16.msra.mxu1 %v11640_v6  ;;  %v10165_v13 = vpop.f32.mrf.mxu0  ;;  %10429 = vmatprep.subr.bf16.mxu0 %v12085_v25  ;;  %v11663_v6 = vld [vmem:[%s15047_s1 + $0x198] sm:$0xff]  }
 0x18a   : > { %v10185_v15 = vpop.f32.mrf.mxu1  ;;  %10449 = vmatprep.subr.bf16.mxu1 %v12085_v25  ;;  %10443 = vmatprep.mubr.msk.bf16.mxu0 %vm12086_vm0, %v12085_v25  ;;  %v13170_v13 = vld [vmem:[%s12245_s5 + $0x90] sm:$0x1f]  }
 0x18b   : > { %v1440_v17 = vpop.f32.mrf.mxu0  ;;  %10463 = vmatprep.mubr.msk.bf16.mxu1 %vm12086_vm0, %v12085_v25  ;;  %v11673_v15 = vld [vmem:[%s15047_s1 + $0x38] sm:$0xff]  }
 0x18c   : > { %v1447_v22 = vrot.slane %v1440_v17, 2  ;;  %v1578_v23 = vpop.f32.mrf.mxu1  ;;  %10430 = vmatpush3.bf16.msra.mxu0 %v11641_v9  ;;  %v11666_v9 = vld [vmem:[%s15047_s1 + $0x1d0] sm:$0xff]  }
 0x18d   : > { %10450 = vmatpush3.bf16.msra.mxu1 %v11642_v1  ;;  %v10166_v26 = vpop.f32.mrf.mxu0  ;;  %10431 = vmatprep.subr.bf16.mxu0 %v12085_v25  ;;  %v11669_v1 = vld [vmem:[%s15047_s1 + $0x180] sm:$0xff]   ;;  %v11674_v17 = vld [vmem:[%s15047_s1 + $0x230] sm:$0xff]   ;;  %v11676_v23 = vld [vmem:[%s15047_s1 + $0x228] sm:$0xff]  }
 0x18e   : > { %v1448_v28 = vsel %vm769_vm2, %v1446_v20, %v1447_v22  ;;  %v10186_v29 = vpop.f32.mrf.mxu1  ;;  %10451 = vmatprep.subr.bf16.mxu1 %v12085_v25  ;;  %v11675_v20 = vld [vmem:[%s15047_s1 + $0x30] sm:$0xff]  }
 0x18f   : > { %v1450_v30 = vadd.f32 %v1448_v28, %v1338_v24  ;;  %v11678_v29 = vld [vmem:[%s15047_s1 + $0x220] sm:$0xff]  }
 0x190   : > { %10432 = vmatpush3.bf16.msra.mxu0 %v11643_v18 }
 0x191   : > { %v1457_v33 = vmul.f32 %v8759_v21, %v1450_v30  ;;  %10452 = vmatpush3.bf16.msra.mxu1 %v11644_v19  ;;  %10433 = vmatprep.subr.bf16.mxu0 %v12085_v25  ;;  %v11679_v30 = vld [vmem:[%s15047_s1 + $0x20] sm:$0xff]  }
 0x192   : > { %10453 = vmatprep.subr.bf16.mxu1 %v12085_v25 }
 0x193   : > { %v1464_v34 = vadd.f32 %v8760_v27, %v1457_v33  ;;  %v11677_v27 = vld [vmem:[%s15047_s1 + $0x28] sm:$0xff]   ;;  %v11682_v33 = vld [vmem:[%s15047_s1 + $0x210] sm:$0xff]  }
 0x194   : > { %10434 = vmatpush3.bf16.msra.mxu0 %v11645_v31  ;;  %v11680_v31 = vld [vmem:[%s15047_s1 + $0x218] sm:$0xff]  }
 0x195   : > { %v1465_v36 = vmax.f32 %v1464_v34, 0.0  ;;  %10454 = vmatpush3.bf16.msra.mxu1 %v11646_v32  ;;  %10435 = vmatprep.subr.bf16.mxu0 %v12085_v25  ;;  %v11681_v32 = vld [vmem:[%s15047_s1 + $0x18] sm:$0xff]   ;;  %v11683_v34 = vld [vmem:[%s15047_s1 + $0x10] sm:$0xff]  }
 0x196   : > { %10455 = vmatprep.subr.bf16.mxu1 %v12085_v25 }
 0x197   : > { %v1466_v38 = vpack.c.bf16 %v1465_v36, %v1465_v36  ;;  %v11685_v36 = vld [vmem:[%s15047_s1 + $0x8] sm:$0xff]  }
 0x198   : > { %10436 = vmatpush3.bf16.msra.mxu0 %v11647_v35  ;;  %v11684_v35 = vld [vmem:[%s15047_s1 + $0x208] sm:$0xff]  }
 0x199   : > { %1467 = vst [vmem:[%s13067_s30] sm:$0xf] %v1466_v38  ;;  %10456 = vmatpush3.bf16.msra.mxu1 %v11648_v37  ;;  %10437 = vmatprep.subr.bf16.mxu0 %v12085_v25  ;;  %v11686_v37 = vld [vmem:[%s15047_s1 + $0x200] sm:$0xff]  }
 0x19a   : > { %10457 = vmatprep.subr.bf16.mxu1 %v12085_v25  ;;  %v11687_v38 = vld [vmem:[%s15047_s1] sm:$0xff]  }
 0x19c   : > { %10438 = vmatpush3.bf16.msra.mxu0 %v11649_v39  ;;  %v13250_v39 = vld [vmem:[%s12245_s5 + $0x18] sm:$0x1f]  }
 0x19d   : > { %10458 = vmatpush3.bf16.msra.mxu1 %v11650_v40  ;;  %10439 = vmatprep.subr.bf16.mxu0 %v12085_v25  ;;  %v11689_v40 = vld [vmem:[%s15047_s1 + $0x78] sm:$0xff]  }
 0x19e   : > { %10459 = vmatprep.subr.bf16.mxu1 %v12085_v25 }
 0x1a0   : > { %10440 = vmatpush3.bf16.msra.mxu0 %v11651_v41  ;;  %v11690_v41 = vld [vmem:[%s15047_s1 + $0xb8] sm:$0xff]  }
 0x1a1   : > { %10460 = vmatpush3.bf16.msra.mxu1 %v11652_v42  ;;  %10441 = vmatprep.subr.bf16.mxu0 %v12085_v25 }
 0x1a2   : > { %10461 = vmatprep.subr.bf16.mxu1 %v12085_v25 }
 0x1a4   : > { %10442 = vmatpush3.bf16.msra.mxu0 %v11653_v43  ;;  %v11691_v43 = vld [vmem:[%s15047_s1 + $0x70] sm:$0xff]  }
 0x1a5   : > { %10462 = vmatpush3.bf16.msra.mxu1 %v11654_v44  ;;  %10467 = vmatprep.subr.bf16.mxu0 %v12085_v25 }
 0x1a6   : > { %10487 = vmatprep.subr.bf16.mxu1 %v12085_v25 }
 0x1a7   : > { %v1680_v47 = vpop.f32.mrf.mxu0  ;;  %10444 = vmatmul.mubr.bf16.vlgmr.msra.gmra.mxu0 %v12999_v2 }
 0x1a8   : > { %v1792_v48 = vpop.f32.mrf.mxu1  ;;  %10464 = vmatmul.mubr.bf16.vlgmr.msra.gmra.mxu1 %v12999_v2  ;;  %10468 = vmatpush3.bf16.msra.mxu0 %v11655_v45  ;;  %v1689_v56 = vrot.slane %v1680_v47, 1  ;;  %v11662_v2 = vld [vmem:[%s15047_s1 + $0x1e0] sm:$0xff]   ;;  %v11692_v45 = vld [vmem:[%s15047_s1 + $0xb0] sm:$0xff]  }
 0x1a9   : > { %10488 = vmatpush3.bf16.msra.mxu1 %v11656_v46  ;;  %v10205_v50 = vpop.f32.mrf.mxu0  ;;  %10469 = vmatprep.subr.bf16.mxu0 %v12085_v25  ;;  %v1801_v53 = vrot.slane %v1792_v48, 2 }
 0x1aa   : > { %v10225_v52 = vpop.f32.mrf.mxu1  ;;  %10489 = vmatprep.subr.bf16.mxu1 %v12085_v25  ;;  %10483 = vmatprep.mubr.msk.bf16.mxu0 %vm12086_vm0, %v12085_v25 }
 0x1ab   : > { %v1683_v54 = vpop.f32.mrf.mxu0  ;;  %10503 = vmatprep.mubr.msk.bf16.mxu1 %vm12086_vm0, %v12085_v25 }
 0x1ac   : > { %v1690_v57 = vrot.slane %v1683_v54, 1  ;;  %v1795_v58 = vpop.f32.mrf.mxu1  ;;  %10470 = vmatpush3.bf16.msra.mxu0 %v11657_v49  ;;  %v11693_v49 = vld [vmem:[%s15047_s1 + $0x68] sm:$0xff]   ;;  %v11695_v54 = vld [vmem:[%s15047_s1 + $0x60] sm:$0xff]  }
 0x1ad   : > { %v1802_v59 = vrot.slane %v1795_v58, 2  ;;  %10490 = vmatpush3.bf16.msra.mxu1 %v11658_v51  ;;  %v10206_v60 = vpop.f32.mrf.mxu0  ;;  %10471 = vmatprep.subr.bf16.mxu0 %v12085_v25  ;;  %v11694_v51 = vld [vmem:[%s15047_s1 + $0xa8] sm:$0xff]   ;;  %v11699_v58 = vld [vmem:[%s15047_s1 + $0x50] sm:$0xff]  }
 0x1ae   : > { %v1691_v62 = vsel %vm656_vm1, %v1689_v56, %v1690_v57  ;;  %v10226_v63 = vpop.f32.mrf.mxu1  ;;  %10491 = vmatprep.subr.bf16.mxu1 %v12085_v25  ;;  %v11697_v56 = vld [vmem:[%s15047_s1 + $0x58] sm:$0xff]   ;;  %v11701_v60 = vld [vmem:[%s15047_s1 + $0x48] sm:$0xff]  }
 0x1af   : > { %v1693_v3 = vadd.f32 %v1691_v62, %v13017_v11  ;;  %v1803_v4 = vsel %vm769_vm2, %v1801_v53, %v1802_v59  ;;  %v11668_v11 = vld [vmem:[%s15047_s1 + $0x1c8] sm:$0xff]   ;;  %v11698_v57 = vld [vmem:[%s15047_s1 + $0x98] sm:$0xff]   ;;  %v11700_v59 = vld [vmem:[%s15047_s1 + $0x90] sm:$0xff]  }
 0x1b0   : > { %10472 = vmatpush3.bf16.msra.mxu0 %v11659_v55  ;;  %v11696_v55 = vld [vmem:[%s15047_s1 + $0xa0] sm:$0xff]  }
 0x1b1   : > { %10492 = vmatpush3.bf16.msra.mxu1 %v11660_v61  ;;  %10473 = vmatprep.subr.bf16.mxu0 %v12085_v25  ;;  %v13135_v5 = vadd.f32 %v1803_v4, %v1693_v3  ;;  %v11702_v61 = vld [vmem:[%s15047_s1 + $0x88] sm:$0xff]   ;;  %v11703_v62 = vld [vmem:[%s15047_s1 + $0x40] sm:$0xff]   ;;  %v11705_v4 = vld [vmem:[%s15047_s1 + $0xf8] sm:$0xff]  }
 0x1b2   : > { %10493 = vmatprep.subr.bf16.mxu1 %v12085_v25 }
 0x1b4   : > { %10474 = vmatpush3.bf16.msra.mxu0 %v11661_v0 }
 0x1b5   : > { %10494 = vmatpush3.bf16.msra.mxu1 %v11662_v2  ;;  %10475 = vmatprep.subr.bf16.mxu0 %v12085_v25  ;;  %v11704_v2 = vld [vmem:[%s15047_s1 + $0x80] sm:$0xff]  }
 0x1b6   : > { %10495 = vmatprep.subr.bf16.mxu1 %v12085_v25 }
 0x1b8   : > { %10476 = vmatpush3.bf16.msra.mxu0 %v11663_v6 }
 0x1b9   : > { %10496 = vmatpush3.bf16.msra.mxu1 %v11664_v7  ;;  %10477 = vmatprep.subr.bf16.mxu0 %v12085_v25  ;;  %v11706_v7 = vld [vmem:[%s15047_s1 + $0x138] sm:$0xff]  }
 0x1ba   : > { %10497 = vmatprep.subr.bf16.mxu1 %v12085_v25 }
 0x1bc   : > { %10478 = vmatpush3.bf16.msra.mxu0 %v11665_v8 }
 0x1bd   : > { %10498 = vmatpush3.bf16.msra.mxu1 %v11666_v9  ;;  %10479 = vmatprep.subr.bf16.mxu0 %v12085_v25 }
 0x1be   : > { %10499 = vmatprep.subr.bf16.mxu1 %v12085_v25 }
 0x1c0   : > { %10480 = vmatpush3.bf16.msra.mxu0 %v11667_v10 }
 0x1c1   : > { %10500 = vmatpush3.bf16.msra.mxu1 %v11668_v11  ;;  %10481 = vmatprep.subr.bf16.mxu0 %v12085_v25 }
 0x1c2   : > { %10501 = vmatprep.subr.bf16.mxu1 %v12085_v25 }
 0x1c4   : > { %10482 = vmatpush3.bf16.msra.mxu0 %v11669_v1 }
 0x1c5   : > { %10502 = vmatpush3.bf16.msra.mxu1 %v11670_v12  ;;  %10507 = vmatprep.subr.bf16.mxu0 %v12085_v25 }
 0x1c6   : > { %10527 = vmatprep.subr.bf16.mxu1 %v12085_v25 }
 0x1c7   : > { %v13181_v16 = vpop.f32.mrf.mxu0  ;;  %10484 = vmatmul.mubr.bf16.vlgmr.msra.gmra.mxu0 %v13170_v13 }
 0x1c8   : > { %v13187_v18 = vpop.f32.mrf.mxu1  ;;  %10504 = vmatmul.mubr.bf16.vlgmr.msra.gmra.mxu1 %v13170_v13  ;;  %10508 = vmatpush3.bf16.msra.mxu0 %v11672_v14  ;;  %v1919_v9 = vadd.f32 %v13181_v16, %v13135_v5 }
 0x1c9   : > { %10528 = vmatpush3.bf16.msra.mxu1 %v11673_v15  ;;  %v10245_v19 = vpop.f32.mrf.mxu0  ;;  %10509 = vmatprep.subr.bf16.mxu0 %v12085_v25  ;;  %v2027_v63 = vrot.slane %v13187_v18, 1  ;;  %v11708_v15 = vld [vmem:[%s15047_s1 + $0x130] sm:$0xff]  }
 0x1ca   : > { %v10265_v21 = vpop.f32.mrf.mxu1  ;;  %10529 = vmatprep.subr.bf16.mxu1 %v12085_v25  ;;  %10523 = vmatprep.mubr.msk.bf16.mxu0 %vm12086_vm0, %v12085_v25  ;;  %v11709_v19 = vld [vmem:[%s15047_s1 + $0xe8] sm:$0xff]  }
 0x1cb   : > { %v1916_v22 = vpop.f32.mrf.mxu0  ;;  %10543 = vmatprep.mubr.msk.bf16.mxu1 %vm12086_vm0, %v12085_v25 }
 0x1cc   : > { %v13202_v24 = vpop.f32.mrf.mxu1  ;;  %10510 = vmatpush3.bf16.msra.mxu0 %v11674_v17 }
 0x1cd   : > { %10530 = vmatpush3.bf16.msra.mxu1 %v11675_v20  ;;  %v10246_v26 = vpop.f32.mrf.mxu0  ;;  %10511 = vmatprep.subr.bf16.mxu0 %v12085_v25  ;;  %v2028_v0 = vrot.slane %v13202_v24, 1 }
 0x1ce   : > { %v10266_v28 = vpop.f32.mrf.mxu1  ;;  %10531 = vmatprep.subr.bf16.mxu1 %v12085_v25 }
 0x1cf   : > { %v2029_v8 = vsel %vm656_vm1, %v2027_v63, %v2028_v0  ;;  %v11727_v0 = vld [vmem:[%s15047_s1 + $0x1a8] sm:$0xff]  }
 0x1d0   : > { %10512 = vmatpush3.bf16.msra.mxu0 %v11676_v23  ;;  %v2031_v11 = vadd.f32 %v2029_v8, %v1919_v9  ;;  %v11730_v8 = vld [vmem:[%s15047_s1 + $0x158] sm:$0xff]  }
 0x1d1   : > { %10532 = vmatpush3.bf16.msra.mxu1 %v11677_v27  ;;  %10513 = vmatprep.subr.bf16.mxu0 %v12085_v25  ;;  %v11710_v27 = vld [vmem:[%s15047_s1 + $0x128] sm:$0xff]   ;;  %v11731_v9 = vld [vmem:[%s15047_s1 + $0x198] sm:$0xff]  }
 0x1d2   : > { %10533 = vmatprep.subr.bf16.mxu1 %v12085_v25 }
 0x1d4   : > { %10514 = vmatpush3.bf16.msra.mxu0 %v11678_v29 }
 0x1d5   : > { %10534 = vmatpush3.bf16.msra.mxu1 %v11679_v30  ;;  %10515 = vmatprep.subr.bf16.mxu0 %v12085_v25 }
 0x1d6   : > { %10535 = vmatprep.subr.bf16.mxu1 %v12085_v25 }
 0x1d8   : > { %10516 = vmatpush3.bf16.msra.mxu0 %v11680_v31  ;;  %v11711_v31 = vld [vmem:[%s15047_s1 + $0xe0] sm:$0xff]  }
 0x1d9   : > { %10536 = vmatpush3.bf16.msra.mxu1 %v11681_v32  ;;  %10517 = vmatprep.subr.bf16.mxu0 %v12085_v25  ;;  %v11712_v32 = vld [vmem:[%s15047_s1 + $0x120] sm:$0xff]  }
 0x1da   : > { %10537 = vmatprep.subr.bf16.mxu1 %v12085_v25 }
 0x1dc   : > { %10518 = vmatpush3.bf16.msra.mxu0 %v11682_v33 }
 0x1dd   : > { %10538 = vmatpush3.bf16.msra.mxu1 %v11683_v34  ;;  %10519 = vmatprep.subr.bf16.mxu0 %v12085_v25 }
 0x1de   : > { %10539 = vmatprep.subr.bf16.mxu1 %v12085_v25 }
 0x1e0   : > { %10520 = vmatpush3.bf16.msra.mxu0 %v11684_v35  ;;  %v11713_v35 = vld [vmem:[%s15047_s1 + $0xd8] sm:$0xff]  }
 0x1e1   : > { %10540 = vmatpush3.bf16.msra.mxu1 %v11685_v36  ;;  %10521 = vmatprep.subr.bf16.mxu0 %v12085_v25  ;;  %v13380_v36 = vld [vmem:[%s15048_s2] ss:$0 sm:$0xff] }
 0x1e2   : > { %10541 = vmatprep.subr.bf16.mxu1 %v12085_v25 }
 0x1e4   : > { %10522 = vmatpush3.bf16.msra.mxu0 %v11686_v37 }
 0x1e5   : > { %10542 = vmatpush3.bf16.msra.mxu1 %v11687_v38  ;;  %10547 = vmatprep.subr.bf16.mxu0 %v12085_v25  ;;  %v11714_v38 = vld [vmem:[%s15047_s1 + $0x118] sm:$0xff]  }
 0x1e6   : > { %10567 = vmatprep.subr.bf16.mxu1 %v12085_v25 }
 0x1e7   : > { %v13260_v42 = vpop.f32.mrf.mxu0  ;;  %10524 = vmatmul.mubr.bf16.vlgmr.msra.gmra.mxu0 %v13170_v13  ;;  %v11707_v13 = vld [vmem:[%s15047_s1 + $0xf0] sm:$0xff]  }
 0x1e8   : > { %v13266_v44 = vpop.f32.mrf.mxu1  ;;  %10544 = vmatmul.mubr.bf16.vlgmr.msra.gmra.mxu1 %v13250_v39  ;;  %10548 = vmatpush3.bf16.msra.mxu0 %v11689_v40  ;;  %v2139_v6 = vrot.slane %v13260_v42, 2 }
 0x1e9   : > { %10568 = vmatpush3.bf16.msra.mxu1 %v11690_v41  ;;  %v10285_v46 = vpop.f32.mrf.mxu0  ;;  %10549 = vmatprep.subr.bf16.mxu0 %v12085_v25  ;;  %v11715_v41 = vld [vmem:[%s15047_s1 + $0xd0] sm:$0xff]  }
 0x1ea   : > { %v10305_v47 = vpop.f32.mrf.mxu1  ;;  %10569 = vmatprep.subr.bf16.mxu1 %v12085_v25  ;;  %10563 = vmatprep.mubr.msk.bf16.mxu0 %vm12086_vm0, %v12085_v25  ;;  %v11718_v46 = vld [vmem:[%s15047_s1 + $0x108] sm:$0xff]  }
 0x1eb   : > { %v2133_v48 = vpop.f32.mrf.mxu0  ;;  %10583 = vmatprep.mubr.msk.bf16.mxu1 %vm12086_vm0, %v12085_v25  ;;  %v11719_v47 = vld [vmem:[%s15047_s1 + $0xc0] sm:$0xff]  }
 0x1ec   : > { %v2254_v50 = vpop.f32.mrf.mxu1  ;;  %10550 = vmatpush3.bf16.msra.mxu0 %v11691_v43  ;;  %v2140_v3 = vrot.slane %v2133_v48, 2  ;;  %v11716_v43 = vld [vmem:[%s15047_s1 + $0x110] sm:$0xff]   ;;  %v11720_v48 = vld [vmem:[%s15047_s1 + $0x100] sm:$0xff]  }
 0x1ed   : > { %10570 = vmatpush3.bf16.msra.mxu1 %v11692_v45  ;;  %v10286_v52 = vpop.f32.mrf.mxu0  ;;  %10551 = vmatprep.subr.bf16.mxu0 %v12085_v25  ;;  %v11717_v45 = vld [vmem:[%s15047_s1 + $0xc8] sm:$0xff]   ;;  %v11722_v50 = vld [vmem:[%s15047_s1 + $0x178] sm:$0xff]  }
 0x1ee   : > { %v10306_v53 = vpop.f32.mrf.mxu1  ;;  %10571 = vmatprep.subr.bf16.mxu1 %v12085_v25  ;;  %v2141_v10 = vsel %vm769_vm2, %v2139_v6, %v2140_v3 }
 0x1ef   : > { %v2143_v5 = vadd.f32 %v2141_v10, %v2031_v11  ;;  %v11724_v53 = vld [vmem:[%s15047_s1 + $0x170] sm:$0xff]  }
 0x1f0   : > { %10552 = vmatpush3.bf16.msra.mxu0 %v11693_v49  ;;  %v13419_v49 = vld [vmem:[%s12245_s5 + $0x58] sm:$0x1f]   ;;  %v11732_v10 = vld [vmem:[%s15047_s1 + $0x150] sm:$0xff]  }
 0x1f1   : > { %10572 = vmatpush3.bf16.msra.mxu1 %v11694_v51  ;;  %10553 = vmatprep.subr.bf16.mxu0 %v12085_v25  ;;  %v2257_v23 = vadd.f32 %v13266_v44, %v2143_v5  ;;  %v11723_v51 = vld [vmem:[%s15047_s1 + $0x1b8] sm:$0xff]   ;;  %v11733_v11 = vld [vmem:[%s15047_s1 + $0x190] sm:$0xff]   ;;  %v11737_v5 = vld [vmem:[%s15047_s1 + $0x180] sm:$0xff]  }
 0x1f2   : > { %10573 = vmatprep.subr.bf16.mxu1 %v12085_v25 }
 0x1f4   : > { %10554 = vmatpush3.bf16.msra.mxu0 %v11695_v54 }
 0x1f5   : > { %10574 = vmatpush3.bf16.msra.mxu1 %v11696_v55  ;;  %10555 = vmatprep.subr.bf16.mxu0 %v12085_v25 }
 0x1f6   : > { %10575 = vmatprep.subr.bf16.mxu1 %v12085_v25 }
 0x1f8   : > { %10556 = vmatpush3.bf16.msra.mxu0 %v11697_v56  ;;  %v11725_v56 = vld [vmem:[%s15047_s1 + $0x1b0] sm:$0xff]  }
 0x1f9   : > { %10576 = vmatpush3.bf16.msra.mxu1 %v11698_v57  ;;  %10557 = vmatprep.subr.bf16.mxu0 %v12085_v25 }
 0x1fa   : > { %10577 = vmatprep.subr.bf16.mxu1 %v12085_v25 }
 0x1fc   : > { %10558 = vmatpush3.bf16.msra.mxu0 %v11699_v58 }
 0x1fd   : > { %10578 = vmatpush3.bf16.msra.mxu1 %v11700_v59  ;;  %10559 = vmatprep.subr.bf16.mxu0 %v12085_v25 }
 0x1fe   : > { %10579 = vmatprep.subr.bf16.mxu1 %v12085_v25 }
 0x200   : > { %10560 = vmatpush3.bf16.msra.mxu0 %v11701_v60  ;;  %v11726_v60 = vld [vmem:[%s15047_s1 + $0x168] sm:$0xff]  }
 0x201   : > { %10580 = vmatpush3.bf16.msra.mxu1 %v11702_v61  ;;  %10561 = vmatprep.subr.bf16.mxu0 %v12085_v25 }
 0x202   : > { %10581 = vmatprep.subr.bf16.mxu1 %v12085_v25 }
 0x204   : > { %10562 = vmatpush3.bf16.msra.mxu0 %v11703_v62 }
 0x205   : > { %10582 = vmatpush3.bf16.msra.mxu1 %v11704_v2  ;;  %10587 = vmatprep.subr.bf16.mxu0 %v12085_v25 }
 0x206   : > { %10607 = vmatprep.subr.bf16.mxu1 %v12085_v25 }
 0x207   : > { %v2356_v1 = vpop.f32.mrf.mxu0  ;;  %10564 = vmatmul.mubr.bf16.vlgmr.msra.gmra.mxu0 %v13250_v39 }
 0x208   : > { %v2468_v12 = vpop.f32.mrf.mxu1  ;;  %10584 = vmatmul.mubr.bf16.vlgmr.msra.gmra.mxu1 %v13250_v39  ;;  %10588 = vmatpush3.bf16.msra.mxu0 %v11705_v4  ;;  %v2365_v17 = vrot.slane %v2356_v1, 1  ;;  %v13389_v39 = vld [vmem:[%s15049_s3] ss:$0 sm:$0xff]  ;;  %v11734_v1 = vld [vmem:[%s15047_s1 + $0x148] sm:$0xff]  }
 0x209   : > { %10608 = vmatpush3.bf16.msra.mxu1 %v11706_v7  ;;  %v10325_v14 = vpop.f32.mrf.mxu0  ;;  %10589 = vmatprep.subr.bf16.mxu0 %v12085_v25  ;;  %v2477_v20 = vrot.slane %v2468_v12, 2  ;;  %v11728_v4 = vld [vmem:[%s15047_s1 + $0x160] sm:$0xff]   ;;  %v11735_v12 = vld [vmem:[%s15047_s1 + $0x188] sm:$0xff]  }
 0x20a   : > { %v10345_v16 = vpop.f32.mrf.mxu1  ;;  %10609 = vmatprep.subr.bf16.mxu1 %v12085_v25  ;;  %10603 = vmatprep.mubr.msk.bf16.mxu0 %vm12086_vm0, %v12085_v25  ;;  %v11729_v7 = vld [vmem:[%s15047_s1 + $0x1a0] sm:$0xff]   ;;  %v13496_v14 = vld [vmem:[%s12245_s5 + $0x98] sm:$0x1f]  }
 0x20b   : > { %v2359_v18 = vpop.f32.mrf.mxu0  ;;  %10623 = vmatprep.mubr.msk.bf16.mxu1 %vm12086_vm0, %v12085_v25  ;;  %v11740_v16 = vld [vmem:[%s15047_s1 + $0x238] sm:$0xff]  }
 0x20c   : > { %v2366_v21 = vrot.slane %v2359_v18, 1  ;;  %v2471_v22 = vpop.f32.mrf.mxu1  ;;  %10590 = vmatpush3.bf16.msra.mxu0 %v11707_v13  ;;  %v11736_v13 = vld [vmem:[%s15047_s1 + $0x140] sm:$0xff]  }
 0x20d   : > { %v2478_v24 = vrot.slane %v2471_v22, 2  ;;  %10610 = vmatpush3.bf16.msra.mxu1 %v11708_v15  ;;  %v10326_v26 = vpop.f32.mrf.mxu0  ;;  %10591 = vmatprep.subr.bf16.mxu0 %v12085_v25  ;;  %v11739_v15 = vld [vmem:[%s15047_s1 + $0x1f8] sm:$0xff]  }
 0x20e   : > { %v2367_v28 = vsel %vm656_vm1, %v2365_v17, %v2366_v21  ;;  %v10346_v29 = vpop.f32.mrf.mxu1  ;;  %10611 = vmatprep.subr.bf16.mxu1 %v12085_v25  ;;  %v11742_v21 = vld [vmem:[%s15047_s1 + $0x230] sm:$0xff]  }
 0x20f   : > { %v2369_v30 = vadd.f32 %v2367_v28, %v2257_v23  ;;  %v2479_v33 = vsel %vm769_vm2, %v2477_v20, %v2478_v24  ;;  %v11743_v28 = vld [vmem:[%s15047_s1 + $0x1e8] sm:$0xff]  }
 0x210   : > { %10592 = vmatpush3.bf16.msra.mxu0 %v11709_v19  ;;  %v11741_v19 = vld [vmem:[%s15047_s1 + $0x1f0] sm:$0xff]  }
 0x211   : > { %v2481_v34 = vadd.f32 %v2479_v33, %v2369_v30  ;;  %10612 = vmatpush3.bf16.msra.mxu1 %v11710_v27  ;;  %10593 = vmatprep.subr.bf16.mxu0 %v12085_v25  ;;  %v11744_v30 = vld [vmem:[%s15047_s1 + $0x228] sm:$0xff]  }
 0x212   : > { %10613 = vmatprep.subr.bf16.mxu1 %v12085_v25 }
 0x213   : > { %v2482_v37 = vmul.f32 %v13380_v36, %v2481_v34  ;;  %v11745_v34 = vld [vmem:[%s15047_s1 + $0x1e0] sm:$0xff]  }
 0x214   : > { %10594 = vmatpush3.bf16.msra.mxu0 %v11711_v31 }
 0x215   : > { %v2483_v40 = vadd.f32 %v13389_v39, %v2482_v37  ;;  %10614 = vmatpush3.bf16.msra.mxu1 %v11712_v32  ;;  %10595 = vmatprep.subr.bf16.mxu0 %v12085_v25 }
 0x216   : > { %10615 = vmatprep.subr.bf16.mxu1 %v12085_v25 }
 0x217   : > { %v2484_v42 = vmax.f32 %v2483_v40, 0.0  ;;  %v11748_v40 = vld [vmem:[%s15047_s1 + $0x218] sm:$0xff]  }
 0x218   : > { %10596 = vmatpush3.bf16.msra.mxu0 %v11713_v35  ;;  %v11746_v35 = vld [vmem:[%s15047_s1 + $0x220] sm:$0xff]  }
 0x219   : > { %v2485_v44 = vpack.c.bf16 %v2484_v42, %v2484_v42  ;;  %10616 = vmatpush3.bf16.msra.mxu1 %v11714_v38  ;;  %10597 = vmatprep.subr.bf16.mxu0 %v12085_v25  ;;  %v11747_v38 = vld [vmem:[%s15047_s1 + $0x1d8] sm:$0xff]   ;;  %v11750_v42 = vld [vmem:[%s15047_s1 + $0x210] sm:$0xff]  }
 0x21a   : > { %10617 = vmatprep.subr.bf16.mxu1 %v12085_v25 }
 0x21b   : > { %8842 = vst [vmem:[%s13067_s30 + $0x4] sm:$0xf] %v2485_v44  ;;  %v11752_v44 = vld [vmem:[%s15047_s1 + $0x208] sm:$0xff]  }
 0x21c   : > { %10598 = vmatpush3.bf16.msra.mxu0 %v11715_v41  ;;  %v11749_v41 = vld [vmem:[%s15047_s1 + $0x1d0] sm:$0xff]  }
 0x21d   : > { %10618 = vmatpush3.bf16.msra.mxu1 %v11716_v43  ;;  %10599 = vmatprep.subr.bf16.mxu0 %v12085_v25  ;;  %v11751_v43 = vld [vmem:[%s15047_s1 + $0x1c8] sm:$0xff]  }
 0x21e   : > { %10619 = vmatprep.subr.bf16.mxu1 %v12085_v25 }
 0x220   : > { %10600 = vmatpush3.bf16.msra.mxu0 %v11717_v45  ;;  %v11753_v45 = vld [vmem:[%s15047_s1 + $0x1c0] sm:$0xff]  }
 0x221   : > { %10620 = vmatpush3.bf16.msra.mxu1 %v11718_v46  ;;  %10601 = vmatprep.subr.bf16.mxu0 %v12085_v25  ;;  %v11754_v46 = vld [vmem:[%s15047_s1 + $0x200] sm:$0xff]  }
 0x222   : > { %10621 = vmatprep.subr.bf16.mxu1 %v12085_v25 }
 0x224   : > { %10602 = vmatpush3.bf16.msra.mxu0 %v11719_v47  ;;  %v11755_v47 = vld [vmem:[%s15047_s1 + $0x38] sm:$0xff]  }
 0x225   : > { %10622 = vmatpush3.bf16.msra.mxu1 %v11720_v48  ;;  %10627 = vmatprep.subr.bf16.mxu0 %v12085_v25  ;;  %v11756_v48 = vld [vmem:[%s15047_s1 + $0x78] sm:$0xff]  }
 0x226   : > { %10647 = vmatprep.subr.bf16.mxu1 %v12085_v25 }
 0x227   : > { %v2595_v52 = vpop.f32.mrf.mxu0  ;;  %10604 = vmatmul.mubr.bf16.vlgmr.msra.gmra.mxu0 %v13419_v49 }
 0x228   : > { %v2700_v54 = vpop.f32.mrf.mxu1  ;;  %10624 = vmatmul.mubr.bf16.vlgmr.msra.gmra.mxu1 %v13419_v49  ;;  %10628 = vmatpush3.bf16.msra.mxu0 %v11722_v50 }
 0x229   : > { %10648 = vmatpush3.bf16.msra.mxu1 %v11723_v51  ;;  %v10365_v55 = vpop.f32.mrf.mxu0  ;;  %10629 = vmatprep.subr.bf16.mxu0 %v12085_v25  ;;  %v2709_v58 = vrot.slane %v2700_v54, 1  ;;  %v11757_v51 = vld [vmem:[%s15047_s1 + $0x30] sm:$0xff]  }
 0x22a   : > { %v10385_v57 = vpop.f32.mrf.mxu1  ;;  %10649 = vmatprep.subr.bf16.mxu1 %v12085_v25  ;;  %10643 = vmatprep.mubr.msk.bf16.mxu0 %vm12086_vm0, %v12085_v25 }
 0x22b   : > { %v2598_v59 = vpop.f32.mrf.mxu0  ;;  %10663 = vmatprep.mubr.msk.bf16.mxu1 %vm12086_vm0, %v12085_v25  ;;  %v11759_v57 = vld [vmem:[%s15047_s1 + $0x28] sm:$0xff]  }
 0x22c   : > { %v2703_v61 = vpop.f32.mrf.mxu1  ;;  %10630 = vmatpush3.bf16.msra.mxu0 %v11724_v53  ;;  %v11758_v53 = vld [vmem:[%s15047_s1 + $0x70] sm:$0xff]   ;;  %v11760_v59 = vld [vmem:[%s15047_s1 + $0x68] sm:$0xff]  }
 0x22d   : > { %v2710_v62 = vrot.slane %v2703_v61, 1  ;;  %10650 = vmatpush3.bf16.msra.mxu1 %v11725_v56  ;;  %v10366_v63 = vpop.f32.mrf.mxu0  ;;  %10631 = vmatprep.subr.bf16.mxu0 %v12085_v25  ;;  %v11761_v61 = vld [vmem:[%s15047_s1 + $0x20] sm:$0xff]  }
 0x22e   : > { %v10386_v2 = vpop.f32.mrf.mxu1  ;;  %10651 = vmatprep.subr.bf16.mxu1 %v12085_v25  ;;  %v11763_v63 = vld [vmem:[%s15047_s1 + $0x18] sm:$0xff]  }
 0x22f   : > { %v2711_v3 = vsel %vm656_vm1, %v2709_v58, %v2710_v62  ;;  %v11762_v62 = vld [vmem:[%s15047_s1 + $0x60] sm:$0xff]   ;;  %v11765_v2 = vld [vmem:[%s15047_s1 + $0x10] sm:$0xff]  }
 0x230   : > { %v13456_v6 = vadd.f32 %v2711_v3, %v2595_v52  ;;  %10632 = vmatpush3.bf16.msra.mxu0 %v11726_v60  ;;  %v11766_v3 = vld [vmem:[%s15047_s1 + $0x50] sm:$0xff]  }
 0x231   : > { %10652 = vmatpush3.bf16.msra.mxu1 %v11727_v0  ;;  %10633 = vmatprep.subr.bf16.mxu0 %v12085_v25  ;;  %v11764_v0 = vld [vmem:[%s15047_s1 + $0x58] sm:$0xff]  }
 0x232   : > { %10653 = vmatprep.subr.bf16.mxu1 %v12085_v25 }
 0x234   : > { %10634 = vmatpush3.bf16.msra.mxu0 %v11728_v4  ;;  %v11767_v4 = vld [vmem:[%s15047_s1 + $0x8] sm:$0xff]  }
 0x235   : > { %10654 = vmatpush3.bf16.msra.mxu1 %v11729_v7  ;;  %10635 = vmatprep.subr.bf16.mxu0 %v12085_v25  ;;  %v11769_v7 = vld [vmem:[%s15047_s1] sm:$0xff]  }
 0x236   : > { %10655 = vmatprep.subr.bf16.mxu1 %v12085_v25 }
 0x238   : > { %10636 = vmatpush3.bf16.msra.mxu0 %v11730_v8  ;;  %v11770_v8 = vld [vmem:[%s15047_s1 + $0x40] sm:$0xff]  }
 0x239   : > { %10656 = vmatpush3.bf16.msra.mxu1 %v11731_v9  ;;  %10637 = vmatprep.subr.bf16.mxu0 %v12085_v25  ;;  %v13651_v9 = vld [vmem:[%s12245_s5 + $0x20] sm:$0x1f]  }
 0x23a   : > { %10657 = vmatprep.subr.bf16.mxu1 %v12085_v25 }
 0x23c   : > { %10638 = vmatpush3.bf16.msra.mxu0 %v11732_v10  ;;  %v11772_v10 = vld [vmem:[%s15047_s1 + $0xb8] sm:$0xff]  }
 0x23d   : > { %10658 = vmatpush3.bf16.msra.mxu1 %v11733_v11  ;;  %10639 = vmatprep.subr.bf16.mxu0 %v12085_v25  ;;  %v11773_v11 = vld [vmem:[%s15047_s1 + $0xf8] sm:$0xff]  }
 0x23e   : > { %10659 = vmatprep.subr.bf16.mxu1 %v12085_v25 }
 0x240   : > { %10640 = vmatpush3.bf16.msra.mxu0 %v11734_v1 }
 0x241   : > { %10660 = vmatpush3.bf16.msra.mxu1 %v11735_v12  ;;  %10641 = vmatprep.subr.bf16.mxu0 %v12085_v25 }
 0x242   : > { %10661 = vmatprep.subr.bf16.mxu1 %v12085_v25 }
 0x244   : > { %10642 = vmatpush3.bf16.msra.mxu0 %v11736_v13  ;;  %v11774_v13 = vld [vmem:[%s15047_s1 + $0xb0] sm:$0xff]  }
 0x245   : > { %10662 = vmatpush3.bf16.msra.mxu1 %v11737_v5  ;;  %10667 = vmatprep.subr.bf16.mxu0 %v12085_v25 }
 0x246   : > { %10687 = vmatprep.subr.bf16.mxu1 %v12085_v25 }
 0x247   : > { %v2812_v17 = vpop.f32.mrf.mxu0  ;;  %10644 = vmatmul.mubr.bf16.vlgmr.msra.gmra.mxu0 %v13419_v49 }
 0x248   : > { %v2933_v18 = vpop.f32.mrf.mxu1  ;;  %10664 = vmatmul.mubr.bf16.vlgmr.msra.gmra.mxu1 %v13496_v14  ;;  %10668 = vmatpush3.bf16.msra.mxu0 %v11739_v15  ;;  %v2821_v24 = vrot.slane %v2812_v17, 2 }
 0x249   : > { %10688 = vmatpush3.bf16.msra.mxu1 %v11740_v16  ;;  %v10405_v20 = vpop.f32.mrf.mxu0  ;;  %10669 = vmatprep.subr.bf16.mxu0 %v12085_v25 }
 0x24a   : > { %v10425_v22 = vpop.f32.mrf.mxu1  ;;  %10689 = vmatprep.subr.bf16.mxu1 %v12085_v25  ;;  %10683 = vmatprep.mubr.msk.bf16.mxu0 %vm12086_vm0, %v12085_v25  ;;  %v11777_v20 = vld [vmem:[%s15047_s1 + $0xe8] sm:$0xff]  }
 0x24b   : > { %v2815_v23 = vpop.f32.mrf.mxu0  ;;  %10703 = vmatprep.mubr.msk.bf16.mxu1 %vm12086_vm0, %v12085_v25  ;;  %v11778_v22 = vld [vmem:[%s15047_s1 + $0xa0] sm:$0xff]  }
 0x24c   : > { %v2822_v26 = vrot.slane %v2815_v23, 2  ;;  %v2936_v27 = vpop.f32.mrf.mxu1  ;;  %10670 = vmatpush3.bf16.msra.mxu0 %v11741_v19  ;;  %v11779_v23 = vld [vmem:[%s15047_s1 + $0xe0] sm:$0xff]  }
 0x24d   : > { %10690 = vmatpush3.bf16.msra.mxu1 %v11742_v21  ;;  %v10406_v29 = vpop.f32.mrf.mxu0  ;;  %10671 = vmatprep.subr.bf16.mxu0 %v12085_v25  ;;  %v11782_v27 = vld [vmem:[%s15047_s1 + $0x90] sm:$0xff]  }
 0x24e   : > { %v2823_v31 = vsel %vm769_vm2, %v2821_v24, %v2822_v26  ;;  %v10426_v32 = vpop.f32.mrf.mxu1  ;;  %10691 = vmatprep.subr.bf16.mxu1 %v12085_v25  ;;  %v11780_v24 = vld [vmem:[%s15047_s1 + $0x98] sm:$0xff]   ;;  %v11784_v29 = vld [vmem:[%s15047_s1 + $0x88] sm:$0xff]  }
 0x24f   : > { %v2825_v33 = vadd.f32 %v2823_v31, %v13456_v6  ;;  %v11768_v6 = vld [vmem:[%s15047_s1 + $0x48] sm:$0xff]   ;;  %v11781_v26 = vld [vmem:[%s15047_s1 + $0xd8] sm:$0xff]  }
 0x250   : > { %10672 = vmatpush3.bf16.msra.mxu0 %v11743_v28  ;;  %v11783_v28 = vld [vmem:[%s15047_s1 + $0xd0] sm:$0xff]  }
 0x251   : > { %10692 = vmatpush3.bf16.msra.mxu1 %v11744_v30  ;;  %10673 = vmatprep.subr.bf16.mxu0 %v12085_v25  ;;  %v13537_v37 = vadd.f32 %v2933_v18, %v2825_v33  ;;  %v11776_v18 = vld [vmem:[%s15047_s1 + $0xa8] sm:$0xff]   ;;  %v11786_v33 = vld [vmem:[%s15047_s1 + $0x80] sm:$0xff]  }
 0x252   : > { %10693 = vmatprep.subr.bf16.mxu1 %v12085_v25  ;;  %v11785_v30 = vld [vmem:[%s15047_s1 + $0xc8] sm:$0xff]  }
 0x254   : > { %10674 = vmatpush3.bf16.msra.mxu0 %v11745_v34  ;;  %v11787_v34 = vld [vmem:[%s15047_s1 + $0xc0] sm:$0xff]  }
 0x255   : > { %10694 = vmatpush3.bf16.msra.mxu1 %v11746_v35  ;;  %10675 = vmatprep.subr.bf16.mxu0 %v12085_v25 }
 0x256   : > { %10695 = vmatprep.subr.bf16.mxu1 %v12085_v25 }
 0x258   : > { %10676 = vmatpush3.bf16.msra.mxu0 %v11747_v38 }
 0x259   : > { %10696 = vmatpush3.bf16.msra.mxu1 %v11748_v40  ;;  %10677 = vmatprep.subr.bf16.mxu0 %v12085_v25 }
 0x25a   : > { %10697 = vmatprep.subr.bf16.mxu1 %v12085_v25 }
 0x25c   : > { %10678 = vmatpush3.bf16.msra.mxu0 %v11749_v41  ;;  %v13735_v41 = vld [vmem:[%s12245_s5 + $0x60] sm:$0x1f]  }
 0x25d   : > { %10698 = vmatpush3.bf16.msra.mxu1 %v11750_v42  ;;  %10679 = vmatprep.subr.bf16.mxu0 %v12085_v25  ;;  %v11789_v42 = vld [vmem:[%s15047_s1 + $0x138] sm:$0xff]  }
 0x25e   : > { %10699 = vmatprep.subr.bf16.mxu1 %v12085_v25 }
 0x260   : > { %10680 = vmatpush3.bf16.msra.mxu0 %v11751_v43 }
 0x261   : > { %10700 = vmatpush3.bf16.msra.mxu1 %v11752_v44  ;;  %10681 = vmatprep.subr.bf16.mxu0 %v12085_v25  ;;  %v11790_v44 = vld [vmem:[%s15047_s1 + $0x178] sm:$0xff]  }
 0x262   : > { %10701 = vmatprep.subr.bf16.mxu1 %v12085_v25 }
 0x264   : > { %10682 = vmatpush3.bf16.msra.mxu0 %v11753_v45 }
 0x265   : > { %10702 = vmatpush3.bf16.msra.mxu1 %v11754_v46  ;;  %10707 = vmatprep.subr.bf16.mxu0 %v12085_v25 }
 0x266   : > { %10727 = vmatprep.subr.bf16.mxu1 %v12085_v25 }
 0x267   : > { %v13580_v49 = vpop.f32.mrf.mxu0  ;;  %10684 = vmatmul.mubr.bf16.vlgmr.msra.gmra.mxu0 %v13496_v14 }
 0x268   : > { %v13583_v50 = vpop.f32.mrf.mxu1  ;;  %10704 = vmatmul.mubr.bf16.vlgmr.msra.gmra.mxu1 %v13496_v14  ;;  %10708 = vmatpush3.bf16.msra.mxu0 %v11755_v47  ;;  %v11775_v14 = vld [vmem:[%s15047_s1 + $0xf0] sm:$0xff]   ;;  %v3047_v32 = vrot.slane %v13580_v49, 1 }
 0x269   : > { %10728 = vmatpush3.bf16.msra.mxu1 %v11756_v48  ;;  %v10445_v52 = vpop.f32.mrf.mxu0  ;;  %10709 = vmatprep.subr.bf16.mxu0 %v12085_v25  ;;  %v3159_v38 = vrot.slane %v13583_v50, 2 }
 0x26a   : > { %v10465_v54 = vpop.f32.mrf.mxu1  ;;  %10729 = vmatprep.subr.bf16.mxu1 %v12085_v25  ;;  %10723 = vmatprep.mubr.msk.bf16.mxu0 %vm12086_vm0, %v12085_v25  ;;  %v11792_v52 = vld [vmem:[%s15047_s1 + $0x170] sm:$0xff]  }
 0x26b   : > { %v13596_v55 = vpop.f32.mrf.mxu0  ;;  %10743 = vmatprep.mubr.msk.bf16.mxu1 %vm12086_vm0, %v12085_v25 }
 0x26c   : > { %v13600_v56 = vpop.f32.mrf.mxu1  ;;  %10710 = vmatpush3.bf16.msra.mxu0 %v11757_v51  ;;  %v3048_v31 = vrot.slane %v13596_v55, 1 }
 0x26d   : > { %10730 = vmatpush3.bf16.msra.mxu1 %v11758_v53  ;;  %v10446_v58 = vpop.f32.mrf.mxu0  ;;  %10711 = vmatprep.subr.bf16.mxu0 %v12085_v25  ;;  %v3160_v40 = vrot.slane %v13600_v56, 2 }
 0x26e   : > { %v10466_v60 = vpop.f32.mrf.mxu1  ;;  %10731 = vmatprep.subr.bf16.mxu1 %v12085_v25  ;;  %v3049_v35 = vsel %vm656_vm1, %v3047_v32, %v3048_v31  ;;  %v11810_v32 = vld [vmem:[%s15047_s1 + $0x1e8] sm:$0xff]  }
 0x26f   : > { %v3051_v43 = vadd.f32 %v3049_v35, %v13537_v37  ;;  %v3161_v48 = vsel %vm769_vm2, %v3159_v38, %v3160_v40  ;;  %v11791_v37 = vld [vmem:[%s15047_s1 + $0x130] sm:$0xff]   ;;  %v11793_v60 = vld [vmem:[%s15047_s1 + $0x128] sm:$0xff]   ;;  %v11811_v40 = vld [vmem:[%s15047_s1 + $0x1a0] sm:$0xff]  }
 0x270   : > { %10712 = vmatpush3.bf16.msra.mxu0 %v11759_v57 }
 0x271   : > { %10732 = vmatpush3.bf16.msra.mxu1 %v11760_v59  ;;  %10713 = vmatprep.subr.bf16.mxu0 %v12085_v25  ;;  %v3163_v50 = vadd.f32 %v3161_v48, %v3051_v43  ;;  %v11813_v43 = vld [vmem:[%s15047_s1 + $0x198] sm:$0xff]   ;;  %v11818_v48 = vld [vmem:[%s15047_s1 + $0x1c8] sm:$0xff]  }
 0x272   : > { %10733 = vmatprep.subr.bf16.mxu1 %v12085_v25 }
 0x274   : > { %10714 = vmatpush3.bf16.msra.mxu0 %v11761_v61 }
 0x275   : > { %10734 = vmatpush3.bf16.msra.mxu1 %v11762_v62  ;;  %10715 = vmatprep.subr.bf16.mxu0 %v12085_v25 }
 0x276   : > { %10735 = vmatprep.subr.bf16.mxu1 %v12085_v25 }
 0x278   : > { %10716 = vmatpush3.bf16.msra.mxu0 %v11763_v63  ;;  %v11794_v63 = vld [vmem:[%s15047_s1 + $0x168] sm:$0xff]  }
 0x279   : > { %10736 = vmatpush3.bf16.msra.mxu1 %v11764_v0  ;;  %10717 = vmatprep.subr.bf16.mxu0 %v12085_v25 }
 0x27a   : > { %10737 = vmatprep.subr.bf16.mxu1 %v12085_v25 }
 0x27c   : > { %10718 = vmatpush3.bf16.msra.mxu0 %v11765_v2 }
 0x27d   : > { %10738 = vmatpush3.bf16.msra.mxu1 %v11766_v3  ;;  %10719 = vmatprep.subr.bf16.mxu0 %v12085_v25 }
 0x27e   : > { %10739 = vmatprep.subr.bf16.mxu1 %v12085_v25 }
 0x280   : > { %10720 = vmatpush3.bf16.msra.mxu0 %v11767_v4  ;;  %v11795_v4 = vld [vmem:[%s15047_s1 + $0x120] sm:$0xff]  }
 0x281   : > { %10740 = vmatpush3.bf16.msra.mxu1 %v11768_v6  ;;  %10721 = vmatprep.subr.bf16.mxu0 %v12085_v25 }
 0x282   : > { %10741 = vmatprep.subr.bf16.mxu1 %v12085_v25 }
 0x284   : > { %10722 = vmatpush3.bf16.msra.mxu0 %v11769_v7  ;;  %v11796_v7 = vld [vmem:[%s15047_s1 + $0x160] sm:$0xff]  }
 0x285   : > { %10742 = vmatpush3.bf16.msra.mxu1 %v11770_v8  ;;  %10747 = vmatprep.subr.bf16.mxu0 %v12085_v25 }
 0x286   : > { %10767 = vmatprep.subr.bf16.mxu1 %v12085_v25 }
 0x287   : > { %v13661_v1 = vpop.f32.mrf.mxu0  ;;  %10724 = vmatmul.mubr.bf16.vlgmr.msra.gmra.mxu0 %v13651_v9 }
 0x288   : > { %v13664_v12 = vpop.f32.mrf.mxu1  ;;  %10744 = vmatmul.mubr.bf16.vlgmr.msra.gmra.mxu1 %v13651_v9  ;;  %10748 = vmatpush3.bf16.msra.mxu0 %v11772_v10  ;;  %v3277_v55 = vadd.f32 %v13661_v1, %v3163_v50  ;;  %v11800_v1 = vld [vmem:[%s15047_s1 + $0x150] sm:$0xff]   ;;  %v13895_v50 = vld [vmem:[%s12245_s5 + $0xa0] sm:$0x1f]  }
 0x289   : > { %10768 = vmatpush3.bf16.msra.mxu1 %v11773_v11  ;;  %v10485_v5 = vpop.f32.mrf.mxu0  ;;  %10749 = vmatprep.subr.bf16.mxu0 %v12085_v25  ;;  %v3385_v45 = vrot.slane %v13664_v12, 1  ;;  %v11801_v12 = vld [vmem:[%s15047_s1 + $0x108] sm:$0xff]  }
 0x28a   : > { %v10505_v15 = vpop.f32.mrf.mxu1  ;;  %10769 = vmatprep.subr.bf16.mxu1 %v12085_v25  ;;  %10763 = vmatprep.mubr.msk.bf16.mxu0 %vm12086_vm0, %v12085_v25  ;;  %v11803_v5 = vld [vmem:[%s15047_s1 + $0x100] sm:$0xff]  }
 0x28b   : > { %v3274_v16 = vpop.f32.mrf.mxu0  ;;  %10783 = vmatprep.mubr.msk.bf16.mxu1 %vm12086_vm0, %v12085_v25  ;;  %v11805_v15 = vld [vmem:[%s15047_s1 + $0x1b8] sm:$0xff]  }
 0x28c   : > { %v13679_v17 = vpop.f32.mrf.mxu1  ;;  %10750 = vmatpush3.bf16.msra.mxu0 %v11774_v13  ;;  %v11802_v13 = vld [vmem:[%s15047_s1 + $0x148] sm:$0xff]   ;;  %v11806_v16 = vld [vmem:[%s15047_s1 + $0x1f8] sm:$0xff]  }
 0x28d   : > { %10770 = vmatpush3.bf16.msra.mxu1 %v11775_v14  ;;  %v10486_v19 = vpop.f32.mrf.mxu0  ;;  %10751 = vmatprep.subr.bf16.mxu0 %v12085_v25  ;;  %v3386_v46 = vrot.slane %v13679_v17, 1  ;;  %v11804_v14 = vld [vmem:[%s15047_s1 + $0x140] sm:$0xff]  }
 0x28e   : > { %v10506_v21 = vpop.f32.mrf.mxu1  ;;  %10771 = vmatprep.subr.bf16.mxu1 %v12085_v25  ;;  %v11807_v19 = vld [vmem:[%s15047_s1 + $0x1b0] sm:$0xff]  }
 0x28f   : > { %v3387_v53 = vsel %vm656_vm1, %v3385_v45, %v3386_v46  ;;  %v11808_v21 = vld [vmem:[%s15047_s1 + $0x1f0] sm:$0xff]  }
 0x290   : > { %10752 = vmatpush3.bf16.msra.mxu0 %v11776_v18  ;;  %v3389_v61 = vadd.f32 %v3387_v53, %v3277_v55  ;;  %v11815_v45 = vld [vmem:[%s15047_s1 + $0x190] sm:$0xff]  }
 0x291   : > { %10772 = vmatpush3.bf16.msra.mxu1 %v11777_v20  ;;  %10753 = vmatprep.subr.bf16.mxu0 %v12085_v25  ;;  %v11816_v46 = vld [vmem:[%s15047_s1 + $0x1d0] sm:$0xff]  }
 0x292   : > { %10773 = vmatprep.subr.bf16.mxu1 %v12085_v25  ;;  %v11824_v55 = vld [vmem:[%s15047_s1 + $0x230] sm:$0xff]  }
 0x294   : > { %10754 = vmatpush3.bf16.msra.mxu0 %v11778_v22 }
 0x295   : > { %10774 = vmatpush3.bf16.msra.mxu1 %v11779_v23  ;;  %10755 = vmatprep.subr.bf16.mxu0 %v12085_v25 }
 0x296   : > { %10775 = vmatprep.subr.bf16.mxu1 %v12085_v25 }
 0x298   : > { %10756 = vmatpush3.bf16.msra.mxu0 %v11780_v24 }
 0x299   : > { %10776 = vmatpush3.bf16.msra.mxu1 %v11781_v26  ;;  %10757 = vmatprep.subr.bf16.mxu0 %v12085_v25 }
 0x29a   : > { %10777 = vmatprep.subr.bf16.mxu1 %v12085_v25 }
 0x29c   : > { %10758 = vmatpush3.bf16.msra.mxu0 %v11782_v27 }
 0x29d   : > { %10778 = vmatpush3.bf16.msra.mxu1 %v11783_v28  ;;  %10759 = vmatprep.subr.bf16.mxu0 %v12085_v25 }
 0x29e   : > { %10779 = vmatprep.subr.bf16.mxu1 %v12085_v25 }
 0x2a0   : > { %10760 = vmatpush3.bf16.msra.mxu0 %v11784_v29  ;;  %v11809_v29 = vld [vmem:[%s15047_s1 + $0x1a8] sm:$0xff]  }
 0x2a1   : > { %10780 = vmatpush3.bf16.msra.mxu1 %v11785_v30  ;;  %10761 = vmatprep.subr.bf16.mxu0 %v12085_v25 }
 0x2a2   : > { %10781 = vmatprep.subr.bf16.mxu1 %v12085_v25 }
 0x2a4   : > { %10762 = vmatpush3.bf16.msra.mxu0 %v11786_v33 }
 0x2a5   : > { %10782 = vmatpush3.bf16.msra.mxu1 %v11787_v34  ;;  %10787 = vmatprep.subr.bf16.mxu0 %v12085_v25 }
 0x2a6   : > { %10807 = vmatprep.subr.bf16.mxu1 %v12085_v25 }
 0x2a7   : > { %v3488_v47 = vpop.f32.mrf.mxu0  ;;  %10764 = vmatmul.mubr.bf16.vlgmr.msra.gmra.mxu0 %v13651_v9  ;;  %v11797_v9 = vld [vmem:[%s15047_s1 + $0x118] sm:$0xff]  }
 0x2a8   : > { %v13750_v49 = vpop.f32.mrf.mxu1  ;;  %10784 = vmatmul.mubr.bf16.vlgmr.msra.gmra.mxu1 %v13735_v41  ;;  %10788 = vmatpush3.bf16.msra.mxu0 %v11789_v42  ;;  %v3497_v57 = vrot.slane %v3488_v47, 2  ;;  %v11817_v47 = vld [vmem:[%s15047_s1 + $0x188] sm:$0xff]  }
 0x2a9   : > { %10808 = vmatpush3.bf16.msra.mxu1 %v11790_v44  ;;  %v10525_v51 = vpop.f32.mrf.mxu0  ;;  %10789 = vmatprep.subr.bf16.mxu0 %v12085_v25  ;;  %v11814_v44 = vld [vmem:[%s15047_s1 + $0x1d8] sm:$0xff]  }
 0x2aa   : > { %v10545_v54 = vpop.f32.mrf.mxu1  ;;  %10809 = vmatprep.subr.bf16.mxu1 %v12085_v25  ;;  %10803 = vmatprep.mubr.msk.bf16.mxu0 %vm12086_vm0, %v12085_v25  ;;  %v11822_v51 = vld [vmem:[%s15047_s1 + $0x238] sm:$0xff]  }
 0x2ab   : > { %v3491_v56 = vpop.f32.mrf.mxu0  ;;  %10823 = vmatprep.mubr.msk.bf16.mxu1 %vm12086_vm0, %v12085_v25 }
 0x2ac   : > { %v3498_v58 = vrot.slane %v3491_v56, 2  ;;  %v3618_v59 = vpop.f32.mrf.mxu1  ;;  %10790 = vmatpush3.bf16.msra.mxu0 %v11791_v37  ;;  %v11820_v37 = vld [vmem:[%s15047_s1 + $0x1c0] sm:$0xff]  }
 0x2ad   : > { %10810 = vmatpush3.bf16.msra.mxu1 %v11792_v52  ;;  %v10526_v62 = vpop.f32.mrf.mxu0  ;;  %10791 = vmatprep.subr.bf16.mxu0 %v12085_v25  ;;  %v11823_v52 = vld [vmem:[%s15047_s1 + $0x38] sm:$0xff]  }
 0x2ae   : > { %v3499_v0 = vsel %vm769_vm2, %v3497_v57, %v3498_v58  ;;  %v10546_v2 = vpop.f32.mrf.mxu1  ;;  %10811 = vmatprep.subr.bf16.mxu1 %v12085_v25  ;;  %v11825_v57 = vld [vmem:[%s15047_s1 + $0x30] sm:$0xff]  }
 0x2af   : > { %v3501_v3 = vadd.f32 %v3499_v0, %v3389_v61  ;;  %v11826_v61 = vld [vmem:[%s15047_s1 + $0x228] sm:$0xff]   ;;  %v11828_v2 = vld [vmem:[%s15047_s1 + $0x220] sm:$0xff]  }
 0x2b0   : > { %10792 = vmatpush3.bf16.msra.mxu0 %v11793_v60 }
 0x2b1   : > { %v3502_v6 = vmul.f32 %v13380_v36, %v3501_v3  ;;  %10812 = vmatpush3.bf16.msra.mxu1 %v11794_v63  ;;  %10793 = vmatprep.subr.bf16.mxu0 %v12085_v25  ;;  %v11798_v36 = vld [vmem:[%s15047_s1 + $0x158] sm:$0xff]   ;;  %v11827_v63 = vld [vmem:[%s15047_s1 + $0x28] sm:$0xff]   ;;  %v11829_v3 = vld [vmem:[%s15047_s1 + $0x20] sm:$0xff]  }
 0x2b2   : > { %10813 = vmatprep.subr.bf16.mxu1 %v12085_v25 }
 0x2b3   : > { %v3503_v8 = vadd.f32 %v13389_v39, %v3502_v6  ;;  %v11799_v39 = vld [vmem:[%s15047_s1 + $0x110] sm:$0xff]   ;;  %v11831_v6 = vld [vmem:[%s15047_s1 + $0x18] sm:$0xff]  }
 0x2b4   : > { %10794 = vmatpush3.bf16.msra.mxu0 %v11795_v4  ;;  %v11830_v4 = vld [vmem:[%s15047_s1 + $0x218] sm:$0xff]  }
 0x2b5   : > { %v3504_v10 = vmax.f32 %v3503_v8, 0.0  ;;  %10814 = vmatpush3.bf16.msra.mxu1 %v11796_v7  ;;  %10795 = vmatprep.subr.bf16.mxu0 %v12085_v25  ;;  %v11832_v7 = vld [vmem:[%s15047_s1 + $0x210] sm:$0xff]  }
 0x2b6   : > { %10815 = vmatprep.subr.bf16.mxu1 %v12085_v25  ;;  %v11833_v8 = vld [vmem:[%s15047_s1 + $0x10] sm:$0xff]  }
 0x2b7   : > { %v3505_v11 = vpack.c.bf16 %v3504_v10, %v3504_v10  ;;  %v11835_v10 = vld [vmem:[%s15047_s1 + $0x8] sm:$0xff]  }
 0x2b8   : > { %10796 = vmatpush3.bf16.msra.mxu0 %v11797_v9  ;;  %v11834_v9 = vld [vmem:[%s15047_s1 + $0x208] sm:$0xff]  }
 0x2b9   : > { %8924 = vst [vmem:[%s13067_s30 + $0x8] sm:$0xf] %v3505_v11  ;;  %10816 = vmatpush3.bf16.msra.mxu1 %v11798_v36  ;;  %10797 = vmatprep.subr.bf16.mxu0 %v12085_v25  ;;  %v11836_v36 = vld [vmem:[%s15047_s1 + $0x200] sm:$0xff]  }
 0x2ba   : > { %10817 = vmatprep.subr.bf16.mxu1 %v12085_v25  ;;  %v11837_v11 = vld [vmem:[%s15047_s1] sm:$0xff]  }
 0x2bc   : > { %10798 = vmatpush3.bf16.msra.mxu0 %v11799_v39  ;;  %v13974_v39 = vld [vmem:[%s12245_s5 + $0x28] sm:$0x1f]  }
 0x2bd   : > { %10818 = vmatpush3.bf16.msra.mxu1 %v11800_v1  ;;  %10799 = vmatprep.subr.bf16.mxu0 %v12085_v25  ;;  %v11839_v1 = vld [vmem:[%s15047_s1 + $0x78] sm:$0xff]  }
 0x2be   : > { %10819 = vmatprep.subr.bf16.mxu1 %v12085_v25 }
 0x2c0   : > { %10800 = vmatpush3.bf16.msra.mxu0 %v11801_v12  ;;  %v11840_v12 = vld [vmem:[%s15047_s1 + $0xb8] sm:$0xff]  }
 0x2c1   : > { %10820 = vmatpush3.bf16.msra.mxu1 %v11802_v13  ;;  %10801 = vmatprep.subr.bf16.mxu0 %v12085_v25 }
 0x2c2   : > { %10821 = vmatprep.subr.bf16.mxu1 %v12085_v25 }
 0x2c4   : > { %10802 = vmatpush3.bf16.msra.mxu0 %v11803_v5 }
 0x2c5   : > { %10822 = vmatpush3.bf16.msra.mxu1 %v11804_v14  ;;  %10827 = vmatprep.subr.bf16.mxu0 %v12085_v25  ;;  %v11841_v14 = vld [vmem:[%s15047_s1 + $0x70] sm:$0xff]  }
 0x2c6   : > { %10847 = vmatprep.subr.bf16.mxu1 %v12085_v25 }
 0x2c7   : > { %v3720_v17 = vpop.f32.mrf.mxu0  ;;  %10804 = vmatmul.mubr.bf16.vlgmr.msra.gmra.mxu0 %v13735_v41 }
 0x2c8   : > { %v3832_v18 = vpop.f32.mrf.mxu1  ;;  %10824 = vmatmul.mubr.bf16.vlgmr.msra.gmra.mxu1 %v13735_v41  ;;  %10828 = vmatpush3.bf16.msra.mxu0 %v11805_v15  ;;  %v3729_v26 = vrot.slane %v3720_v17, 1  ;;  %v11812_v41 = vld [vmem:[%s15047_s1 + $0x1e0] sm:$0xff]  }
 0x2c9   : > { %10848 = vmatpush3.bf16.msra.mxu1 %v11806_v16  ;;  %v10565_v20 = vpop.f32.mrf.mxu0  ;;  %10829 = vmatprep.subr.bf16.mxu0 %v12085_v25  ;;  %v3841_v23 = vrot.slane %v3832_v18, 2  ;;  %v11842_v16 = vld [vmem:[%s15047_s1 + $0xb0] sm:$0xff]  }
 0x2ca   : > { %v10585_v22 = vpop.f32.mrf.mxu1  ;;  %10849 = vmatprep.subr.bf16.mxu1 %v12085_v25  ;;  %10843 = vmatprep.mubr.msk.bf16.mxu0 %vm12086_vm0, %v12085_v25  ;;  %v11843_v20 = vld [vmem:[%s15047_s1 + $0x68] sm:$0xff]  }
 0x2cb   : > { %v3723_v24 = vpop.f32.mrf.mxu0  ;;  %10863 = vmatprep.mubr.msk.bf16.mxu1 %vm12086_vm0, %v12085_v25  ;;  %v11844_v22 = vld [vmem:[%s15047_s1 + $0xa8] sm:$0xff]  }
 0x2cc   : > { %v3730_v27 = vrot.slane %v3723_v24, 1  ;;  %v3835_v28 = vpop.f32.mrf.mxu1  ;;  %10830 = vmatpush3.bf16.msra.mxu0 %v11807_v19  ;;  %v11845_v24 = vld [vmem:[%s15047_s1 + $0x60] sm:$0xff]  }
 0x2cd   : > { %v3842_v30 = vrot.slane %v3835_v28, 2  ;;  %10850 = vmatpush3.bf16.msra.mxu1 %v11808_v21  ;;  %v10566_v31 = vpop.f32.mrf.mxu0  ;;  %10831 = vmatprep.subr.bf16.mxu0 %v12085_v25  ;;  %v11848_v28 = vld [vmem:[%s15047_s1 + $0x98] sm:$0xff]  }
 0x2ce   : > { %v3731_v33 = vsel %vm656_vm1, %v3729_v26, %v3730_v27  ;;  %v10586_v34 = vpop.f32.mrf.mxu1  ;;  %10851 = vmatprep.subr.bf16.mxu1 %v12085_v25  ;;  %v11846_v26 = vld [vmem:[%s15047_s1 + $0xa0] sm:$0xff]   ;;  %v11847_v27 = vld [vmem:[%s15047_s1 + $0x58] sm:$0xff]   ;;  %v11851_v31 = vld [vmem:[%s15047_s1 + $0x48] sm:$0xff]  }
 0x2cf   : > { %v3733_v35 = vadd.f32 %v3731_v33, %v13750_v49  ;;  %v3843_v38 = vsel %vm769_vm2, %v3841_v23, %v3842_v30  ;;  %v11819_v49 = vld [vmem:[%s15047_s1 + $0x180] sm:$0xff]   ;;  %v11850_v30 = vld [vmem:[%s15047_s1 + $0x90] sm:$0xff]  }
 0x2d0   : > { %10832 = vmatpush3.bf16.msra.mxu0 %v11809_v29  ;;  %v11849_v29 = vld [vmem:[%s15047_s1 + $0x50] sm:$0xff]  }
 0x2d1   : > { %10852 = vmatpush3.bf16.msra.mxu1 %v11810_v32  ;;  %10833 = vmatprep.subr.bf16.mxu0 %v12085_v25  ;;  %v13859_v42 = vadd.f32 %v3843_v38, %v3733_v35  ;;  %v11852_v32 = vld [vmem:[%s15047_s1 + $0x88] sm:$0xff]   ;;  %v11853_v35 = vld [vmem:[%s15047_s1 + $0x40] sm:$0xff]  }
 0x2d2   : > { %10853 = vmatprep.subr.bf16.mxu1 %v12085_v25  ;;  %v11854_v38 = vld [vmem:[%s15047_s1 + $0x80] sm:$0xff]  }
 0x2d4   : > { %10834 = vmatpush3.bf16.msra.mxu0 %v11811_v40 }
 0x2d5   : > { %10854 = vmatpush3.bf16.msra.mxu1 %v11812_v41  ;;  %10835 = vmatprep.subr.bf16.mxu0 %v12085_v25 }
 0x2d6   : > { %10855 = vmatprep.subr.bf16.mxu1 %v12085_v25 }
 0x2d8   : > { %10836 = vmatpush3.bf16.msra.mxu0 %v11813_v43 }
 0x2d9   : > { %10856 = vmatpush3.bf16.msra.mxu1 %v11814_v44  ;;  %10837 = vmatprep.subr.bf16.mxu0 %v12085_v25  ;;  %v11855_v44 = vld [vmem:[%s15047_s1 + $0xf8] sm:$0xff]  }
 0x2da   : > { %10857 = vmatprep.subr.bf16.mxu1 %v12085_v25 }
 0x2dc   : > { %10838 = vmatpush3.bf16.msra.mxu0 %v11815_v45 }
 0x2dd   : > { %10858 = vmatpush3.bf16.msra.mxu1 %v11816_v46  ;;  %10839 = vmatprep.subr.bf16.mxu0 %v12085_v25  ;;  %v11856_v46 = vld [vmem:[%s15047_s1 + $0x138] sm:$0xff]  }
 0x2de   : > { %10859 = vmatprep.subr.bf16.mxu1 %v12085_v25 }
 0x2e0   : > { %10840 = vmatpush3.bf16.msra.mxu0 %v11817_v47 }
 0x2e1   : > { %10860 = vmatpush3.bf16.msra.mxu1 %v11818_v48  ;;  %10841 = vmatprep.subr.bf16.mxu0 %v12085_v25 }
 0x2e2   : > { %10861 = vmatprep.subr.bf16.mxu1 %v12085_v25 }
 0x2e4   : > { %10842 = vmatpush3.bf16.msra.mxu0 %v11819_v49 }
 0x2e5   : > { %10862 = vmatpush3.bf16.msra.mxu1 %v11820_v37  ;;  %10867 = vmatprep.subr.bf16.mxu0 %v12085_v25 }
 0x2e6   : > { %10887 = vmatprep.subr.bf16.mxu1 %v12085_v25 }
 0x2e7   : > { %v13905_v53 = vpop.f32.mrf.mxu0  ;;  %10844 = vmatmul.mubr.bf16.vlgmr.msra.gmra.mxu0 %v13895_v50 }
 0x2e8   : > { %v13908_v54 = vpop.f32.mrf.mxu1  ;;  %10864 = vmatmul.mubr.bf16.vlgmr.msra.gmra.mxu1 %v13895_v50  ;;  %10868 = vmatpush3.bf16.msra.mxu0 %v11822_v51  ;;  %v3959_v45 = vadd.f32 %v13905_v53, %v13859_v42  ;;  %v11857_v42 = vld [vmem:[%s15047_s1 + $0xf0] sm:$0xff]  }
 0x2e9   : > { %10888 = vmatpush3.bf16.msra.mxu1 %v11823_v52  ;;  %v10605_v56 = vpop.f32.mrf.mxu0  ;;  %10869 = vmatprep.subr.bf16.mxu0 %v12085_v25  ;;  %v4067_v33 = vrot.slane %v13908_v54, 1  ;;  %v11858_v52 = vld [vmem:[%s15047_s1 + $0x130] sm:$0xff]  }
 0x2ea   : > { %v10625_v58 = vpop.f32.mrf.mxu1  ;;  %10889 = vmatprep.subr.bf16.mxu1 %v12085_v25  ;;  %10883 = vmatprep.mubr.msk.bf16.mxu0 %vm12086_vm0, %v12085_v25 }
 0x2eb   : > { %v3956_v59 = vpop.f32.mrf.mxu0  ;;  %10903 = vmatprep.mubr.msk.bf16.mxu1 %vm12086_vm0, %v12085_v25 }
 0x2ec   : > { %v13923_v60 = vpop.f32.mrf.mxu1  ;;  %10870 = vmatpush3.bf16.msra.mxu0 %v11824_v55  ;;  %v11859_v59 = vld [vmem:[%s15047_s1 + $0xe8] sm:$0xff]  }
 0x2ed   : > { %10890 = vmatpush3.bf16.msra.mxu1 %v11825_v57  ;;  %v10606_v62 = vpop.f32.mrf.mxu0  ;;  %10871 = vmatprep.subr.bf16.mxu0 %v12085_v25  ;;  %v4068_v34 = vrot.slane %v13923_v60, 1 }
 0x2ee   : > { %v10626_v0 = vpop.f32.mrf.mxu1  ;;  %10891 = vmatprep.subr.bf16.mxu1 %v12085_v25 }
 0x2ef   : > { %v4069_v41 = vsel %vm656_vm1, %v4067_v33, %v4068_v34 }
 0x2f0   : > { %10872 = vmatpush3.bf16.msra.mxu0 %v11826_v61  ;;  %v4071_v48 = vadd.f32 %v4069_v41, %v3959_v45  ;;  %v11880_v45 = vld [vmem:[%s15047_s1 + $0x158] sm:$0xff]  }
 0x2f1   : > { %10892 = vmatpush3.bf16.msra.mxu1 %v11827_v63  ;;  %10873 = vmatprep.subr.bf16.mxu0 %v12085_v25  ;;  %v11860_v63 = vld [vmem:[%s15047_s1 + $0x128] sm:$0xff]  }
 0x2f2   : > { %10893 = vmatprep.subr.bf16.mxu1 %v12085_v25 }
 0x2f4   : > { %10874 = vmatpush3.bf16.msra.mxu0 %v11828_v2 }
 0x2f5   : > { %10894 = vmatpush3.bf16.msra.mxu1 %v11829_v3  ;;  %10875 = vmatprep.subr.bf16.mxu0 %v12085_v25 }
 0x2f6   : > { %10895 = vmatprep.subr.bf16.mxu1 %v12085_v25 }
 0x2f8   : > { %10876 = vmatpush3.bf16.msra.mxu0 %v11830_v4 }
 0x2f9   : > { %10896 = vmatpush3.bf16.msra.mxu1 %v11831_v6  ;;  %10877 = vmatprep.subr.bf16.mxu0 %v12085_v25  ;;  %v11861_v6 = vld [vmem:[%s15047_s1 + $0xe0] sm:$0xff]  }
 0x2fa   : > { %10897 = vmatprep.subr.bf16.mxu1 %v12085_v25 }
 0x2fc   : > { %10878 = vmatpush3.bf16.msra.mxu0 %v11832_v7 }
 0x2fd   : > { %10898 = vmatpush3.bf16.msra.mxu1 %v11833_v8  ;;  %10879 = vmatprep.subr.bf16.mxu0 %v12085_v25  ;;  %v11862_v8 = vld [vmem:[%s15047_s1 + $0x120] sm:$0xff]  }
 0x2fe   : > { %10899 = vmatprep.subr.bf16.mxu1 %v12085_v25 }
 0x300   : > { %10880 = vmatpush3.bf16.msra.mxu0 %v11834_v9  ;;  %v14101_v9 = vld [vmem:[%s15048_s2] ss:$0 sm:$0xff] }
 0x301   : > { %10900 = vmatpush3.bf16.msra.mxu1 %v11835_v10  ;;  %10881 = vmatprep.subr.bf16.mxu0 %v12085_v25 }
 0x302   : > { %10901 = vmatprep.subr.bf16.mxu1 %v12085_v25 }
 0x304   : > { %10882 = vmatpush3.bf16.msra.mxu0 %v11836_v36  ;;  %v11863_v36 = vld [vmem:[%s15047_s1 + $0xd8] sm:$0xff]  }
 0x305   : > { %10902 = vmatpush3.bf16.msra.mxu1 %v11837_v11  ;;  %10907 = vmatprep.subr.bf16.mxu0 %v12085_v25  ;;  %v14110_v11 = vld [vmem:[%s15049_s3] ss:$0 sm:$0xff] }
 0x306   : > { %10927 = vmatprep.subr.bf16.mxu1 %v12085_v25 }
 0x307   : > { %v13984_v13 = vpop.f32.mrf.mxu0  ;;  %10884 = vmatmul.mubr.bf16.vlgmr.msra.gmra.mxu0 %v13895_v50 }
 0x308   : > { %v13987_v5 = vpop.f32.mrf.mxu1  ;;  %10904 = vmatmul.mubr.bf16.vlgmr.msra.gmra.mxu1 %v13974_v39  ;;  %10908 = vmatpush3.bf16.msra.mxu0 %v11839_v1  ;;  %v4179_v43 = vrot.slane %v13984_v13, 2  ;;  %v11864_v1 = vld [vmem:[%s15047_s1 + $0x118] sm:$0xff]   ;;  %v11865_v13 = vld [vmem:[%s15047_s1 + $0xd0] sm:$0xff]  }
 0x309   : > { %10928 = vmatpush3.bf16.msra.mxu1 %v11840_v12  ;;  %v10645_v15 = vpop.f32.mrf.mxu0  ;;  %10909 = vmatprep.subr.bf16.mxu0 %v12085_v25 }
 0x30a   : > { %v10665_v17 = vpop.f32.mrf.mxu1  ;;  %10929 = vmatprep.subr.bf16.mxu1 %v12085_v25  ;;  %10923 = vmatprep.mubr.msk.bf16.mxu0 %vm12086_vm0, %v12085_v25  ;;  %v11867_v15 = vld [vmem:[%s15047_s1 + $0xc8] sm:$0xff]  }
 0x30b   : > { %v4173_v18 = vpop.f32.mrf.mxu0  ;;  %10943 = vmatprep.mubr.msk.bf16.mxu1 %vm12086_vm0, %v12085_v25  ;;  %v11869_v17 = vld [vmem:[%s15047_s1 + $0xc0] sm:$0xff]  }
 0x30c   : > { %v4294_v19 = vpop.f32.mrf.mxu1  ;;  %10910 = vmatpush3.bf16.msra.mxu0 %v11841_v14  ;;  %v4180_v40 = vrot.slane %v4173_v18, 2  ;;  %v11866_v14 = vld [vmem:[%s15047_s1 + $0x110] sm:$0xff]   ;;  %v11870_v18 = vld [vmem:[%s15047_s1 + $0x100] sm:$0xff]  }
 0x30d   : > { %10930 = vmatpush3.bf16.msra.mxu1 %v11842_v16  ;;  %v10646_v21 = vpop.f32.mrf.mxu0  ;;  %10911 = vmatprep.subr.bf16.mxu0 %v12085_v25  ;;  %v11868_v16 = vld [vmem:[%s15047_s1 + $0x108] sm:$0xff]  }
 0x30e   : > { %v10666_v23 = vpop.f32.mrf.mxu1  ;;  %10931 = vmatprep.subr.bf16.mxu1 %v12085_v25  ;;  %v4181_v47 = vsel %vm769_vm2, %v4179_v43, %v4180_v40  ;;  %v14144_v19 = vld [vmem:[%s12245_s5 + $0x68] sm:$0x1f]   ;;  %v11873_v21 = vld [vmem:[%s15047_s1 + $0x1b8] sm:$0xff]   ;;  %v11878_v43 = vld [vmem:[%s15047_s1 + $0x160] sm:$0xff]  }
 0x30f   : > { %v4183_v50 = vadd.f32 %v4181_v47, %v4071_v48  ;;  %v11882_v47 = vld [vmem:[%s15047_s1 + $0x150] sm:$0xff]  }
 0x310   : > { %10912 = vmatpush3.bf16.msra.mxu0 %v11843_v20  ;;  %v11872_v20 = vld [vmem:[%s15047_s1 + $0x178] sm:$0xff]   ;;  %v11883_v48 = vld [vmem:[%s15047_s1 + $0x190] sm:$0xff]  }
 0x311   : > { %10932 = vmatpush3.bf16.msra.mxu1 %v11844_v22  ;;  %10913 = vmatprep.subr.bf16.mxu0 %v12085_v25  ;;  %v4297_v60 = vadd.f32 %v13987_v5, %v4183_v50  ;;  %v11887_v50 = vld [vmem:[%s15047_s1 + $0x180] sm:$0xff]  }
 0x312   : > { %10933 = vmatprep.subr.bf16.mxu1 %v12085_v25 }
 0x314   : > { %10914 = vmatpush3.bf16.msra.mxu0 %v11845_v24  ;;  %v11874_v24 = vld [vmem:[%s15047_s1 + $0x170] sm:$0xff]  }
 0x315   : > { %10934 = vmatpush3.bf16.msra.mxu1 %v11846_v26  ;;  %10915 = vmatprep.subr.bf16.mxu0 %v12085_v25 }
 0x316   : > { %10935 = vmatprep.subr.bf16.mxu1 %v12085_v25 }
 0x318   : > { %10916 = vmatpush3.bf16.msra.mxu0 %v11847_v27  ;;  %v11875_v27 = vld [vmem:[%s15047_s1 + $0x1b0] sm:$0xff]  }
 0x319   : > { %10936 = vmatpush3.bf16.msra.mxu1 %v11848_v28  ;;  %10917 = vmatprep.subr.bf16.mxu0 %v12085_v25 }
 0x31a   : > { %10937 = vmatprep.subr.bf16.mxu1 %v12085_v25 }
 0x31c   : > { %10918 = vmatpush3.bf16.msra.mxu0 %v11849_v29 }
 0x31d   : > { %10938 = vmatpush3.bf16.msra.mxu1 %v11850_v30  ;;  %10919 = vmatprep.subr.bf16.mxu0 %v12085_v25 }
 0x31e   : > { %10939 = vmatprep.subr.bf16.mxu1 %v12085_v25 }
 0x320   : > { %10920 = vmatpush3.bf16.msra.mxu0 %v11851_v31 }
 0x321   : > { %10940 = vmatpush3.bf16.msra.mxu1 %v11852_v32  ;;  %10921 = vmatprep.subr.bf16.mxu0 %v12085_v25  ;;  %v11876_v32 = vld [vmem:[%s15047_s1 + $0x168] sm:$0xff]  }
 0x322   : > { %10941 = vmatprep.subr.bf16.mxu1 %v12085_v25 }
 0x324   : > { %10922 = vmatpush3.bf16.msra.mxu0 %v11853_v35  ;;  %v11877_v35 = vld [vmem:[%s15047_s1 + $0x1a8] sm:$0xff]  }
 0x325   : > { %10942 = vmatpush3.bf16.msra.mxu1 %v11854_v38  ;;  %10947 = vmatprep.subr.bf16.mxu0 %v12085_v25 }
 0x326   : > { %10967 = vmatprep.subr.bf16.mxu1 %v12085_v25 }
 0x327   : > { %v4396_v49 = vpop.f32.mrf.mxu0  ;;  %10924 = vmatmul.mubr.bf16.vlgmr.msra.gmra.mxu0 %v13974_v39 }
 0x328   : > { %v4508_v37 = vpop.f32.mrf.mxu1  ;;  %10944 = vmatmul.mubr.bf16.vlgmr.msra.gmra.mxu1 %v13974_v39  ;;  %10948 = vmatpush3.bf16.msra.mxu0 %v11855_v44  ;;  %v4405_v55 = vrot.slane %v4396_v49, 1  ;;  %v11879_v44 = vld [vmem:[%s15047_s1 + $0x1a0] sm:$0xff]   ;;  %v11884_v49 = vld [vmem:[%s15047_s1 + $0x148] sm:$0xff]  }
 0x329   : > { %10968 = vmatpush3.bf16.msra.mxu1 %v11856_v46  ;;  %v10685_v51 = vpop.f32.mrf.mxu0  ;;  %10949 = vmatprep.subr.bf16.mxu0 %v12085_v25  ;;  %v4517_v56 = vrot.slane %v4508_v37, 2  ;;  %v11881_v46 = vld [vmem:[%s15047_s1 + $0x198] sm:$0xff]   ;;  %v11885_v37 = vld [vmem:[%s15047_s1 + $0x188] sm:$0xff]  }
 0x32a   : > { %v10705_v53 = vpop.f32.mrf.mxu1  ;;  %10969 = vmatprep.subr.bf16.mxu1 %v12085_v25  ;;  %10963 = vmatprep.mubr.msk.bf16.mxu0 %vm12086_vm0, %v12085_v25  ;;  %v14220_v51 = vld [vmem:[%s12245_s5 + $0xa8] sm:$0x1f]  }
 0x32b   : > { %v4399_v54 = vpop.f32.mrf.mxu0  ;;  %10983 = vmatprep.mubr.msk.bf16.mxu1 %vm12086_vm0, %v12085_v25  ;;  %v11890_v53 = vld [vmem:[%s15047_s1 + $0x238] sm:$0xff]  }
 0x32c   : > { %v4406_v57 = vrot.slane %v4399_v54, 1  ;;  %v4511_v58 = vpop.f32.mrf.mxu1  ;;  %10950 = vmatpush3.bf16.msra.mxu0 %v11857_v42  ;;  %v11886_v42 = vld [vmem:[%s15047_s1 + $0x140] sm:$0xff]  }
 0x32d   : > { %v4518_v61 = vrot.slane %v4511_v58, 2  ;;  %10970 = vmatpush3.bf16.msra.mxu1 %v11858_v52  ;;  %v10686_v62 = vpop.f32.mrf.mxu0  ;;  %10951 = vmatprep.subr.bf16.mxu0 %v12085_v25  ;;  %v11889_v52 = vld [vmem:[%s15047_s1 + $0x1f8] sm:$0xff]   ;;  %v11892_v58 = vld [vmem:[%s15047_s1 + $0x230] sm:$0xff]  }
 0x32e   : > { %v4407_v0 = vsel %vm656_vm1, %v4405_v55, %v4406_v57  ;;  %v10706_v2 = vpop.f32.mrf.mxu1  ;;  %10971 = vmatprep.subr.bf16.mxu1 %v12085_v25 }
 0x32f   : > { %v4409_v3 = vadd.f32 %v4407_v0, %v4297_v60  ;;  %v4519_v4 = vsel %vm769_vm2, %v4517_v56, %v4518_v61  ;;  %v11891_v56 = vld [vmem:[%s15047_s1 + $0x1f0] sm:$0xff]   ;;  %v11893_v0 = vld [vmem:[%s15047_s1 + $0x1e8] sm:$0xff]  }
 0x330   : > { %10952 = vmatpush3.bf16.msra.mxu0 %v11859_v59 }
 0x331   : > { %v4521_v7 = vadd.f32 %v4519_v4, %v4409_v3  ;;  %10972 = vmatpush3.bf16.msra.mxu1 %v11860_v63  ;;  %10953 = vmatprep.subr.bf16.mxu0 %v12085_v25  ;;  %v11894_v3 = vld [vmem:[%s15047_s1 + $0x228] sm:$0xff]  }
 0x332   : > { %10973 = vmatprep.subr.bf16.mxu1 %v12085_v25 }
 0x333   : > { %v4522_v10 = vmul.f32 %v14101_v9, %v4521_v7 }
 0x334   : > { %10954 = vmatpush3.bf16.msra.mxu0 %v11861_v6 }
 0x335   : > { %v4523_v39 = vadd.f32 %v14110_v11, %v4522_v10  ;;  %10974 = vmatpush3.bf16.msra.mxu1 %v11862_v8  ;;  %10955 = vmatprep.subr.bf16.mxu0 %v12085_v25  ;;  %v11895_v8 = vld [vmem:[%s15047_s1 + $0x1e0] sm:$0xff]  }
 0x336   : > { %10975 = vmatprep.subr.bf16.mxu1 %v12085_v25  ;;  %v11896_v10 = vld [vmem:[%s15047_s1 + $0x220] sm:$0xff]  }
 0x337   : > { %v4524_v12 = vmax.f32 %v4523_v39, 0.0  ;;  %v11897_v39 = vld [vmem:[%s15047_s1 + $0x1d8] sm:$0xff]  }
 0x338   : > { %10956 = vmatpush3.bf16.msra.mxu0 %v11863_v36 }
 0x339   : > { %v4525_v5 = vpack.c.bf16 %v4524_v12, %v4524_v12  ;;  %10976 = vmatpush3.bf16.msra.mxu1 %v11864_v1  ;;  %10957 = vmatprep.subr.bf16.mxu0 %v12085_v25  ;;  %v11898_v1 = vld [vmem:[%s15047_s1 + $0x218] sm:$0xff]   ;;  %v11899_v12 = vld [vmem:[%s15047_s1 + $0x1d0] sm:$0xff]  }
 0x33a   : > { %10977 = vmatprep.subr.bf16.mxu1 %v12085_v25 }
 0x33b   : > { %9006 = vst [vmem:[%s13067_s30 + $0xc] sm:$0xf] %v4525_v5  ;;  %v11901_v5 = vld [vmem:[%s15047_s1 + $0x1c8] sm:$0xff]  }
 0x33c   : > { %10958 = vmatpush3.bf16.msra.mxu0 %v11865_v13  ;;  %v11900_v13 = vld [vmem:[%s15047_s1 + $0x210] sm:$0xff]  }
 0x33d   : > { %10978 = vmatpush3.bf16.msra.mxu1 %v11866_v14  ;;  %10959 = vmatprep.subr.bf16.mxu0 %v12085_v25  ;;  %v11902_v14 = vld [vmem:[%s15047_s1 + $0x208] sm:$0xff]  }
 0x33e   : > { %10979 = vmatprep.subr.bf16.mxu1 %v12085_v25 }
 0x340   : > { %10960 = vmatpush3.bf16.msra.mxu0 %v11867_v15  ;;  %v11903_v15 = vld [vmem:[%s15047_s1 + $0x1c0] sm:$0xff]  }
 0x341   : > { %10980 = vmatpush3.bf16.msra.mxu1 %v11868_v16  ;;  %10961 = vmatprep.subr.bf16.mxu0 %v12085_v25  ;;  %v11904_v16 = vld [vmem:[%s15047_s1 + $0x200] sm:$0xff]  }
 0x342   : > { %10981 = vmatprep.subr.bf16.mxu1 %v12085_v25 }
 0x344   : > { %10962 = vmatpush3.bf16.msra.mxu0 %v11869_v17  ;;  %v11905_v17 = vld [vmem:[%s15047_s1 + $0x38] sm:$0xff]  }
 0x345   : > { %10982 = vmatpush3.bf16.msra.mxu1 %v11870_v18  ;;  %10987 = vmatprep.subr.bf16.mxu0 %v12085_v25  ;;  %v11906_v18 = vld [vmem:[%s15047_s1 + $0x78] sm:$0xff]  }
 0x346   : > { %11007 = vmatprep.subr.bf16.mxu1 %v12085_v25 }
 0x347   : > { %v4635_v22 = vpop.f32.mrf.mxu0  ;;  %10964 = vmatmul.mubr.bf16.vlgmr.msra.gmra.mxu0 %v14144_v19 }
 0x348   : > { %v4740_v23 = vpop.f32.mrf.mxu1  ;;  %10984 = vmatmul.mubr.bf16.vlgmr.msra.gmra.mxu1 %v14144_v19  ;;  %10988 = vmatpush3.bf16.msra.mxu0 %v11872_v20 }
 0x349   : > { %11008 = vmatpush3.bf16.msra.mxu1 %v11873_v21  ;;  %v10725_v26 = vpop.f32.mrf.mxu0  ;;  %10989 = vmatprep.subr.bf16.mxu0 %v12085_v25  ;;  %v4749_v29 = vrot.slane %v4740_v23, 1  ;;  %v11907_v21 = vld [vmem:[%s15047_s1 + $0x30] sm:$0xff]  }
 0x34a   : > { %v10745_v28 = vpop.f32.mrf.mxu1  ;;  %11009 = vmatprep.subr.bf16.mxu1 %v12085_v25  ;;  %11003 = vmatprep.mubr.msk.bf16.mxu0 %vm12086_vm0, %v12085_v25  ;;  %v11908_v23 = vld [vmem:[%s15047_s1 + $0x70] sm:$0xff]  }
 0x34b   : > { %v4638_v30 = vpop.f32.mrf.mxu0  ;;  %11023 = vmatprep.mubr.msk.bf16.mxu1 %vm12086_vm0, %v12085_v25  ;;  %v11909_v28 = vld [vmem:[%s15047_s1 + $0x28] sm:$0xff]  }
 0x34c   : > { %v4743_v31 = vpop.f32.mrf.mxu1  ;;  %10990 = vmatpush3.bf16.msra.mxu0 %v11874_v24  ;;  %v11910_v30 = vld [vmem:[%s15047_s1 + $0x68] sm:$0xff]  }
 0x34d   : > { %v4750_v33 = vrot.slane %v4743_v31, 1  ;;  %11010 = vmatpush3.bf16.msra.mxu1 %v11875_v27  ;;  %v10726_v34 = vpop.f32.mrf.mxu0  ;;  %10991 = vmatprep.subr.bf16.mxu0 %v12085_v25 }
 0x34e   : > { %v10746_v38 = vpop.f32.mrf.mxu1  ;;  %11011 = vmatprep.subr.bf16.mxu1 %v12085_v25  ;;  %v11913_v34 = vld [vmem:[%s15047_s1 + $0x18] sm:$0xff]  }
 0x34f   : > { %v4751_v40 = vsel %vm656_vm1, %v4749_v29, %v4750_v33  ;;  %v11912_v33 = vld [vmem:[%s15047_s1 + $0x60] sm:$0xff]   ;;  %v11915_v38 = vld [vmem:[%s15047_s1 + $0x10] sm:$0xff]  }
 0x350   : > { %v14177_v41 = vadd.f32 %v4751_v40, %v4635_v22  ;;  %10992 = vmatpush3.bf16.msra.mxu0 %v11876_v32  ;;  %v11911_v32 = vld [vmem:[%s15047_s1 + $0x20] sm:$0xff]   ;;  %v11916_v40 = vld [vmem:[%s15047_s1 + $0x50] sm:$0xff]  }
 0x351   : > { %11012 = vmatpush3.bf16.msra.mxu1 %v11877_v35  ;;  %10993 = vmatprep.subr.bf16.mxu0 %v12085_v25  ;;  %v11914_v35 = vld [vmem:[%s15047_s1 + $0x58] sm:$0xff]  }
 0x352   : > { %11013 = vmatprep.subr.bf16.mxu1 %v12085_v25 }
 0x354   : > { %10994 = vmatpush3.bf16.msra.mxu0 %v11878_v43  ;;  %v11918_v43 = vld [vmem:[%s15047_s1 + $0x48] sm:$0xff]  }
 0x355   : > { %11014 = vmatpush3.bf16.msra.mxu1 %v11879_v44  ;;  %10995 = vmatprep.subr.bf16.mxu0 %v12085_v25  ;;  %v11919_v44 = vld [vmem:[%s15047_s1] sm:$0xff]  }
 0x356   : > { %11015 = vmatprep.subr.bf16.mxu1 %v12085_v25 }
 0x358   : > { %10996 = vmatpush3.bf16.msra.mxu0 %v11880_v45  ;;  %v11920_v45 = vld [vmem:[%s15047_s1 + $0x40] sm:$0xff]  }
 0x359   : > { %11016 = vmatpush3.bf16.msra.mxu1 %v11881_v46  ;;  %10997 = vmatprep.subr.bf16.mxu0 %v12085_v25  ;;  %v14375_v46 = vld [vmem:[%s12245_s5 + $0x30] sm:$0x1f]  }
 0x35a   : > { %11017 = vmatprep.subr.bf16.mxu1 %v12085_v25 }
 0x35c   : > { %10998 = vmatpush3.bf16.msra.mxu0 %v11882_v47  ;;  %v11922_v47 = vld [vmem:[%s15047_s1 + $0xb8] sm:$0xff]  }
 0x35d   : > { %11018 = vmatpush3.bf16.msra.mxu1 %v11883_v48  ;;  %10999 = vmatprep.subr.bf16.mxu0 %v12085_v25  ;;  %v11923_v48 = vld [vmem:[%s15047_s1 + $0xf8] sm:$0xff]  }
 0x35e   : > { %11019 = vmatprep.subr.bf16.mxu1 %v12085_v25 }
 0x360   : > { %11000 = vmatpush3.bf16.msra.mxu0 %v11884_v49 }
 0x361   : > { %11020 = vmatpush3.bf16.msra.mxu1 %v11885_v37  ;;  %11001 = vmatprep.subr.bf16.mxu0 %v12085_v25 }
 0x362   : > { %11021 = vmatprep.subr.bf16.mxu1 %v12085_v25 }
 0x364   : > { %11002 = vmatpush3.bf16.msra.mxu0 %v11886_v42  ;;  %v11924_v42 = vld [vmem:[%s15047_s1 + $0xb0] sm:$0xff]  }
 0x365   : > { %11022 = vmatpush3.bf16.msra.mxu1 %v11887_v50  ;;  %11027 = vmatprep.subr.bf16.mxu0 %v12085_v25 }
 0x366   : > { %11047 = vmatprep.subr.bf16.mxu1 %v12085_v25 }
 0x367   : > { %v4852_v54 = vpop.f32.mrf.mxu0  ;;  %11004 = vmatmul.mubr.bf16.vlgmr.msra.gmra.mxu0 %v14144_v19 }
 0x368   : > { %v4973_v55 = vpop.f32.mrf.mxu1  ;;  %11024 = vmatmul.mubr.bf16.vlgmr.msra.gmra.mxu1 %v14220_v51  ;;  %11028 = vmatpush3.bf16.msra.mxu0 %v11889_v52  ;;  %v4861_v61 = vrot.slane %v4852_v54, 2 }
 0x369   : > { %11048 = vmatpush3.bf16.msra.mxu1 %v11890_v53  ;;  %v10765_v57 = vpop.f32.mrf.mxu0  ;;  %11029 = vmatprep.subr.bf16.mxu0 %v12085_v25 }
 0x36a   : > { %v10785_v59 = vpop.f32.mrf.mxu1  ;;  %11049 = vmatprep.subr.bf16.mxu1 %v12085_v25  ;;  %11043 = vmatprep.mubr.msk.bf16.mxu0 %vm12086_vm0, %v12085_v25  ;;  %v11927_v57 = vld [vmem:[%s15047_s1 + $0xe8] sm:$0xff]  }
 0x36b   : > { %v4855_v60 = vpop.f32.mrf.mxu0  ;;  %11063 = vmatprep.mubr.msk.bf16.mxu1 %vm12086_vm0, %v12085_v25  ;;  %v11928_v59 = vld [vmem:[%s15047_s1 + $0xa0] sm:$0xff]  }
 0x36c   : > { %v4862_v62 = vrot.slane %v4855_v60, 2  ;;  %v4976_v63 = vpop.f32.mrf.mxu1  ;;  %11030 = vmatpush3.bf16.msra.mxu0 %v11891_v56  ;;  %v11929_v60 = vld [vmem:[%s15047_s1 + $0xe0] sm:$0xff]  }
 0x36d   : > { %11050 = vmatpush3.bf16.msra.mxu1 %v11892_v58  ;;  %v10766_v2 = vpop.f32.mrf.mxu0  ;;  %11031 = vmatprep.subr.bf16.mxu0 %v12085_v25  ;;  %v11932_v63 = vld [vmem:[%s15047_s1 + $0x90] sm:$0xff]  }
 0x36e   : > { %v4863_v4 = vsel %vm769_vm2, %v4861_v61, %v4862_v62  ;;  %v10786_v6 = vpop.f32.mrf.mxu1  ;;  %11051 = vmatprep.subr.bf16.mxu1 %v12085_v25  ;;  %v11930_v61 = vld [vmem:[%s15047_s1 + $0x98] sm:$0xff]   ;;  %v11934_v2 = vld [vmem:[%s15047_s1 + $0x88] sm:$0xff]  }
 0x36f   : > { %v4865_v7 = vadd.f32 %v4863_v4, %v14177_v41  ;;  %v11917_v41 = vld [vmem:[%s15047_s1 + $0x8] sm:$0xff]   ;;  %v11931_v62 = vld [vmem:[%s15047_s1 + $0xd8] sm:$0xff]  }
 0x370   : > { %11032 = vmatpush3.bf16.msra.mxu0 %v11893_v0  ;;  %v11933_v0 = vld [vmem:[%s15047_s1 + $0xd0] sm:$0xff]  }
 0x371   : > { %11052 = vmatpush3.bf16.msra.mxu1 %v11894_v3  ;;  %11033 = vmatprep.subr.bf16.mxu0 %v12085_v25  ;;  %v14261_v36 = vadd.f32 %v4973_v55, %v4865_v7  ;;  %v11926_v55 = vld [vmem:[%s15047_s1 + $0xa8] sm:$0xff]   ;;  %v11936_v7 = vld [vmem:[%s15047_s1 + $0x80] sm:$0xff]  }
 0x372   : > { %11053 = vmatprep.subr.bf16.mxu1 %v12085_v25  ;;  %v11935_v3 = vld [vmem:[%s15047_s1 + $0xc8] sm:$0xff]  }
 0x374   : > { %11034 = vmatpush3.bf16.msra.mxu0 %v11895_v8  ;;  %v11937_v8 = vld [vmem:[%s15047_s1 + $0xc0] sm:$0xff]  }
 0x375   : > { %11054 = vmatpush3.bf16.msra.mxu1 %v11896_v10  ;;  %11035 = vmatprep.subr.bf16.mxu0 %v12085_v25 }
 0x376   : > { %11055 = vmatprep.subr.bf16.mxu1 %v12085_v25 }
 0x378   : > { %11036 = vmatpush3.bf16.msra.mxu0 %v11897_v39 }
 0x379   : > { %11056 = vmatpush3.bf16.msra.mxu1 %v11898_v1  ;;  %11037 = vmatprep.subr.bf16.mxu0 %v12085_v25 }
 0x37a   : > { %11057 = vmatprep.subr.bf16.mxu1 %v12085_v25 }
 0x37c   : > { %11038 = vmatpush3.bf16.msra.mxu0 %v11899_v12  ;;  %v14459_v12 = vld [vmem:[%s12245_s5 + $0x70] sm:$0x1f]  }
 0x37d   : > { %11058 = vmatpush3.bf16.msra.mxu1 %v11900_v13  ;;  %11039 = vmatprep.subr.bf16.mxu0 %v12085_v25  ;;  %v11939_v13 = vld [vmem:[%s15047_s1 + $0x138] sm:$0xff]  }
 0x37e   : > { %11059 = vmatprep.subr.bf16.mxu1 %v12085_v25 }
 0x380   : > { %11040 = vmatpush3.bf16.msra.mxu0 %v11901_v5 }
 0x381   : > { %11060 = vmatpush3.bf16.msra.mxu1 %v11902_v14  ;;  %11041 = vmatprep.subr.bf16.mxu0 %v12085_v25  ;;  %v11940_v14 = vld [vmem:[%s15047_s1 + $0x178] sm:$0xff]  }
 0x382   : > { %11061 = vmatprep.subr.bf16.mxu1 %v12085_v25 }
 0x384   : > { %11042 = vmatpush3.bf16.msra.mxu0 %v11903_v15 }
 0x385   : > { %11062 = vmatpush3.bf16.msra.mxu1 %v11904_v16  ;;  %11067 = vmatprep.subr.bf16.mxu0 %v12085_v25 }
 0x386   : > { %11087 = vmatprep.subr.bf16.mxu1 %v12085_v25 }
 0x387   : > { %v14304_v19 = vpop.f32.mrf.mxu0  ;;  %11044 = vmatmul.mubr.bf16.vlgmr.msra.gmra.mxu0 %v14220_v51 }
 0x388   : > { %v14307_v20 = vpop.f32.mrf.mxu1  ;;  %11064 = vmatmul.mubr.bf16.vlgmr.msra.gmra.mxu1 %v14220_v51  ;;  %11068 = vmatpush3.bf16.msra.mxu0 %v11905_v17  ;;  %v11925_v51 = vld [vmem:[%s15047_s1 + $0xf0] sm:$0xff]   ;;  %v5087_v6 = vrot.slane %v14304_v19, 1 }
 0x389   : > { %11088 = vmatpush3.bf16.msra.mxu1 %v11906_v18  ;;  %v10805_v22 = vpop.f32.mrf.mxu0  ;;  %11069 = vmatprep.subr.bf16.mxu0 %v12085_v25  ;;  %v5199_v39 = vrot.slane %v14307_v20, 2 }
 0x38a   : > { %v10825_v24 = vpop.f32.mrf.mxu1  ;;  %11089 = vmatprep.subr.bf16.mxu1 %v12085_v25  ;;  %11083 = vmatprep.mubr.msk.bf16.mxu0 %vm12086_vm0, %v12085_v25  ;;  %v11942_v22 = vld [vmem:[%s15047_s1 + $0x170] sm:$0xff]  }
 0x38b   : > { %v14320_v26 = vpop.f32.mrf.mxu0  ;;  %11103 = vmatprep.mubr.msk.bf16.mxu1 %vm12086_vm0, %v12085_v25 }
 0x38c   : > { %v14324_v27 = vpop.f32.mrf.mxu1  ;;  %11070 = vmatpush3.bf16.msra.mxu0 %v11907_v21  ;;  %v5088_v4 = vrot.slane %v14320_v26, 1 }
 0x38d   : > { %11090 = vmatpush3.bf16.msra.mxu1 %v11908_v23  ;;  %v10806_v29 = vpop.f32.mrf.mxu0  ;;  %11071 = vmatprep.subr.bf16.mxu0 %v12085_v25  ;;  %v5200_v1 = vrot.slane %v14324_v27, 2 }
 0x38e   : > { %v10826_v31 = vpop.f32.mrf.mxu1  ;;  %11091 = vmatprep.subr.bf16.mxu1 %v12085_v25  ;;  %v5089_v10 = vsel %vm656_vm1, %v5087_v6, %v5088_v4  ;;  %v11960_v6 = vld [vmem:[%s15047_s1 + $0x1e8] sm:$0xff]  }
 0x38f   : > { %v5091_v5 = vadd.f32 %v5089_v10, %v14261_v36  ;;  %v5201_v18 = vsel %vm769_vm2, %v5199_v39, %v5200_v1  ;;  %v11941_v36 = vld [vmem:[%s15047_s1 + $0x130] sm:$0xff]   ;;  %v11943_v31 = vld [vmem:[%s15047_s1 + $0x128] sm:$0xff]   ;;  %v11961_v1 = vld [vmem:[%s15047_s1 + $0x1a0] sm:$0xff]  }
 0x390   : > { %11072 = vmatpush3.bf16.msra.mxu0 %v11909_v28 }
 0x391   : > { %11092 = vmatpush3.bf16.msra.mxu1 %v11910_v30  ;;  %11073 = vmatprep.subr.bf16.mxu0 %v12085_v25  ;;  %v5203_v20 = vadd.f32 %v5201_v18, %v5091_v5  ;;  %v11963_v5 = vld [vmem:[%s15047_s1 + $0x198] sm:$0xff]   ;;  %v11968_v18 = vld [vmem:[%s15047_s1 + $0x1c8] sm:$0xff]  }
 0x392   : > { %11093 = vmatprep.subr.bf16.mxu1 %v12085_v25 }
 0x394   : > { %11074 = vmatpush3.bf16.msra.mxu0 %v11911_v32 }
 0x395   : > { %11094 = vmatpush3.bf16.msra.mxu1 %v11912_v33  ;;  %11075 = vmatprep.subr.bf16.mxu0 %v12085_v25 }
 0x396   : > { %11095 = vmatprep.subr.bf16.mxu1 %v12085_v25 }
 0x398   : > { %11076 = vmatpush3.bf16.msra.mxu0 %v11913_v34  ;;  %v11944_v34 = vld [vmem:[%s15047_s1 + $0x168] sm:$0xff]  }
 0x399   : > { %11096 = vmatpush3.bf16.msra.mxu1 %v11914_v35  ;;  %11077 = vmatprep.subr.bf16.mxu0 %v12085_v25 }
 0x39a   : > { %11097 = vmatprep.subr.bf16.mxu1 %v12085_v25 }
 0x39c   : > { %11078 = vmatpush3.bf16.msra.mxu0 %v11915_v38 }
 0x39d   : > { %11098 = vmatpush3.bf16.msra.mxu1 %v11916_v40  ;;  %11079 = vmatprep.subr.bf16.mxu0 %v12085_v25 }
 0x39e   : > { %11099 = vmatprep.subr.bf16.mxu1 %v12085_v25 }
 0x3a0   : > { %11080 = vmatpush3.bf16.msra.mxu0 %v11917_v41  ;;  %v11945_v41 = vld [vmem:[%s15047_s1 + $0x120] sm:$0xff]  }
 0x3a1   : > { %11100 = vmatpush3.bf16.msra.mxu1 %v11918_v43  ;;  %11081 = vmatprep.subr.bf16.mxu0 %v12085_v25 }
 0x3a2   : > { %11101 = vmatprep.subr.bf16.mxu1 %v12085_v25 }
 0x3a4   : > { %11082 = vmatpush3.bf16.msra.mxu0 %v11919_v44  ;;  %v11946_v44 = vld [vmem:[%s15047_s1 + $0x160] sm:$0xff]  }
 0x3a5   : > { %11102 = vmatpush3.bf16.msra.mxu1 %v11920_v45  ;;  %11107 = vmatprep.subr.bf16.mxu0 %v12085_v25 }
 0x3a6   : > { %11127 = vmatprep.subr.bf16.mxu1 %v12085_v25 }
 0x3a7   : > { %v14385_v49 = vpop.f32.mrf.mxu0  ;;  %11084 = vmatmul.mubr.bf16.vlgmr.msra.gmra.mxu0 %v14375_v46 }
 0x3a8   : > { %v14388_v37 = vpop.f32.mrf.mxu1  ;;  %11104 = vmatmul.mubr.bf16.vlgmr.msra.gmra.mxu1 %v14375_v46  ;;  %11108 = vmatpush3.bf16.msra.mxu0 %v11922_v47  ;;  %v5317_v26 = vadd.f32 %v14385_v49, %v5203_v20  ;;  %v11950_v49 = vld [vmem:[%s15047_s1 + $0x150] sm:$0xff]  }
 0x3a9   : > { %11128 = vmatpush3.bf16.msra.mxu1 %v11923_v48  ;;  %v10845_v50 = vpop.f32.mrf.mxu0  ;;  %11109 = vmatprep.subr.bf16.mxu0 %v12085_v25  ;;  %v5425_v15 = vrot.slane %v14388_v37, 1  ;;  %v11951_v37 = vld [vmem:[%s15047_s1 + $0x108] sm:$0xff]   ;;  %v14619_v20 = vld [vmem:[%s12245_s5 + $0xb0] sm:$0x1f]  }
 0x3aa   : > { %v10865_v52 = vpop.f32.mrf.mxu1  ;;  %11129 = vmatprep.subr.bf16.mxu1 %v12085_v25  ;;  %11123 = vmatprep.mubr.msk.bf16.mxu0 %vm12086_vm0, %v12085_v25  ;;  %v11953_v50 = vld [vmem:[%s15047_s1 + $0x100] sm:$0xff]  }
 0x3ab   : > { %v5314_v53 = vpop.f32.mrf.mxu0  ;;  %11143 = vmatprep.mubr.msk.bf16.mxu1 %vm12086_vm0, %v12085_v25  ;;  %v11955_v52 = vld [vmem:[%s15047_s1 + $0x1b8] sm:$0xff]  }
 0x3ac   : > { %v14403_v54 = vpop.f32.mrf.mxu1  ;;  %11110 = vmatpush3.bf16.msra.mxu0 %v11924_v42  ;;  %v11952_v42 = vld [vmem:[%s15047_s1 + $0x148] sm:$0xff]   ;;  %v11956_v53 = vld [vmem:[%s15047_s1 + $0x1f8] sm:$0xff]  }
 0x3ad   : > { %11130 = vmatpush3.bf16.msra.mxu1 %v11925_v51  ;;  %v10846_v56 = vpop.f32.mrf.mxu0  ;;  %11111 = vmatprep.subr.bf16.mxu0 %v12085_v25  ;;  %v5426_v16 = vrot.slane %v14403_v54, 1  ;;  %v11954_v51 = vld [vmem:[%s15047_s1 + $0x140] sm:$0xff]  }
 0x3ae   : > { %v10866_v58 = vpop.f32.mrf.mxu1  ;;  %11131 = vmatprep.subr.bf16.mxu1 %v12085_v25  ;;  %v11957_v56 = vld [vmem:[%s15047_s1 + $0x1b0] sm:$0xff]  }
 0x3af   : > { %v5427_v23 = vsel %vm656_vm1, %v5425_v15, %v5426_v16  ;;  %v11958_v58 = vld [vmem:[%s15047_s1 + $0x1f0] sm:$0xff]  }
 0x3b0   : > { %11112 = vmatpush3.bf16.msra.mxu0 %v11926_v55  ;;  %v5429_v32 = vadd.f32 %v5427_v23, %v5317_v26  ;;  %v11965_v15 = vld [vmem:[%s15047_s1 + $0x190] sm:$0xff]  }
 0x3b1   : > { %11132 = vmatpush3.bf16.msra.mxu1 %v11927_v57  ;;  %11113 = vmatprep.subr.bf16.mxu0 %v12085_v25  ;;  %v11966_v16 = vld [vmem:[%s15047_s1 + $0x1d0] sm:$0xff]  }
 0x3b2   : > { %11133 = vmatprep.subr.bf16.mxu1 %v12085_v25  ;;  %v11974_v26 = vld [vmem:[%s15047_s1 + $0x230] sm:$0xff]  }
 0x3b4   : > { %11114 = vmatpush3.bf16.msra.mxu0 %v11928_v59 }
 0x3b5   : > { %11134 = vmatpush3.bf16.msra.mxu1 %v11929_v60  ;;  %11115 = vmatprep.subr.bf16.mxu0 %v12085_v25 }
 0x3b6   : > { %11135 = vmatprep.subr.bf16.mxu1 %v12085_v25 }
 0x3b8   : > { %11116 = vmatpush3.bf16.msra.mxu0 %v11930_v61 }
 0x3b9   : > { %11136 = vmatpush3.bf16.msra.mxu1 %v11931_v62  ;;  %11117 = vmatprep.subr.bf16.mxu0 %v12085_v25 }
 0x3ba   : > { %11137 = vmatprep.subr.bf16.mxu1 %v12085_v25 }
 0x3bc   : > { %11118 = vmatpush3.bf16.msra.mxu0 %v11932_v63 }
 0x3bd   : > { %11138 = vmatpush3.bf16.msra.mxu1 %v11933_v0  ;;  %11119 = vmatprep.subr.bf16.mxu0 %v12085_v25 }
 0x3be   : > { %11139 = vmatprep.subr.bf16.mxu1 %v12085_v25 }
 0x3c0   : > { %11120 = vmatpush3.bf16.msra.mxu0 %v11934_v2  ;;  %v11959_v2 = vld [vmem:[%s15047_s1 + $0x1a8] sm:$0xff]  }
 0x3c1   : > { %11140 = vmatpush3.bf16.msra.mxu1 %v11935_v3  ;;  %11121 = vmatprep.subr.bf16.mxu0 %v12085_v25 }
 0x3c2   : > { %11141 = vmatprep.subr.bf16.mxu1 %v12085_v25 }
 0x3c4   : > { %11122 = vmatpush3.bf16.msra.mxu0 %v11936_v7 }
 0x3c5   : > { %11142 = vmatpush3.bf16.msra.mxu1 %v11937_v8  ;;  %11147 = vmatprep.subr.bf16.mxu0 %v12085_v25 }
 0x3c6   : > { %11167 = vmatprep.subr.bf16.mxu1 %v12085_v25 }
 0x3c7   : > { %v5528_v17 = vpop.f32.mrf.mxu0  ;;  %11124 = vmatmul.mubr.bf16.vlgmr.msra.gmra.mxu0 %v14375_v46  ;;  %v11947_v46 = vld [vmem:[%s15047_s1 + $0x118] sm:$0xff]  }
 0x3c8   : > { %v14474_v19 = vpop.f32.mrf.mxu1  ;;  %11144 = vmatmul.mubr.bf16.vlgmr.msra.gmra.mxu1 %v14459_v12  ;;  %11148 = vmatpush3.bf16.msra.mxu0 %v11939_v13  ;;  %v5537_v28 = vrot.slane %v5528_v17, 2  ;;  %v11967_v17 = vld [vmem:[%s15047_s1 + $0x188] sm:$0xff]  }
 0x3c9   : > { %11168 = vmatpush3.bf16.msra.mxu1 %v11940_v14  ;;  %v10885_v21 = vpop.f32.mrf.mxu0  ;;  %11149 = vmatprep.subr.bf16.mxu0 %v12085_v25  ;;  %v11964_v14 = vld [vmem:[%s15047_s1 + $0x1d8] sm:$0xff]  }
 0x3ca   : > { %v10905_v24 = vpop.f32.mrf.mxu1  ;;  %11169 = vmatprep.subr.bf16.mxu1 %v12085_v25  ;;  %11163 = vmatprep.mubr.msk.bf16.mxu0 %vm12086_vm0, %v12085_v25  ;;  %v11972_v21 = vld [vmem:[%s15047_s1 + $0x238] sm:$0xff]  }
 0x3cb   : > { %v5531_v27 = vpop.f32.mrf.mxu0  ;;  %11183 = vmatprep.mubr.msk.bf16.mxu1 %vm12086_vm0, %v12085_v25 }
 0x3cc   : > { %v5538_v29 = vrot.slane %v5531_v27, 2  ;;  %v5658_v30 = vpop.f32.mrf.mxu1  ;;  %11150 = vmatpush3.bf16.msra.mxu0 %v11941_v36  ;;  %v11970_v36 = vld [vmem:[%s15047_s1 + $0x1c0] sm:$0xff]  }
 0x3cd   : > { %11170 = vmatpush3.bf16.msra.mxu1 %v11942_v22  ;;  %v10886_v33 = vpop.f32.mrf.mxu0  ;;  %11151 = vmatprep.subr.bf16.mxu0 %v12085_v25  ;;  %v11973_v22 = vld [vmem:[%s15047_s1 + $0x38] sm:$0xff]  }
 0x3ce   : > { %v5539_v35 = vsel %vm769_vm2, %v5537_v28, %v5538_v29  ;;  %v10906_v38 = vpop.f32.mrf.mxu1  ;;  %11171 = vmatprep.subr.bf16.mxu1 %v12085_v25  ;;  %v11975_v28 = vld [vmem:[%s15047_s1 + $0x30] sm:$0xff]  }
 0x3cf   : > { %v5541_v40 = vadd.f32 %v5539_v35, %v5429_v32  ;;  %v11976_v32 = vld [vmem:[%s15047_s1 + $0x228] sm:$0xff]   ;;  %v11978_v38 = vld [vmem:[%s15047_s1 + $0x220] sm:$0xff]  }
 0x3d0   : > { %11152 = vmatpush3.bf16.msra.mxu0 %v11943_v31 }
 0x3d1   : > { %v5542_v43 = vmul.f32 %v14101_v9, %v5541_v40  ;;  %11172 = vmatpush3.bf16.msra.mxu1 %v11944_v34  ;;  %11153 = vmatprep.subr.bf16.mxu0 %v12085_v25  ;;  %v11948_v9 = vld [vmem:[%s15047_s1 + $0x158] sm:$0xff]   ;;  %v11977_v34 = vld [vmem:[%s15047_s1 + $0x28] sm:$0xff]   ;;  %v11979_v40 = vld [vmem:[%s15047_s1 + $0x20] sm:$0xff]  }
 0x3d2   : > { %11173 = vmatprep.subr.bf16.mxu1 %v12085_v25 }
 0x3d3   : > { %v5543_v45 = vadd.f32 %v14110_v11, %v5542_v43  ;;  %v11949_v11 = vld [vmem:[%s15047_s1 + $0x110] sm:$0xff]   ;;  %v11981_v43 = vld [vmem:[%s15047_s1 + $0x18] sm:$0xff]  }
 0x3d4   : > { %11154 = vmatpush3.bf16.msra.mxu0 %v11945_v41  ;;  %v11980_v41 = vld [vmem:[%s15047_s1 + $0x218] sm:$0xff]  }
 0x3d5   : > { %v5544_v47 = vmax.f32 %v5543_v45, 0.0  ;;  %11174 = vmatpush3.bf16.msra.mxu1 %v11946_v44  ;;  %11155 = vmatprep.subr.bf16.mxu0 %v12085_v25  ;;  %v11982_v44 = vld [vmem:[%s15047_s1 + $0x210] sm:$0xff]  }
 0x3d6   : > { %11175 = vmatprep.subr.bf16.mxu1 %v12085_v25  ;;  %v11983_v45 = vld [vmem:[%s15047_s1 + $0x10] sm:$0xff]  }
 0x3d7   : > { %v5545_v48 = vpack.c.bf16 %v5544_v47, %v5544_v47  ;;  %v11985_v47 = vld [vmem:[%s15047_s1 + $0x8] sm:$0xff]  }
 0x3d8   : > { %11156 = vmatpush3.bf16.msra.mxu0 %v11947_v46  ;;  %v11984_v46 = vld [vmem:[%s15047_s1 + $0x208] sm:$0xff]  }
 0x3d9   : > { %9088 = vst [vmem:[%s13067_s30 + $0x10] sm:$0xf] %v5545_v48  ;;  %11176 = vmatpush3.bf16.msra.mxu1 %v11948_v9  ;;  %11157 = vmatprep.subr.bf16.mxu0 %v12085_v25  ;;  %v11986_v9 = vld [vmem:[%s15047_s1 + $0x200] sm:$0xff]  }
 0x3da   : > { %11177 = vmatprep.subr.bf16.mxu1 %v12085_v25  ;;  %v11987_v48 = vld [vmem:[%s15047_s1] sm:$0xff]  }
 0x3dc   : > { %11158 = vmatpush3.bf16.msra.mxu0 %v11949_v11  ;;  %v14698_v11 = vld [vmem:[%s12245_s5 + $0x38] sm:$0x1f]  }
 0x3dd   : > { %11178 = vmatpush3.bf16.msra.mxu1 %v11950_v49  ;;  %11159 = vmatprep.subr.bf16.mxu0 %v12085_v25  ;;  %v11989_v49 = vld [vmem:[%s15047_s1 + $0x78] sm:$0xff]  }
 0x3de   : > { %11179 = vmatprep.subr.bf16.mxu1 %v12085_v25 }
 0x3e0   : > { %11160 = vmatpush3.bf16.msra.mxu0 %v11951_v37  ;;  %v11990_v37 = vld [vmem:[%s15047_s1 + $0xb8] sm:$0xff]  }
 0x3e1   : > { %11180 = vmatpush3.bf16.msra.mxu1 %v11952_v42  ;;  %11161 = vmatprep.subr.bf16.mxu0 %v12085_v25 }
 0x3e2   : > { %11181 = vmatprep.subr.bf16.mxu1 %v12085_v25 }
 0x3e4   : > { %11162 = vmatpush3.bf16.msra.mxu0 %v11953_v50 }
 0x3e5   : > { %11182 = vmatpush3.bf16.msra.mxu1 %v11954_v51  ;;  %11187 = vmatprep.subr.bf16.mxu0 %v12085_v25  ;;  %v11991_v51 = vld [vmem:[%s15047_s1 + $0x70] sm:$0xff]  }
 0x3e6   : > { %11207 = vmatprep.subr.bf16.mxu1 %v12085_v25 }
 0x3e7   : > { %v5760_v54 = vpop.f32.mrf.mxu0  ;;  %11164 = vmatmul.mubr.bf16.vlgmr.msra.gmra.mxu0 %v14459_v12 }
 0x3e8   : > { %v5872_v55 = vpop.f32.mrf.mxu1  ;;  %11184 = vmatmul.mubr.bf16.vlgmr.msra.gmra.mxu1 %v14459_v12  ;;  %11188 = vmatpush3.bf16.msra.mxu0 %v11955_v52  ;;  %v5769_v62 = vrot.slane %v5760_v54, 1  ;;  %v11962_v12 = vld [vmem:[%s15047_s1 + $0x1e0] sm:$0xff]  }
 0x3e9   : > { %11208 = vmatpush3.bf16.msra.mxu1 %v11956_v53  ;;  %v10925_v57 = vpop.f32.mrf.mxu0  ;;  %11189 = vmatprep.subr.bf16.mxu0 %v12085_v25  ;;  %v5881_v60 = vrot.slane %v5872_v55, 2  ;;  %v11992_v53 = vld [vmem:[%s15047_s1 + $0xb0] sm:$0xff]  }
 0x3ea   : > { %v10945_v59 = vpop.f32.mrf.mxu1  ;;  %11209 = vmatprep.subr.bf16.mxu1 %v12085_v25  ;;  %11203 = vmatprep.mubr.msk.bf16.mxu0 %vm12086_vm0, %v12085_v25  ;;  %v11993_v57 = vld [vmem:[%s15047_s1 + $0x68] sm:$0xff]  }
 0x3eb   : > { %v5763_v61 = vpop.f32.mrf.mxu0  ;;  %11223 = vmatprep.mubr.msk.bf16.mxu1 %vm12086_vm0, %v12085_v25  ;;  %v11994_v59 = vld [vmem:[%s15047_s1 + $0xa8] sm:$0xff]  }
 0x3ec   : > { %v5770_v63 = vrot.slane %v5763_v61, 1  ;;  %v5875_v0 = vpop.f32.mrf.mxu1  ;;  %11190 = vmatpush3.bf16.msra.mxu0 %v11957_v56  ;;  %v11995_v61 = vld [vmem:[%s15047_s1 + $0x60] sm:$0xff]  }
 0x3ed   : > { %v5882_v3 = vrot.slane %v5875_v0, 2  ;;  %11210 = vmatpush3.bf16.msra.mxu1 %v11958_v58  ;;  %v10926_v4 = vpop.f32.mrf.mxu0  ;;  %11191 = vmatprep.subr.bf16.mxu0 %v12085_v25  ;;  %v11998_v0 = vld [vmem:[%s15047_s1 + $0x98] sm:$0xff]  }
 0x3ee   : > { %v5771_v7 = vsel %vm656_vm1, %v5769_v62, %v5770_v63  ;;  %v10946_v8 = vpop.f32.mrf.mxu1  ;;  %11211 = vmatprep.subr.bf16.mxu1 %v12085_v25  ;;  %v11996_v62 = vld [vmem:[%s15047_s1 + $0xa0] sm:$0xff]   ;;  %v11997_v63 = vld [vmem:[%s15047_s1 + $0x58] sm:$0xff]   ;;  %v12001_v4 = vld [vmem:[%s15047_s1 + $0x48] sm:$0xff]  }
 0x3ef   : > { %v5773_v10 = vadd.f32 %v5771_v7, %v14474_v19  ;;  %v5883_v39 = vsel %vm769_vm2, %v5881_v60, %v5882_v3  ;;  %v11969_v19 = vld [vmem:[%s15047_s1 + $0x180] sm:$0xff]   ;;  %v12000_v3 = vld [vmem:[%s15047_s1 + $0x90] sm:$0xff]  }
 0x3f0   : > { %11192 = vmatpush3.bf16.msra.mxu0 %v11959_v2  ;;  %v11999_v2 = vld [vmem:[%s15047_s1 + $0x50] sm:$0xff]  }
 0x3f1   : > { %11212 = vmatpush3.bf16.msra.mxu1 %v11960_v6  ;;  %11193 = vmatprep.subr.bf16.mxu0 %v12085_v25  ;;  %v14583_v13 = vadd.f32 %v5883_v39, %v5773_v10  ;;  %v12002_v6 = vld [vmem:[%s15047_s1 + $0x88] sm:$0xff]   ;;  %v12003_v10 = vld [vmem:[%s15047_s1 + $0x40] sm:$0xff]  }
 0x3f2   : > { %11213 = vmatprep.subr.bf16.mxu1 %v12085_v25  ;;  %v12004_v39 = vld [vmem:[%s15047_s1 + $0x80] sm:$0xff]  }
 0x3f4   : > { %11194 = vmatpush3.bf16.msra.mxu0 %v11961_v1 }
 0x3f5   : > { %11214 = vmatpush3.bf16.msra.mxu1 %v11962_v12  ;;  %11195 = vmatprep.subr.bf16.mxu0 %v12085_v25 }
 0x3f6   : > { %11215 = vmatprep.subr.bf16.mxu1 %v12085_v25 }
 0x3f8   : > { %11196 = vmatpush3.bf16.msra.mxu0 %v11963_v5 }
 0x3f9   : > { %11216 = vmatpush3.bf16.msra.mxu1 %v11964_v14  ;;  %11197 = vmatprep.subr.bf16.mxu0 %v12085_v25  ;;  %v12005_v14 = vld [vmem:[%s15047_s1 + $0xf8] sm:$0xff]  }
 0x3fa   : > { %11217 = vmatprep.subr.bf16.mxu1 %v12085_v25 }
 0x3fc   : > { %11198 = vmatpush3.bf16.msra.mxu0 %v11965_v15 }
 0x3fd   : > { %11218 = vmatpush3.bf16.msra.mxu1 %v11966_v16  ;;  %11199 = vmatprep.subr.bf16.mxu0 %v12085_v25  ;;  %v12006_v16 = vld [vmem:[%s15047_s1 + $0x138] sm:$0xff]  }
 0x3fe   : > { %11219 = vmatprep.subr.bf16.mxu1 %v12085_v25 }
 0x400   : > { %11200 = vmatpush3.bf16.msra.mxu0 %v11967_v17 }
 0x401   : > { %11220 = vmatpush3.bf16.msra.mxu1 %v11968_v18  ;;  %11201 = vmatprep.subr.bf16.mxu0 %v12085_v25 }
 0x402   : > { %11221 = vmatprep.subr.bf16.mxu1 %v12085_v25 }
 0x404   : > { %11202 = vmatpush3.bf16.msra.mxu0 %v11969_v19 }
 0x405   : > { %11222 = vmatpush3.bf16.msra.mxu1 %v11970_v36  ;;  %11227 = vmatprep.subr.bf16.mxu0 %v12085_v25 }
 0x406   : > { %11247 = vmatprep.subr.bf16.mxu1 %v12085_v25 }
 0x407   : > { %v14629_v23 = vpop.f32.mrf.mxu0  ;;  %11204 = vmatmul.mubr.bf16.vlgmr.msra.gmra.mxu0 %v14619_v20 }
 0x408   : > { %v14632_v24 = vpop.f32.mrf.mxu1  ;;  %11224 = vmatmul.mubr.bf16.vlgmr.msra.gmra.mxu1 %v14619_v20  ;;  %11228 = vmatpush3.bf16.msra.mxu0 %v11972_v21  ;;  %v5999_v15 = vadd.f32 %v14629_v23, %v14583_v13  ;;  %v12007_v13 = vld [vmem:[%s15047_s1 + $0xf0] sm:$0xff]  }
 0x409   : > { %11248 = vmatpush3.bf16.msra.mxu1 %v11973_v22  ;;  %v10965_v27 = vpop.f32.mrf.mxu0  ;;  %11229 = vmatprep.subr.bf16.mxu0 %v12085_v25  ;;  %v6107_v7 = vrot.slane %v14632_v24, 1  ;;  %v12008_v22 = vld [vmem:[%s15047_s1 + $0x130] sm:$0xff]  }
 0x40a   : > { %v10985_v29 = vpop.f32.mrf.mxu1  ;;  %11249 = vmatprep.subr.bf16.mxu1 %v12085_v25  ;;  %11243 = vmatprep.mubr.msk.bf16.mxu0 %vm12086_vm0, %v12085_v25 }
 0x40b   : > { %v5996_v30 = vpop.f32.mrf.mxu0  ;;  %11263 = vmatprep.mubr.msk.bf16.mxu1 %vm12086_vm0, %v12085_v25 }
 0x40c   : > { %v14647_v31 = vpop.f32.mrf.mxu1  ;;  %11230 = vmatpush3.bf16.msra.mxu0 %v11974_v26  ;;  %v12009_v30 = vld [vmem:[%s15047_s1 + $0xe8] sm:$0xff]  }
 0x40d   : > { %11250 = vmatpush3.bf16.msra.mxu1 %v11975_v28  ;;  %v10966_v33 = vpop.f32.mrf.mxu0  ;;  %11231 = vmatprep.subr.bf16.mxu0 %v12085_v25  ;;  %v6108_v8 = vrot.slane %v14647_v31, 1 }
 0x40e   : > { %v10986_v35 = vpop.f32.mrf.mxu1  ;;  %11251 = vmatprep.subr.bf16.mxu1 %v12085_v25 }
 0x40f   : > { %v6109_v12 = vsel %vm656_vm1, %v6107_v7, %v6108_v8 }
 0x410   : > { %11232 = vmatpush3.bf16.msra.mxu0 %v11976_v32  ;;  %v6111_v18 = vadd.f32 %v6109_v12, %v5999_v15  ;;  %v12030_v15 = vld [vmem:[%s15047_s1 + $0x158] sm:$0xff]  }
 0x411   : > { %11252 = vmatpush3.bf16.msra.mxu1 %v11977_v34  ;;  %11233 = vmatprep.subr.bf16.mxu0 %v12085_v25  ;;  %v12010_v34 = vld [vmem:[%s15047_s1 + $0x128] sm:$0xff]  }
 0x412   : > { %11253 = vmatprep.subr.bf16.mxu1 %v12085_v25 }
 0x414   : > { %11234 = vmatpush3.bf16.msra.mxu0 %v11978_v38 }
 0x415   : > { %11254 = vmatpush3.bf16.msra.mxu1 %v11979_v40  ;;  %11235 = vmatprep.subr.bf16.mxu0 %v12085_v25 }
 0x416   : > { %11255 = vmatprep.subr.bf16.mxu1 %v12085_v25 }
 0x418   : > { %11236 = vmatpush3.bf16.msra.mxu0 %v11980_v41 }
 0x419   : > { %11256 = vmatpush3.bf16.msra.mxu1 %v11981_v43  ;;  %11237 = vmatprep.subr.bf16.mxu0 %v12085_v25  ;;  %v12011_v43 = vld [vmem:[%s15047_s1 + $0xe0] sm:$0xff]  }
 0x41a   : > { %11257 = vmatprep.subr.bf16.mxu1 %v12085_v25 }
 0x41c   : > { %11238 = vmatpush3.bf16.msra.mxu0 %v11982_v44 }
 0x41d   : > { %11258 = vmatpush3.bf16.msra.mxu1 %v11983_v45  ;;  %11239 = vmatprep.subr.bf16.mxu0 %v12085_v25  ;;  %v12012_v45 = vld [vmem:[%s15047_s1 + $0x120] sm:$0xff]  }
 0x41e   : > { %11259 = vmatprep.subr.bf16.mxu1 %v12085_v25 }
 0x420   : > { %11240 = vmatpush3.bf16.msra.mxu0 %v11984_v46  ;;  %v14825_v46 = vld [vmem:[%s15048_s2] ss:$0 sm:$0xff] }
 0x421   : > { %11260 = vmatpush3.bf16.msra.mxu1 %v11985_v47  ;;  %11241 = vmatprep.subr.bf16.mxu0 %v12085_v25 }
 0x422   : > { %11261 = vmatprep.subr.bf16.mxu1 %v12085_v25 }
 0x424   : > { %11242 = vmatpush3.bf16.msra.mxu0 %v11986_v9  ;;  %v12013_v9 = vld [vmem:[%s15047_s1 + $0xd8] sm:$0xff]  }
 0x425   : > { %11262 = vmatpush3.bf16.msra.mxu1 %v11987_v48  ;;  %11267 = vmatprep.subr.bf16.mxu0 %v12085_v25  ;;  %v14834_v48 = vld [vmem:[%s15049_s3] ss:$0 sm:$0xff] }
 0x426   : > { %11287 = vmatprep.subr.bf16.mxu1 %v12085_v25 }
 0x427   : > { %v14708_v42 = vpop.f32.mrf.mxu0  ;;  %11244 = vmatmul.mubr.bf16.vlgmr.msra.gmra.mxu0 %v14619_v20 }
 0x428   : > { %v14711_v50 = vpop.f32.mrf.mxu1  ;;  %11264 = vmatmul.mubr.bf16.vlgmr.msra.gmra.mxu1 %v14698_v11  ;;  %11268 = vmatpush3.bf16.msra.mxu0 %v11989_v49  ;;  %v6219_v5 = vrot.slane %v14708_v42, 2  ;;  %v12014_v49 = vld [vmem:[%s15047_s1 + $0x118] sm:$0xff]   ;;  %v12015_v42 = vld [vmem:[%s15047_s1 + $0xd0] sm:$0xff]  }
 0x429   : > { %11288 = vmatpush3.bf16.msra.mxu1 %v11990_v37  ;;  %v11005_v52 = vpop.f32.mrf.mxu0  ;;  %11269 = vmatprep.subr.bf16.mxu0 %v12085_v25 }
 0x42a   : > { %v11025_v54 = vpop.f32.mrf.mxu1  ;;  %11289 = vmatprep.subr.bf16.mxu1 %v12085_v25  ;;  %11283 = vmatprep.mubr.msk.bf16.mxu0 %vm12086_vm0, %v12085_v25  ;;  %v12017_v52 = vld [vmem:[%s15047_s1 + $0xc8] sm:$0xff]  }
 0x42b   : > { %v6213_v55 = vpop.f32.mrf.mxu0  ;;  %11303 = vmatprep.mubr.msk.bf16.mxu1 %vm12086_vm0, %v12085_v25  ;;  %v12019_v54 = vld [vmem:[%s15047_s1 + $0xc0] sm:$0xff]  }
 0x42c   : > { %v6334_v56 = vpop.f32.mrf.mxu1  ;;  %11270 = vmatpush3.bf16.msra.mxu0 %v11991_v51  ;;  %v6220_v1 = vrot.slane %v6213_v55, 2  ;;  %v12016_v51 = vld [vmem:[%s15047_s1 + $0x110] sm:$0xff]   ;;  %v12020_v55 = vld [vmem:[%s15047_s1 + $0x100] sm:$0xff]  }
 0x42d   : > { %11290 = vmatpush3.bf16.msra.mxu1 %v11992_v53  ;;  %v11006_v58 = vpop.f32.mrf.mxu0  ;;  %11271 = vmatprep.subr.bf16.mxu0 %v12085_v25  ;;  %v12018_v53 = vld [vmem:[%s15047_s1 + $0x108] sm:$0xff]   ;;  %v14868_v56 = vld [vmem:[%s12245_s5 + $0x78] sm:$0x1f]  }
 0x42e   : > { %v11026_v60 = vpop.f32.mrf.mxu1  ;;  %11291 = vmatprep.subr.bf16.mxu1 %v12085_v25  ;;  %v6221_v17 = vsel %vm769_vm2, %v6219_v5, %v6220_v1  ;;  %v12023_v58 = vld [vmem:[%s15047_s1 + $0x1b8] sm:$0xff]   ;;  %v12028_v5 = vld [vmem:[%s15047_s1 + $0x160] sm:$0xff]  }
 0x42f   : > { %v6223_v20 = vadd.f32 %v6221_v17, %v6111_v18  ;;  %v12032_v17 = vld [vmem:[%s15047_s1 + $0x150] sm:$0xff]  }
 0x430   : > { %11272 = vmatpush3.bf16.msra.mxu0 %v11993_v57  ;;  %v12022_v57 = vld [vmem:[%s15047_s1 + $0x178] sm:$0xff]   ;;  %v12033_v18 = vld [vmem:[%s15047_s1 + $0x190] sm:$0xff]  }
 0x431   : > { %11292 = vmatpush3.bf16.msra.mxu1 %v11994_v59  ;;  %11273 = vmatprep.subr.bf16.mxu0 %v12085_v25  ;;  %v6337_v31 = vadd.f32 %v14711_v50, %v6223_v20  ;;  %v12037_v20 = vld [vmem:[%s15047_s1 + $0x180] sm:$0xff]  }
 0x432   : > { %11293 = vmatprep.subr.bf16.mxu1 %v12085_v25 }
 0x434   : > { %11274 = vmatpush3.bf16.msra.mxu0 %v11995_v61  ;;  %v12024_v61 = vld [vmem:[%s15047_s1 + $0x170] sm:$0xff]  }
 0x435   : > { %11294 = vmatpush3.bf16.msra.mxu1 %v11996_v62  ;;  %11275 = vmatprep.subr.bf16.mxu0 %v12085_v25 }
 0x436   : > { %11295 = vmatprep.subr.bf16.mxu1 %v12085_v25 }
 0x438   : > { %11276 = vmatpush3.bf16.msra.mxu0 %v11997_v63  ;;  %v12025_v63 = vld [vmem:[%s15047_s1 + $0x1b0] sm:$0xff]  }
 0x439   : > { %11296 = vmatpush3.bf16.msra.mxu1 %v11998_v0  ;;  %11277 = vmatprep.subr.bf16.mxu0 %v12085_v25 }
 0x43a   : > { %11297 = vmatprep.subr.bf16.mxu1 %v12085_v25 }
 0x43c   : > { %11278 = vmatpush3.bf16.msra.mxu0 %v11999_v2 }
 0x43d   : > { %11298 = vmatpush3.bf16.msra.mxu1 %v12000_v3  ;;  %11279 = vmatprep.subr.bf16.mxu0 %v12085_v25 }
 0x43e   : > { %11299 = vmatprep.subr.bf16.mxu1 %v12085_v25 }
 0x440   : > { %11280 = vmatpush3.bf16.msra.mxu0 %v12001_v4 }
 0x441   : > { %11300 = vmatpush3.bf16.msra.mxu1 %v12002_v6  ;;  %11281 = vmatprep.subr.bf16.mxu0 %v12085_v25  ;;  %v12026_v6 = vld [vmem:[%s15047_s1 + $0x168] sm:$0xff]  }
 0x442   : > { %11301 = vmatprep.subr.bf16.mxu1 %v12085_v25 }
 0x444   : > { %11282 = vmatpush3.bf16.msra.mxu0 %v12003_v10  ;;  %v12027_v10 = vld [vmem:[%s15047_s1 + $0x1a8] sm:$0xff]  }
 0x445   : > { %11302 = vmatpush3.bf16.msra.mxu1 %v12004_v39  ;;  %11307 = vmatprep.subr.bf16.mxu0 %v12085_v25 }
 0x446   : > { %11327 = vmatprep.subr.bf16.mxu1 %v12085_v25 }
 0x447   : > { %v6436_v19 = vpop.f32.mrf.mxu0  ;;  %11284 = vmatmul.mubr.bf16.vlgmr.msra.gmra.mxu0 %v14698_v11 }
 0x448   : > { %v6548_v36 = vpop.f32.mrf.mxu1  ;;  %11304 = vmatmul.mubr.bf16.vlgmr.msra.gmra.mxu1 %v14698_v11  ;;  %11308 = vmatpush3.bf16.msra.mxu0 %v12005_v14  ;;  %v6445_v26 = vrot.slane %v6436_v19, 1  ;;  %v12029_v14 = vld [vmem:[%s15047_s1 + $0x1a0] sm:$0xff]   ;;  %v12034_v19 = vld [vmem:[%s15047_s1 + $0x148] sm:$0xff]  }
 0x449   : > { %11328 = vmatpush3.bf16.msra.mxu1 %v12006_v16  ;;  %v11045_v21 = vpop.f32.mrf.mxu0  ;;  %11309 = vmatprep.subr.bf16.mxu0 %v12085_v25  ;;  %v6557_v27 = vrot.slane %v6548_v36, 2  ;;  %v12031_v16 = vld [vmem:[%s15047_s1 + $0x198] sm:$0xff]   ;;  %v12035_v36 = vld [vmem:[%s15047_s1 + $0x188] sm:$0xff]  }
 0x44a   : > { %v11065_v23 = vpop.f32.mrf.mxu1  ;;  %11329 = vmatprep.subr.bf16.mxu1 %v12085_v25  ;;  %11323 = vmatprep.mubr.msk.bf16.mxu0 %vm12086_vm0, %v12085_v25  ;;  %v14944_v21 = vld [vmem:[%s12245_s5 + $0xb8] sm:$0x1f]  }
 0x44b   : > { %v6439_v24 = vpop.f32.mrf.mxu0  ;;  %11343 = vmatprep.mubr.msk.bf16.mxu1 %vm12086_vm0, %v12085_v25  ;;  %v12040_v23 = vld [vmem:[%s15047_s1 + $0x238] sm:$0xff]  }
 0x44c   : > { %v6446_v28 = vrot.slane %v6439_v24, 1  ;;  %v6551_v29 = vpop.f32.mrf.mxu1  ;;  %11310 = vmatpush3.bf16.msra.mxu0 %v12007_v13  ;;  %v12036_v13 = vld [vmem:[%s15047_s1 + $0x140] sm:$0xff]  }
 0x44d   : > { %v6558_v32 = vrot.slane %v6551_v29, 2  ;;  %11330 = vmatpush3.bf16.msra.mxu1 %v12008_v22  ;;  %v11046_v33 = vpop.f32.mrf.mxu0  ;;  %11311 = vmatprep.subr.bf16.mxu0 %v12085_v25  ;;  %v12039_v22 = vld [vmem:[%s15047_s1 + $0x1f8] sm:$0xff]   ;;  %v12042_v29 = vld [vmem:[%s15047_s1 + $0x230] sm:$0xff]  }
 0x44e   : > { %v6447_v35 = vsel %vm656_vm1, %v6445_v26, %v6446_v28  ;;  %v11066_v38 = vpop.f32.mrf.mxu1  ;;  %11331 = vmatprep.subr.bf16.mxu1 %v12085_v25 }
 0x44f   : > { %v6449_v40 = vadd.f32 %v6447_v35, %v6337_v31  ;;  %v6559_v41 = vsel %vm769_vm2, %v6557_v27, %v6558_v32  ;;  %v12041_v27 = vld [vmem:[%s15047_s1 + $0x1f0] sm:$0xff]   ;;  %v12043_v35 = vld [vmem:[%s15047_s1 + $0x1e8] sm:$0xff]  }
 0x450   : > { %11312 = vmatpush3.bf16.msra.mxu0 %v12009_v30 }
 0x451   : > { %v6561_v44 = vadd.f32 %v6559_v41, %v6449_v40  ;;  %11332 = vmatpush3.bf16.msra.mxu1 %v12010_v34  ;;  %11313 = vmatprep.subr.bf16.mxu0 %v12085_v25  ;;  %v12044_v40 = vld [vmem:[%s15047_s1 + $0x228] sm:$0xff]  }
 0x452   : > { %11333 = vmatprep.subr.bf16.mxu1 %v12085_v25 }
 0x453   : > { %v6562_v47 = vmul.f32 %v14825_v46, %v6561_v44 }
 0x454   : > { %11314 = vmatpush3.bf16.msra.mxu0 %v12011_v43 }
 0x455   : > { %v6563_v11 = vadd.f32 %v14834_v48, %v6562_v47  ;;  %11334 = vmatpush3.bf16.msra.mxu1 %v12012_v45  ;;  %11315 = vmatprep.subr.bf16.mxu0 %v12085_v25  ;;  %v12045_v45 = vld [vmem:[%s15047_s1 + $0x1e0] sm:$0xff]  }
 0x456   : > { %11335 = vmatprep.subr.bf16.mxu1 %v12085_v25  ;;  %v12046_v47 = vld [vmem:[%s15047_s1 + $0x220] sm:$0xff]  }
 0x457   : > { %v6564_v37 = vmax.f32 %v6563_v11, 0.0  ;;  %v12047_v11 = vld [vmem:[%s15047_s1 + $0x1d8] sm:$0xff]  }
 0x458   : > { %11316 = vmatpush3.bf16.msra.mxu0 %v12013_v9 }
 0x459   : > { %v6565_v50 = vpack.c.bf16 %v6564_v37, %v6564_v37  ;;  %11336 = vmatpush3.bf16.msra.mxu1 %v12014_v49  ;;  %11317 = vmatprep.subr.bf16.mxu0 %v12085_v25  ;;  %v12048_v49 = vld [vmem:[%s15047_s1 + $0x218] sm:$0xff]   ;;  %v12049_v37 = vld [vmem:[%s15047_s1 + $0x1d0] sm:$0xff]  }
 0x45a   : > { %11337 = vmatprep.subr.bf16.mxu1 %v12085_v25 }
 0x45b   : > { %9170 = vst [vmem:[%s13067_s30 + $0x14] sm:$0xf] %v6565_v50  ;;  %v12051_v50 = vld [vmem:[%s15047_s1 + $0x1c8] sm:$0xff]  }
 0x45c   : > { %11318 = vmatpush3.bf16.msra.mxu0 %v12015_v42  ;;  %v12050_v42 = vld [vmem:[%s15047_s1 + $0x210] sm:$0xff]  }
 0x45d   : > { %11338 = vmatpush3.bf16.msra.mxu1 %v12016_v51  ;;  %11319 = vmatprep.subr.bf16.mxu0 %v12085_v25  ;;  %v12052_v51 = vld [vmem:[%s15047_s1 + $0x208] sm:$0xff]  }
 0x45e   : > { %11339 = vmatprep.subr.bf16.mxu1 %v12085_v25 }
 0x460   : > { %11320 = vmatpush3.bf16.msra.mxu0 %v12017_v52  ;;  %v12053_v52 = vld [vmem:[%s15047_s1 + $0x1c0] sm:$0xff]  }
 0x461   : > { %11340 = vmatpush3.bf16.msra.mxu1 %v12018_v53  ;;  %11321 = vmatprep.subr.bf16.mxu0 %v12085_v25  ;;  %v12054_v53 = vld [vmem:[%s15047_s1 + $0x200] sm:$0xff]  }
 0x462   : > { %11341 = vmatprep.subr.bf16.mxu1 %v12085_v25 }
 0x464   : > { %11322 = vmatpush3.bf16.msra.mxu0 %v12019_v54 }
 0x465   : > { %11342 = vmatpush3.bf16.msra.mxu1 %v12020_v55  ;;  %11347 = vmatprep.subr.bf16.mxu0 %v12085_v25 }
 0x466   : > { %11367 = vmatprep.subr.bf16.mxu1 %v12085_v25 }
 0x467   : > { %v6675_v59 = vpop.f32.mrf.mxu0  ;;  %11324 = vmatmul.mubr.bf16.vlgmr.msra.gmra.mxu0 %v14868_v56 }
 0x468   : > { %v6780_v60 = vpop.f32.mrf.mxu1  ;;  %11344 = vmatmul.mubr.bf16.vlgmr.msra.gmra.mxu1 %v14868_v56  ;;  %11348 = vmatpush3.bf16.msra.mxu0 %v12022_v57 }
 0x469   : > { %11368 = vmatpush3.bf16.msra.mxu1 %v12023_v58  ;;  %v11085_v62 = vpop.f32.mrf.mxu0  ;;  %11349 = vmatprep.subr.bf16.mxu0 %v12085_v25  ;;  %v6789_v2 = vrot.slane %v6780_v60, 1 }
 0x46a   : > { %v11105_v0 = vpop.f32.mrf.mxu1  ;;  %11369 = vmatprep.subr.bf16.mxu1 %v12085_v25  ;;  %11363 = vmatprep.mubr.msk.bf16.mxu0 %vm12086_vm0, %v12085_v25 }
 0x46b   : > { %v6678_v3 = vpop.f32.mrf.mxu0  ;;  %11383 = vmatprep.mubr.msk.bf16.mxu1 %vm12086_vm0, %v12085_v25 }
 0x46c   : > { %v6783_v4 = vpop.f32.mrf.mxu1  ;;  %11350 = vmatpush3.bf16.msra.mxu0 %v12024_v61 }
 0x46d   : > { %v6790_v7 = vrot.slane %v6783_v4, 1  ;;  %11370 = vmatpush3.bf16.msra.mxu1 %v12025_v63  ;;  %v11086_v8 = vpop.f32.mrf.mxu0  ;;  %11351 = vmatprep.subr.bf16.mxu0 %v12085_v25 }
 0x46e   : > { %v11106_v39 = vpop.f32.mrf.mxu1  ;;  %11371 = vmatprep.subr.bf16.mxu1 %v12085_v25 }
 0x46f   : > { %v6791_v1 = vsel %vm656_vm1, %v6789_v2, %v6790_v7 }
 0x470   : > { %v14901_v12 = vadd.f32 %v6791_v1, %v6675_v59  ;;  %11352 = vmatpush3.bf16.msra.mxu0 %v12026_v6 }
 0x471   : > { %11372 = vmatpush3.bf16.msra.mxu1 %v12027_v10  ;;  %11353 = vmatprep.subr.bf16.mxu0 %v12085_v25 }
 0x472   : > { %11373 = vmatprep.subr.bf16.mxu1 %v12085_v25 }
 0x474   : > { %11354 = vmatpush3.bf16.msra.mxu0 %v12028_v5 }
 0x475   : > { %11374 = vmatpush3.bf16.msra.mxu1 %v12029_v14  ;;  %11355 = vmatprep.subr.bf16.mxu0 %v12085_v25 }
 0x476   : > { %11375 = vmatprep.subr.bf16.mxu1 %v12085_v25 }
 0x478   : > { %11356 = vmatpush3.bf16.msra.mxu0 %v12030_v15 }
 0x479   : > { %11376 = vmatpush3.bf16.msra.mxu1 %v12031_v16  ;;  %11357 = vmatprep.subr.bf16.mxu0 %v12085_v25 }
 0x47a   : > { %11377 = vmatprep.subr.bf16.mxu1 %v12085_v25 }
 0x47c   : > { %11358 = vmatpush3.bf16.msra.mxu0 %v12032_v17 }
 0x47d   : > { %11378 = vmatpush3.bf16.msra.mxu1 %v12033_v18  ;;  %11359 = vmatprep.subr.bf16.mxu0 %v12085_v25 }
 0x47e   : > { %11379 = vmatprep.subr.bf16.mxu1 %v12085_v25 }
 0x480   : > { %11360 = vmatpush3.bf16.msra.mxu0 %v12034_v19 }
 0x481   : > { %11380 = vmatpush3.bf16.msra.mxu1 %v12035_v36  ;;  %11361 = vmatprep.subr.bf16.mxu0 %v12085_v25 }
 0x482   : > { %11381 = vmatprep.subr.bf16.mxu1 %v12085_v25 }
 0x484   : > { %11362 = vmatpush3.bf16.msra.mxu0 %v12036_v13 }
 0x485   : > { %11382 = vmatpush3.bf16.msra.mxu1 %v12037_v20  ;;  %11387 = vmatprep.subr.bf16.mxu0 %v12085_v25 }
 0x486   : > { %11407 = vmatprep.subr.bf16.mxu1 %v12085_v25 }
 0x487   : > { %v6892_v24 = vpop.f32.mrf.mxu0  ;;  %11364 = vmatmul.mubr.bf16.vlgmr.msra.gmra.mxu0 %v14868_v56 }
 0x488   : > { %v7013_v26 = vpop.f32.mrf.mxu1  ;;  %11384 = vmatmul.mubr.bf16.vlgmr.msra.gmra.mxu1 %v14944_v21  ;;  %11388 = vmatpush3.bf16.msra.mxu0 %v12039_v22  ;;  %v6901_v32 = vrot.slane %v6892_v24, 2 }
 0x489   : > { %11408 = vmatpush3.bf16.msra.mxu1 %v12040_v23  ;;  %v11125_v28 = vpop.f32.mrf.mxu0  ;;  %11389 = vmatprep.subr.bf16.mxu0 %v12085_v25 }
 0x48a   : > { %v11145_v30 = vpop.f32.mrf.mxu1  ;;  %11409 = vmatprep.subr.bf16.mxu1 %v12085_v25  ;;  %11403 = vmatprep.mubr.msk.bf16.mxu0 %vm12086_vm0, %v12085_v25 }
 0x48b   : > { %v6895_v31 = vpop.f32.mrf.mxu0  ;;  %11423 = vmatprep.mubr.msk.bf16.mxu1 %vm12086_vm0, %v12085_v25 }
 0x48c   : > { %v6902_v33 = vrot.slane %v6895_v31, 2  ;;  %v7016_v34 = vpop.f32.mrf.mxu1  ;;  %11390 = vmatpush3.bf16.msra.mxu0 %v12041_v27 }
 0x48d   : > { %11410 = vmatpush3.bf16.msra.mxu1 %v12042_v29  ;;  %v11126_v38 = vpop.f32.mrf.mxu0  ;;  %11391 = vmatprep.subr.bf16.mxu0 %v12085_v25 }
 0x48e   : > { %v6903_v41 = vsel %vm769_vm2, %v6901_v32, %v6902_v33  ;;  %v11146_v43 = vpop.f32.mrf.mxu1  ;;  %11411 = vmatprep.subr.bf16.mxu1 %v12085_v25 }
 0x48f   : > { %v6905_v44 = vadd.f32 %v6903_v41, %v14901_v12 }
 0x490   : > { %11392 = vmatpush3.bf16.msra.mxu0 %v12043_v35 }
 0x491   : > { %11412 = vmatpush3.bf16.msra.mxu1 %v12044_v40  ;;  %11393 = vmatprep.subr.bf16.mxu0 %v12085_v25  ;;  %v7019_v9 = vadd.f32 %v7013_v26, %v6905_v44 }
 0x492   : > { %11413 = vmatprep.subr.bf16.mxu1 %v12085_v25 }
 0x494   : > { %11394 = vmatpush3.bf16.msra.mxu0 %v12045_v45 }
 0x495   : > { %11414 = vmatpush3.bf16.msra.mxu1 %v12046_v47  ;;  %11395 = vmatprep.subr.bf16.mxu0 %v12085_v25 }
 0x496   : > { %11415 = vmatprep.subr.bf16.mxu1 %v12085_v25 }
 0x498   : > { %11396 = vmatpush3.bf16.msra.mxu0 %v12047_v11 }
 0x499   : > { %11416 = vmatpush3.bf16.msra.mxu1 %v12048_v49  ;;  %11397 = vmatprep.subr.bf16.mxu0 %v12085_v25 }
 0x49a   : > { %11417 = vmatprep.subr.bf16.mxu1 %v12085_v25 }
 0x49c   : > { %11398 = vmatpush3.bf16.msra.mxu0 %v12049_v37 }
 0x49d   : > { %11418 = vmatpush3.bf16.msra.mxu1 %v12050_v42  ;;  %11399 = vmatprep.subr.bf16.mxu0 %v12085_v25 }
 0x49e   : > { %11419 = vmatprep.subr.bf16.mxu1 %v12085_v25 }
 0x4a0   : > { %11400 = vmatpush3.bf16.msra.mxu0 %v12051_v50 }
 0x4a1   : > { %11420 = vmatpush3.bf16.msra.mxu1 %v12052_v51  ;;  %11401 = vmatprep.subr.bf16.mxu0 %v12085_v25 }
 0x4a2   : > { %11421 = vmatprep.subr.bf16.mxu1 %v12085_v25 }
 0x4a4   : > { %11402 = vmatpush3.bf16.msra.mxu0 %v12053_v52 }
 0x4a5   : > { %11422 = vmatpush3.bf16.msra.mxu1 %v12054_v53 }
 0x4a7   : > { %v7118_v54 = vpop.f32.mrf.mxu0  ;;  %11404 = vmatmul.mubr.bf16.vlgmr.msra.gmra.mxu0 %v14944_v21 }
 0x4a8   : > { %v7230_v55 = vpop.f32.mrf.mxu1  ;;  %11424 = vmatmul.mubr.bf16.vlgmr.msra.gmra.mxu1 %v14944_v21  ;;  %v7127_v8 = vrot.slane %v7118_v54, 1 }
 0x4a9   : > { %v11165_v56 = vpop.f32.mrf.mxu0  ;;  %v7239_v39 = vrot.slane %v7230_v55, 2 }
 0x4aa   : > { %v11185_v57 = vpop.f32.mrf.mxu1 }
 0x4ab   : > { %v7121_v58 = vpop.f32.mrf.mxu0 }
 0x4ac   : > { %v7233_v59 = vpop.f32.mrf.mxu1  ;;  %v7128_v7 = vrot.slane %v7121_v58, 1 }
 0x4ad   : > { %v11166_v60 = vpop.f32.mrf.mxu0  ;;  %v7240_v1 = vrot.slane %v7233_v59, 2 }
 0x4ae   : > { %v11186_v61 = vpop.f32.mrf.mxu1  ;;  %v7129_v10 = vsel %vm656_vm1, %v7127_v8, %v7128_v7 }
 0x4af   : > { %v7131_v12 = vadd.f32 %v7129_v10, %v7019_v9  ;;  %v7241_v16 = vsel %vm769_vm2, %v7239_v39, %v7240_v1 }
 0x4b1   : > { %v7243_v18 = vadd.f32 %v7241_v16, %v7131_v12 }
 0x4c7   : > { %v7351_v62 = vpop.f32.mrf.mxu0 }
 0x4c8   : > { %v7456_v63 = vpop.f32.mrf.mxu1  ;;  %v7357_v20 = vadd.f32 %v7351_v62, %v7243_v18 }
 0x4c9   : > { %v11205_v0 = vpop.f32.mrf.mxu0  ;;  %v7465_v5 = vrot.slane %v7456_v63, 1 }
 0x4ca   : > { %v11225_v2 = vpop.f32.mrf.mxu1 }
 0x4cb   : > { %v7354_v3 = vpop.f32.mrf.mxu0 }
 0x4cc   : > { %v7459_v25 = vpop.f32.mrf.mxu1 }
 0x4cd   : > { %v11206_v4 = vpop.f32.mrf.mxu0  ;;  %v7466_v14 = vrot.slane %v7459_v25, 1 }
 0x4ce   : > { %v11226_v6 = vpop.f32.mrf.mxu1 }
 0x4cf   : > { %v7467_v36 = vsel %vm656_vm1, %v7465_v5, %v7466_v14 }
 0x4d0   : > { %v7469_v26 = vadd.f32 %v7467_v36, %v7357_v20 }
 0x4e7   : > { %v7568_v15 = vpop.f32.mrf.mxu0 }
 0x4e8   : > { %v7695_v17 = vpop.f32.mrf.mxu1  ;;  %v7577_v22 = vrot.slane %v7568_v15, 2 }
 0x4e9   : > { %v11245_v19 = vpop.f32.mrf.mxu0 }
 0x4ea   : > { %v11265_v13 = vpop.f32.mrf.mxu1 }
 0x4eb   : > { %v7571_v21 = vpop.f32.mrf.mxu0 }
 0x4ec   : > { %v7578_v23 = vrot.slane %v7571_v21, 2  ;;  %v7698_v24 = vpop.f32.mrf.mxu1 }
 0x4ed   : > { %v11246_v27 = vpop.f32.mrf.mxu0 }
 0x4ee   : > { %v7579_v28 = vsel %vm769_vm2, %v7577_v22, %v7578_v23  ;;  %v11266_v29 = vpop.f32.mrf.mxu1 }
 0x4ef   : > { %v7581_v30 = vadd.f32 %v7579_v28, %v7469_v26 }
 0x4f1   : > { %v7582_v31 = vmul.f32 %v14825_v46, %v7581_v30 }
 0x4f3   : > { %v7583_v32 = vadd.f32 %v14834_v48, %v7582_v31 }
 0x4f5   : > { %v7584_v33 = vmax.f32 %v7583_v32, 0.0 }
 0x4f7   : > { %v7585_v34 = vpack.c.bf16 %v7584_v33, %v7584_v33 }
 0x4f9   : > { %9252 = vst [vmem:[%s13067_s30 + $0x18] sm:$0xf] %v7585_v34 }
 0x507   : > { %v7800_v35 = vpop.f32.mrf.mxu0 }
 0x508   : > { %v7912_v38 = vpop.f32.mrf.mxu1  ;;  %v7809_v45 = vrot.slane %v7800_v35, 1 }
 0x509   : > { %v11285_v40 = vpop.f32.mrf.mxu0  ;;  %v7921_v43 = vrot.slane %v7912_v38, 2 }
 0x50a   : > { %v11305_v41 = vpop.f32.mrf.mxu1 }
 0x50b   : > { %v7803_v44 = vpop.f32.mrf.mxu0 }
 0x50c   : > { %v7810_v47 = vrot.slane %v7803_v44, 1  ;;  %v7915_v9 = vpop.f32.mrf.mxu1 }
 0x50d   : > { %v7922_v11 = vrot.slane %v7915_v9, 2  ;;  %v11286_v49 = vpop.f32.mrf.mxu0 }
 0x50e   : > { %v7811_v37 = vsel %vm656_vm1, %v7809_v45, %v7810_v47  ;;  %v11306_v42 = vpop.f32.mrf.mxu1 }
 0x50f   : > { %v7813_v50 = vadd.f32 %v7811_v37, %v7695_v17  ;;  %v7923_v51 = vsel %vm769_vm2, %v7921_v43, %v7922_v11 }
 0x511   : > { %v7925_v52 = vadd.f32 %v7923_v51, %v7813_v50 }
 0x527   : > { %v8033_v53 = vpop.f32.mrf.mxu0 }
 0x528   : > { %v8138_v54 = vpop.f32.mrf.mxu1  ;;  %v8039_v1 = vadd.f32 %v8033_v53, %v7925_v52 }
 0x529   : > { %v11325_v55 = vpop.f32.mrf.mxu0  ;;  %v8147_v6 = vrot.slane %v8138_v54, 1 }
 0x52a   : > { %v11345_v56 = vpop.f32.mrf.mxu1 }
 0x52b   : > { %v8036_v57 = vpop.f32.mrf.mxu0 }
 0x52c   : > { %v8141_v58 = vpop.f32.mrf.mxu1 }
 0x52d   : > { %v11326_v59 = vpop.f32.mrf.mxu0  ;;  %v8148_v7 = vrot.slane %v8141_v58, 1 }
 0x52e   : > { %v11346_v60 = vpop.f32.mrf.mxu1 }
 0x52f   : > { %v8149_v10 = vsel %vm656_vm1, %v8147_v6, %v8148_v7 }
 0x530   : > { %v8151_v5 = vadd.f32 %v8149_v10, %v8039_v1 }
 0x547   : > { %v8250_v61 = vpop.f32.mrf.mxu0 }
 0x548   : > { %v8371_v62 = vpop.f32.mrf.mxu1  ;;  %v8259_v39 = vrot.slane %v8250_v61, 2 }
 0x549   : > { %v11365_v63 = vpop.f32.mrf.mxu0 }
 0x54a   : > { %v11385_v0 = vpop.f32.mrf.mxu1 }
 0x54b   : > { %v8253_v2 = vpop.f32.mrf.mxu0 }
 0x54c   : > { %v8374_v3 = vpop.f32.mrf.mxu1  ;;  %v8260_v8 = vrot.slane %v8253_v2, 2 }
 0x54d   : > { %v11366_v25 = vpop.f32.mrf.mxu0 }
 0x54e   : > { %v11386_v4 = vpop.f32.mrf.mxu1  ;;  %v8261_v12 = vsel %vm769_vm2, %v8259_v39, %v8260_v8 }
 0x54f   : > { %v8263_v16 = vadd.f32 %v8261_v12, %v8151_v5 }
 0x551   : > { %v8377_v21 = vadd.f32 %v8371_v62, %v8263_v16 }
 0x567   : > { %v8476_v14 = vpop.f32.mrf.mxu0 }
 0x568   : > { %v8588_v15 = vpop.f32.mrf.mxu1  ;;  %v8485_v36 = vrot.slane %v8476_v14, 1 }
 0x569   : > { %v11405_v17 = vpop.f32.mrf.mxu0  ;;  %v8597_v24 = vrot.slane %v8588_v15, 2 }
 0x56a   : > { %v11425_v18 = vpop.f32.mrf.mxu1 }
 0x56b   : > { %v8479_v19 = vpop.f32.mrf.mxu0 }
 0x56c   : > { %v8486_v13 = vrot.slane %v8479_v19, 1  ;;  %v8591_v20 = vpop.f32.mrf.mxu1 }
 0x56d   : > { %v8598_v22 = vrot.slane %v8591_v20, 2  ;;  %v11406_v23 = vpop.f32.mrf.mxu0 }
 0x56e   : > { %v8487_v26 = vsel %vm656_vm1, %v8485_v36, %v8486_v13  ;;  %v11426_v27 = vpop.f32.mrf.mxu1 }
 0x56f   : > { %v8489_v28 = vadd.f32 %v8487_v26, %v8377_v21  ;;  %v8599_v29 = vsel %vm769_vm2, %v8597_v24, %v8598_v22 }
 0x571   : > { %v8601_v30 = vadd.f32 %v8599_v29, %v8489_v28 }
 0x573   : > { %v8602_v31 = vmul.f32 %v14825_v46, %v8601_v30 }
 0x575   : > { %v8603_v32 = vadd.f32 %v14834_v48, %v8602_v31 }
 0x577   : > { %v8604_v33 = vmax.f32 %v8603_v32, 0.0 }
 0x579   : > { %v8605_v34 = vpack.c.bf16 %v8604_v33, %v8604_v33 }
 0x57b   : > { %9334 = vst [vmem:[%s13067_s30 + $0x1c] sm:$0xf] %v8605_v34 }
 0x57c PF: > { %p11_p9 = scmp.ge.s32.totalorder %s12129_s19, 4   ;;  %s15051_s15 = smov %s12079_s16 }
 0x57d   : > { %s15052_s16 = smov %s12138_s22  ;;  %s15053_s17 = smov %s12129_s19 }
 0x57e   :  { %13 = sbr.rel (!%p11_p9) target bundleno = 2 (0x2), region = 142 }

</bundles_post_ra>
